<compile_context>
chip_gen: v5e
topology: v5e:2x2
jax: 0.10.0
libtpu: 0.0.40
codegen_flags: <defaults>
</compile_context>

<pallas_src>
import numpy as np
import jax
import jax.numpy as jnp
from jax import lax
from jax.experimental import pallas as pl
from jax.experimental.pallas import tpu as pltpu

# ---- model dimensions (small, consistent with the module structure) ----
N_RAYS      = 64     # ray feature count
ENC_H       = 32     # shared ray-encoder width
RAY_OUT     = 32     # RayNetwork output size
STATE_H     = 32
STATE_OUT   = 32     # StateNetwork output size
COMB        = RAY_OUT + STATE_OUT
OUT_H       = 64     # OutputNetwork MLP width
LSTM_H      = 32     # OutputNetwork recurrent hidden size
N_OUT       = 256    # model.get_output_size(): number of Halton directions
TOP_K       = 50     # Halton2dDecoderFactory.max_sum50_decoder
MAX_RAY_LEN = 10.0
LN_EPS      = 1e-5   # norm_type == "layer_norm"; dropout is eval-mode identity

SLAB_A_W = 128       # slab for all <=128-lane weights / biases / Halton table
SLAB_B_W = 256       # slab for the 256-wide learned ray decoder

# packed state-slab lane layout (input): rel | vel | pad | h0 | c0 | pad
STATE_W     = 128
ST_REL_OFF  = 0      # lanes 0:3
ST_VEL_OFF  = 3      # lanes 3:6
ST_H_OFF    = 32     # lanes 32:64
ST_C_OFF    = 64     # lanes 64:96

# output slab layout (lane offsets within the single (B, 128) output)
OUT_W     = 128
OUT_D_OFF = 0        # lanes 0:3   -> unit direction (x, y, z)
OUT_H_OFF = 32       # lanes 32:64 -> h_new
OUT_C_OFF = 64       # lanes 64:96 -> c_new

THRESH_ITERS = 16    # binary-search iterations (ties near K-th value kept)


# ----------------------------------------------------------------------------
# Weight-slab packing: every segment is a (rows, cols<=width) f32 block stored
# in rows [r0, r0+rows) / cols [0, cols).  Matrix blocks are 8-row aligned;
# 1-row vectors are packed densely.  Offsets are Python ints -> all in-kernel
# slices are static.
# ----------------------------------------------------------------------------
def _pack_slab(segments, width):
    offs, r, chunks = {}, 0, []
    for name, arr in segments:
        a = np.asarray(arr, np.float32)
        if a.ndim == 1:
            a = a[None, :]
        nr, nc = a.shape
        assert nc <= width, (name, nc, width)
        align = 8 if nr > 1 else 1
        start = ((r + align - 1) // align) * align
        if start > r:
            chunks.append(np.zeros((start - r, width), np.float32))
        blk = np.zeros((nr, width), np.float32)
        blk[:, :nc] = a
        chunks.append(blk)
        offs[name] = (start, nr, nc)
        r = start + nr
    pad = (-r) % 8
    if pad:
        chunks.append(np.zeros((pad, width), np.float32))
    return jnp.asarray(np.concatenate(chunks, axis=0)), offs


# ----------------------------------------------------------------------------
# Fused kernel: RayModel forward + LSTM cell + learned ray decoder + Halton
# "max_sum50" direction decode.
# ----------------------------------------------------------------------------
def _make_fused_kernel(off_a, off_b, bb):
    def kernel(rays_ref, state_ref, a_ref, b_ref, out_ref):
        f32 = jnp.float32

        def seg_a(name):                       # full 2-D block from slab A
            r0, nr, nc = off_a[name]
            return a_ref[r0:r0 + nr, 0:nc]

        def seg_b(name):
            r0, nr, nc = off_b[name]
            return b_ref[r0:r0 + nr, 0:nc]

        def row_a(name, i=0):                  # single (1, nc) row (bias / LN / vec)
            r0, _, nc = off_a[name]
            return a_ref[r0 + i:r0 + i + 1, 0:nc]

        def row_b(name, i=0):
            r0, _, nc = off_b[name]
            return b_ref[r0 + i:r0 + i + 1, 0:nc]

        def layer_norm(x, gname, bname):
            # one-pass form: mean and mean-of-squares are independent reductions
            mu = jnp.mean(x, axis=-1, keepdims=True)
            ms = jnp.mean(x * x, axis=-1, keepdims=True)
            var = ms - mu * mu
            return (x - mu) * lax.rsqrt(var + LN_EPS) * row_a(gname) + row_a(bname)

        rays = rays_ref[...].astype(f32)
        rel  = state_ref[:, ST_REL_OFF:ST_REL_OFF + 3].astype(f32)
        vel  = state_ref[:, ST_VEL_OFF:ST_VEL_OFF + 3].astype(f32)
        h0   = state_ref[:, ST_H_OFF:ST_H_OFF + LSTM_H].astype(f32)
        c0   = state_ref[:, ST_C_OFF:ST_C_OFF + LSTM_H].astype(f32)

        # ---- RayNetwork (shared RayEncoder + ray head) ----
        # TODO(synk): exact RayNetwork/RayEncoder internals not provided; this is a
        # faithful-in-spirit MLP with max-ray-length normalization.
        rays_n = jnp.clip(rays, 0.0, MAX_RAY_LEN) * (1.0 / MAX_RAY_LEN)
        enc = jnp.maximum(
            jnp.dot(rays_n, seg_a("w_enc"), preferred_element_type=f32)
            + row_a("b_enc"), 0.0)
        enc = layer_norm(enc, "g_enc", "be_enc")
        # rel_pos_norm = torch.norm(rel_pos, dim=-1, keepdim=True) (in-kernel)
        rpn = jnp.sqrt(jnp.sum(rel * rel, axis=-1, keepdims=True))
        rpn = jnp.clip(rpn * (1.0 / MAX_RAY_LEN), 0.0, 1.0)               # (B, 1)
        # concat([enc, rpn]) @ W  ==  enc @ W_e + rpn * w_r  (split-matmul form)
        ray_feat = jnp.maximum(
            jnp.dot(enc, seg_a("w_ray_e"), preferred_element_type=f32)
            + rpn * row_a("w_ray_r") + row_a("b_ray"), 0.0)               # (B, RAY_OUT)

        # ---- StateNetwork ----
        # TODO(synk): StateNetwork internals not provided; concat(rel_pos, vel) MLP.
        # robot_radius is None in this configuration and therefore unused.
        s = (jnp.dot(rel, seg_a("w_s1p"), preferred_element_type=f32)
             + jnp.dot(vel, seg_a("w_s1v"), preferred_element_type=f32)
             + row_a("b_s1"))
        s = jnp.maximum(s, 0.0)
        s = layer_norm(s, "g_s", "be_s")
        state_feat = jnp.maximum(
            jnp.dot(s, seg_a("w_s2"), preferred_element_type=f32) + row_a("b_s2"), 0.0)

        # ---- OutputNetwork MLP: split matmul == matmul of cat([ray, state]) ----
        o = jnp.maximum(
            jnp.dot(ray_feat, seg_a("w_o1_ray"), preferred_element_type=f32)
            + jnp.dot(state_feat, seg_a("w_o1_state"), preferred_element_type=f32)
            + row_a("b_o1"), 0.0)
        o = layer_norm(o, "g_o", "be_o")

        # ---- LSTM cell (PyTorch gate order i, f, g, o), gate-separate matmuls so
        #      every gate pre-activation lands at lane offset 0 (no lane slicing).
        rih, nih, _ = off_a["w_ih"]
        rhh, nhh, _ = off_a["w_hh"]

        def gate_pre(k, bias_name):
            w_ih_k = a_ref[rih:rih + nih, LSTM_H * k:LSTM_H * (k + 1)]
            w_hh_k = a_ref[rhh:rhh + nhh, LSTM_H * k:LSTM_H * (k + 1)]
            return (jnp.dot(o, w_ih_k, preferred_element_type=f32)
                    + jnp.dot(h0, w_hh_k, preferred_element_type=f32)
                    + row_a(bias_name))

        i_g = jax.nn.sigmoid(gate_pre(0, "b_lstm_i"))
        f_g = jax.nn.sigmoid(gate_pre(1, "b_lstm_f"))
        g_g = jnp.tanh(gate_pre(2, "b_lstm_g"))
        o_g = jax.nn.sigmoid(gate_pre(3, "b_lstm_o"))
        c_new = f_g * c0 + i_g * g_g
        h_new = o_g * jnp.tanh(c_new)

        # ---- learned ray decoder -> logits over N_OUT Halton directions ----
        y = (jnp.dot(h_new, seg_b("w_dec"), preferred_element_type=f32)
             + row_b("b_dec"))                                            # (B, N_OUT)

        # ---- fused Halton "max_sum50" decode ----
        # Softmax numerator only: the final direction is renormalized, so the
        # 1/sum(exp) factor cancels exactly and is skipped.
        m = jnp.max(y, axis=-1, keepdims=True)
        e = jnp.exp(y - m)                                                # in (0, 1]

        # Halton block stored as (N_OUT, 4) = [x | y | z | 1]; load once.
        hal_r0, _, _ = off_a["halton4"]
        hal4 = a_ref[hal_r0:hal_r0 + N_OUT, 0:4]                          # (256, 4)
        ones_col = a_ref[hal_r0:hal_r0 + N_OUT, 3:4]                      # (256, 1)

        # Top-K by value via per-row threshold binary search: keep the K largest
        # exp-weights.  Count goes through the MXU (dot with ones column) so the
        # serial chain avoids the 256-lane XLU reduce.  Unrolled for overlap.
        # TODO(synk): exact max_sum50 semantics unavailable; ties within ~2^-16 of
        # the K-th value are all kept (torch.topk would tie-break by index).
        lo0 = jnp.zeros((bb, 1), f32)
        hi0 = jnp.ones((bb, 1), f32)

        def search(_, carry):
            lo, hi = carry
            mid = 0.5 * (lo + hi)
            mask = (e > mid).astype(f32)
            cnt = jnp.dot(mask, ones_col, preferred_element_type=f32)     # (bb, 1)
            keep = cnt >= float(TOP_K)
            return (jnp.where(keep, mid, lo), jnp.where(keep, hi, mid))

        lo, _ = lax.fori_loop(0, THRESH_ITERS, search, (lo0, hi0), unroll=True)
        w = jnp.where(e > lo, e, 0.0)                                     # top-K weights

        # weighted sum of unit Halton directions: one MXU push, dir in lanes 0:3
        res = jnp.dot(w, hal4, preferred_element_type=f32)                # (bb, 4)
        d = res[:, 0:3]
        inv = lax.rsqrt(jnp.sum(d * d, axis=-1, keepdims=True) + 1e-12)
        dir_n = d * inv                                                   # (bb, 3)

        # single lane-dense (bb, 128) output slab built in registers: one store
        out_ref[...] = jnp.concatenate(
            [dir_n,
             jnp.zeros((bb, OUT_H_OFF - 3), f32),
             h_new,
             c_new,
             jnp.zeros((bb, OUT_W - OUT_C_OFF - LSTM_H), f32)], axis=-1)

    return kernel


# ----------------------------------------------------------------------------
# pallas_call wrapper
# ----------------------------------------------------------------------------
def _choose_bb(B):
    # sublane rule: bb must be a multiple of 8 or equal the full batch dim
    if B % 8 != 0:
        return B
    cap = min(1024, B)
    if B >= 16:                 # >= 2 grid steps so the "parallel" batch axis
        cap = min(cap, B // 2)  # spans both TensorCores on v7x
    bb = 8
    for d in range(8, cap + 1, 8):
        if B % d == 0:
            bb = d
    return bb


def _fused_forward_call(slab_a, off_a, slab_b, off_b, B):
    bb = _choose_bb(B)
    grid = (B // bb,)
    ra, wa = slab_a.shape
    rb, wb = slab_b.shape
    kernel = _make_fused_kernel(off_a, off_b, bb)
    # explicit VMEM budget from the actual block sizes (+ headroom)
    vmem_bytes = int(2 * 4 * (slab_a.size + slab_b.size
                              + bb * (N_RAYS + STATE_W + OUT_W))) + (2 << 20)
    return pl.pallas_call(
        kernel,
        out_shape=jax.ShapeDtypeStruct((B, OUT_W), jnp.float32),
        grid=grid,
        in_specs=[
            pl.BlockSpec((bb, N_RAYS), lambda i: (i, 0)),
            pl.BlockSpec((bb, STATE_W), lambda i: (i, 0)),
            pl.BlockSpec((ra, wa), lambda i: (0, 0)),
            pl.BlockSpec((rb, wb), lambda i: (0, 0)),
        ],
        out_specs=pl.BlockSpec((bb, OUT_W), lambda i: (i, 0)),
        compiler_params=pltpu.CompilerParams(
            dimension_semantics=("parallel",),
            vmem_limit_bytes=vmem_bytes),
    )


def ray_model_direction_wrapper_forward(model, rays, rel_pos, vel, hiddens=None):
    """RayModelDirectionConversionWrapper.forward (ray_decoding_learned=True)."""
    slab_a, off_a, slab_b, off_b = model
    if rays.ndim != 3 or rel_pos.ndim != 3 or vel.ndim != 3:
        raise ValueError("inputs must be (seq_len, batch, features)")
    S, B = rays.shape[0], rays.shape[1]
    assert S == 1, "torch wrapper's y.reshape(*y.shape[1:]) requires seq_len == 1"
    if hiddens is None:
        h0 = jnp.zeros((B, LSTM_H), jnp.float32)
        c0 = jnp.zeros((B, LSTM_H), jnp.float32)
    else:
        h0, c0 = hiddens

    rel = rel_pos.reshape(B, 3).astype(jnp.float32)
    v = vel.reshape(B, 3).astype(jnp.float32)
    # one lane-dense (B, 128) slab: rel | vel | pad | h0 | c0 | pad
    # TODO(synk): with input_output_aliases the h/c lanes could alias the output
    # slab for zero-copy recurrent stepping; omitted for the single-call demo.
    state_slab = jnp.concatenate(
        [rel, v,
         jnp.zeros((B, ST_H_OFF - 6), jnp.float32),
         h0.astype(jnp.float32), c0.astype(jnp.float32),
         jnp.zeros((B, STATE_W - ST_C_OFF - LSTM_H), jnp.float32)], axis=-1)

    call = _fused_forward_call(slab_a, off_a, slab_b, off_b, B)
    out = call(rays.reshape(B, N_RAYS).astype(jnp.float32), state_slab,
               slab_a, slab_b)
    d = out[:, OUT_D_OFF:OUT_D_OFF + 3]
    h_new = out[:, OUT_H_OFF:OUT_H_OFF + LSTM_H]
    c_new = out[:, OUT_C_OFF:OUT_C_OFF + LSTM_H]
    return d.reshape(S, B, 3), (h_new, c_new)


# ----------------------------------------------------------------------------
# Deterministic parameter / constant construction (no checkpoint loading)
# ----------------------------------------------------------------------------
def _linear_init(key, fan_in, fan_out):
    k1, k2 = jax.random.split(key)
    lim = 1.0 / np.sqrt(fan_in)
    w = np.asarray(jax.random.uniform(k1, (fan_in, fan_out), jnp.float32, -lim, lim))
    b = np.asarray(jax.random.uniform(k2, (fan_out,), jnp.float32, -lim, lim))
    return w, b


def _radical_inverse(n, base):
    f, r = 1.0, 0.0
    while n > 0:
        f /= base
        r += f * (n % base)
        n //= base
    return r


def make_halton_points(n):
    pts = np.zeros((n, 3), np.float32)
    for i in range(n):
        u1 = _radical_inverse(i + 1, 2)
        u2 = _radical_inverse(i + 1, 3)
        z = 1.0 - 2.0 * u2
        r = np.sqrt(max(0.0, 1.0 - z * z))
        phi = 2.0 * np.pi * u1
        pts[i] = (r * np.cos(phi), r * np.sin(phi), z)
    return pts


def init_model(key):
    ks = jax.random.split(key, 8)
    # shared ray encoder
    w_enc, b_enc = _linear_init(ks[0], N_RAYS, ENC_H)
    g_enc, be_enc = np.ones(ENC_H, np.float32), np.zeros(ENC_H, np.float32)
    # ray head (input = enc ++ rel_pos_norm)
    w_ray, b_ray = _linear_init(ks[1], ENC_H + 1, RAY_OUT)
    w_ray_e, w_ray_r = w_ray[:ENC_H], w_ray[ENC_H:]
    # state network (input = rel_pos ++ vel)
    w_s1, b_s1 = _linear_init(ks[2], 6, STATE_H)
    w_s1p, w_s1v = w_s1[:3], w_s1[3:]
    g_s, be_s = np.ones(STATE_H, np.float32), np.zeros(STATE_H, np.float32)
    w_s2, b_s2 = _linear_init(ks[3], STATE_H, STATE_OUT)
    # output network MLP (split into ray / state halves: cat order is [ray, state])
    w_o1, b_o1 = _linear_init(ks[4], COMB, OUT_H)
    w_o1_ray, w_o1_state = w_o1[:RAY_OUT], w_o1[RAY_OUT:]
    g_o, be_o = np.ones(OUT_H, np.float32), np.zeros(OUT_H, np.float32)
    # LSTM cell (i, f, g, o gate order; combined bias, split per gate)
    w_ih, b_ih = _linear_init(ks[5], OUT_H, 4 * LSTM_H)
    w_hh, b_hh = _linear_init(ks[6], LSTM_H, 4 * LSTM_H)
    b_lstm = b_ih + b_hh
    b_gates = [b_lstm[LSTM_H * k:LSTM_H * (k + 1)] for k in range(4)]
    # learned ray decoder -> logits over N_OUT Halton directions
    w_dec, b_dec = _linear_init(ks[7], LSTM_H, N_OUT)
    # Halton table stored as (N_OUT, 4) = [x | y | z | 1] so the decode count
    # and the weighted direction sums both run on the MXU.
    pts = make_halton_points(N_OUT)                               # (N_OUT, 3)
    halton4 = np.concatenate([pts, np.ones((N_OUT, 1), np.float32)], axis=1)

    slab_a, off_a = _pack_slab(
        [("w_enc", w_enc), ("w_ray_e", w_ray_e), ("w_s1p", w_s1p), ("w_s1v", w_s1v),
         ("w_s2", w_s2), ("w_o1_ray", w_o1_ray), ("w_o1_state", w_o1_state),
         ("w_ih", w_ih), ("w_hh", w_hh), ("halton4", halton4),
         ("b_enc", b_enc), ("g_enc", g_enc), ("be_enc", be_enc),
         ("w_ray_r", w_ray_r), ("b_ray", b_ray),
         ("b_s1", b_s1), ("g_s", g_s), ("be_s", be_s), ("b_s2", b_s2),
         ("b_o1", b_o1), ("g_o", g_o), ("be_o", be_o),
         ("b_lstm_i", b_gates[0]), ("b_lstm_f", b_gates[1]),
         ("b_lstm_g", b_gates[2]), ("b_lstm_o", b_gates[3])],
        SLAB_A_W)
    slab_b, off_b = _pack_slab(
        [("w_dec", w_dec), ("b_dec", b_dec)], SLAB_B_W)
    return slab_a, off_a, slab_b, off_b


if __name__ == "__main__":
    key = jax.random.PRNGKey(0)
    kp, kr, krel, kv = jax.random.split(key, 4)

    model = init_model(kp)

    S, B = 1, 8
    rays = jax.random.uniform(kr, (S, B, N_RAYS), jnp.float32, 0.0, MAX_RAY_LEN)
    rel_pos = jax.random.normal(krel, (S, B, 3), jnp.float32) * 3.0
    vel = jax.random.normal(kv, (S, B, 3), jnp.float32)

    y, hiddens = ray_model_direction_wrapper_forward(model, rays, rel_pos, vel,
                                                     hiddens=None)
    y = jax.block_until_ready(y)
    jax.block_until_ready(hiddens)

    assert y.shape == (S, B, 3)
    assert hiddens[0].shape == (B, LSTM_H) and hiddens[1].shape == (B, LSTM_H)
    assert bool(jnp.all(jnp.isfinite(y)))
    # directions are renormalized to unit length
    norms = jnp.sqrt(jnp.sum(y * y, axis=-1))
    assert bool(jnp.all(jnp.abs(norms - 1.0) < 1e-3))
    assert bool(jnp.all(jnp.isfinite(hiddens[0]))) and bool(jnp.all(jnp.isfinite(hiddens[1])))
    print("KERNEL_OK")
</pallas_src>

<mosaic_0001>
module attributes {stable_mosaic.version = 11 : i64} {
  func.func @kernel(%arg0: i32, %arg1: memref<8x64xf32, #tpu.memory_space<vmem>>, %arg2: memref<8x128xf32, #tpu.memory_space<vmem>>, %arg3: memref<576x128xf32, #tpu.memory_space<vmem>>, %arg4: memref<40x256xf32, #tpu.memory_space<vmem>>, %arg5: memref<8x128xf32, #tpu.memory_space<vmem>>) attributes {dimension_semantics = [#tpu.dimension_semantics<parallel>], iteration_bounds = array<i64: 1>, scalar_prefetch = 0 : i64, scratch_operands = 0 : i64, tpu.core_type = #tpu.core_type<tc>, window_params = [{transform_indices = @transform_0, window_bounds = array<i64: 8, 64>}, {transform_indices = @transform_1, window_bounds = array<i64: 8, 128>}, {pipeline_mode = #tpu.pipeline_mode<synchronous>, transform_indices = @transform_2, window_bounds = array<i64: 576, 128>}, {pipeline_mode = #tpu.pipeline_mode<synchronous>, transform_indices = @transform_3, window_bounds = array<i64: 40, 256>}, {transform_indices = @transform_4, window_bounds = array<i64: 8, 128>}]} {
    %c0 = arith.constant 0 : index
    %c0_0 = arith.constant 0 : index
    %0 = vector.load %arg1[%c0, %c0_0] : memref<8x64xf32, #tpu.memory_space<vmem>>, vector<8x64xf32>
    %c0_1 = arith.constant 0 : index
    %c0_2 = arith.constant 0 : index
    %1 = vector.load %arg2[%c0_1, %c0_2] : memref<8x128xf32, #tpu.memory_space<vmem>>, vector<8x3xf32>
    %c0_3 = arith.constant 0 : index
    %c3 = arith.constant 3 : index
    %2 = vector.load %arg2[%c0_3, %c3] : memref<8x128xf32, #tpu.memory_space<vmem>>, vector<8x3xf32>
    %c0_4 = arith.constant 0 : index
    %c32 = arith.constant 32 : index
    %3 = vector.load %arg2[%c0_4, %c32] : memref<8x128xf32, #tpu.memory_space<vmem>>, vector<8x32xf32>
    %c0_5 = arith.constant 0 : index
    %c64 = arith.constant 64 : index
    %4 = vector.load %arg2[%c0_5, %c64] : memref<8x128xf32, #tpu.memory_space<vmem>>, vector<8x32xf32>
    %cst = arith.constant 0.000000e+00 : f32
    %cst_6 = arith.constant 1.000000e+01 : f32
    %5 = vector.broadcast %cst : f32 to vector<8x64xf32>
    %6 = arith.maximumf %5, %0 : vector<8x64xf32>
    %7 = vector.broadcast %cst_6 : f32 to vector<8x64xf32>
    %8 = arith.minimumf %7, %6 : vector<8x64xf32>
    %cst_7 = arith.constant 1.000000e-01 : f32
    %9 = vector.broadcast %cst_7 : f32 to vector<8x64xf32>
    %10 = arith.mulf %8, %9 : vector<8x64xf32>
    %c0_8 = arith.constant 0 : index
    %c0_9 = arith.constant 0 : index
    %11 = vector.load %arg3[%c0_8, %c0_9] : memref<576x128xf32, #tpu.memory_space<vmem>>, vector<64x32xf32>
    %cst_10 = arith.constant dense<0.000000e+00> : vector<8x32xf32>
    %12 = tpu.matmul %10, %11, %cst_10 {dimension_numbers = #tpu.dot_dimension_numbers<[1], [0], [0], [1], [0, 0, 1, 1], [], []>} : vector<8x64xf32>, vector<64x32xf32>, vector<8x32xf32> -> vector<8x32xf32>
    %c560 = arith.constant 560 : index
    %c0_11 = arith.constant 0 : index
    %13 = vector.load %arg3[%c560, %c0_11] : memref<576x128xf32, #tpu.memory_space<vmem>>, vector<1x32xf32>
    %14 = vector.broadcast %13 : vector<1x32xf32> to vector<8x32xf32>
    %15 = arith.addf %12, %14 : vector<8x32xf32>
    %cst_12 = arith.constant 0.000000e+00 : f32
    %16 = vector.broadcast %cst_12 : f32 to vector<8x32xf32>
    %17 = arith.maximumf %15, %16 : vector<8x32xf32>
    %cst_13 = arith.constant dense<0.000000e+00> : vector<8xf32>
    %18 = vector.multi_reduction <add>, %17, %cst_13 [1] : vector<8x32xf32> to vector<8xf32>
    %19 = vector.shape_cast %18 : vector<8xf32> to vector<8x1xf32>
    %cst_14 = arith.constant 3.200000e+01 : f32
    %20 = vector.broadcast %cst_14 : f32 to vector<8x1xf32>
    %21 = arith.divf %19, %20 : vector<8x1xf32>
    %22 = arith.mulf %17, %17 : vector<8x32xf32>
    %cst_15 = arith.constant dense<0.000000e+00> : vector<8xf32>
    %23 = vector.multi_reduction <add>, %22, %cst_15 [1] : vector<8x32xf32> to vector<8xf32>
    %24 = vector.shape_cast %23 : vector<8xf32> to vector<8x1xf32>
    %cst_16 = arith.constant 3.200000e+01 : f32
    %25 = vector.broadcast %cst_16 : f32 to vector<8x1xf32>
    %26 = arith.divf %24, %25 : vector<8x1xf32>
    %27 = arith.mulf %21, %21 : vector<8x1xf32>
    %28 = arith.subf %26, %27 : vector<8x1xf32>
    %29 = vector.broadcast %21 : vector<8x1xf32> to vector<8x32xf32>
    %30 = arith.subf %17, %29 : vector<8x32xf32>
    %cst_17 = arith.constant 9.99999974E-6 : f32
    %31 = vector.broadcast %cst_17 : f32 to vector<8x1xf32>
    %32 = arith.addf %28, %31 : vector<8x1xf32>
    %33 = math.rsqrt %32 : vector<8x1xf32>
    %34 = vector.broadcast %33 : vector<8x1xf32> to vector<8x32xf32>
    %35 = arith.mulf %30, %34 : vector<8x32xf32>
    %c561 = arith.constant 561 : index
    %c0_18 = arith.constant 0 : index
    %36 = vector.load %arg3[%c561, %c0_18] : memref<576x128xf32, #tpu.memory_space<vmem>>, vector<1x32xf32>
    %37 = vector.broadcast %36 : vector<1x32xf32> to vector<8x32xf32>
    %38 = arith.mulf %35, %37 : vector<8x32xf32>
    %c562 = arith.constant 562 : index
    %c0_19 = arith.constant 0 : index
    %39 = vector.load %arg3[%c562, %c0_19] : memref<576x128xf32, #tpu.memory_space<vmem>>, vector<1x32xf32>
    %40 = vector.broadcast %39 : vector<1x32xf32> to vector<8x32xf32>
    %41 = arith.addf %38, %40 : vector<8x32xf32>
    %42 = arith.mulf %1, %1 : vector<8x3xf32>
    %cst_20 = arith.constant dense<0.000000e+00> : vector<8xf32>
    %43 = vector.multi_reduction <add>, %42, %cst_20 [1] : vector<8x3xf32> to vector<8xf32>
    %44 = vector.shape_cast %43 : vector<8xf32> to vector<8x1xf32>
    %45 = math.sqrt %44 : vector<8x1xf32>
    %cst_21 = arith.constant 1.000000e-01 : f32
    %46 = vector.broadcast %cst_21 : f32 to vector<8x1xf32>
    %47 = arith.mulf %45, %46 : vector<8x1xf32>
    %cst_22 = arith.constant 0.000000e+00 : f32
    %cst_23 = arith.constant 1.000000e+00 : f32
    %48 = vector.broadcast %cst_22 : f32 to vector<8x1xf32>
    %49 = arith.maximumf %48, %47 : vector<8x1xf32>
    %50 = vector.broadcast %cst_23 : f32 to vector<8x1xf32>
    %51 = arith.minimumf %50, %49 : vector<8x1xf32>
    %c64_24 = arith.constant 64 : index
    %c0_25 = arith.constant 0 : index
    %52 = vector.load %arg3[%c64_24, %c0_25] : memref<576x128xf32, #tpu.memory_space<vmem>>, vector<32x32xf32>
    %cst_26 = arith.constant dense<0.000000e+00> : vector<8x32xf32>
    %53 = tpu.matmul %41, %52, %cst_26 {dimension_numbers = #tpu.dot_dimension_numbers<[1], [0], [0], [1], [0, 0, 1, 1], [], []>} : vector<8x32xf32>, vector<32x32xf32>, vector<8x32xf32> -> vector<8x32xf32>
    %c563 = arith.constant 563 : index
    %c0_27 = arith.constant 0 : index
    %54 = vector.load %arg3[%c563, %c0_27] : memref<576x128xf32, #tpu.memory_space<vmem>>, vector<1x32xf32>
    %55 = vector.broadcast %51 : vector<8x1xf32> to vector<8x32xf32>
    %56 = vector.broadcast %54 : vector<1x32xf32> to vector<8x32xf32>
    %57 = arith.mulf %55, %56 : vector<8x32xf32>
    %58 = arith.addf %53, %57 : vector<8x32xf32>
    %c564 = arith.constant 564 : index
    %c0_28 = arith.constant 0 : index
    %59 = vector.load %arg3[%c564, %c0_28] : memref<576x128xf32, #tpu.memory_space<vmem>>, vector<1x32xf32>
    %60 = vector.broadcast %59 : vector<1x32xf32> to vector<8x32xf32>
    %61 = arith.addf %58, %60 : vector<8x32xf32>
    %cst_29 = arith.constant 0.000000e+00 : f32
    %62 = vector.broadcast %cst_29 : f32 to vector<8x32xf32>
    %63 = arith.maximumf %61, %62 : vector<8x32xf32>
    %c96 = arith.constant 96 : index
    %c0_30 = arith.constant 0 : index
    %64 = vector.load %arg3[%c96, %c0_30] : memref<576x128xf32, #tpu.memory_space<vmem>>, vector<3x32xf32>
    %cst_31 = arith.constant dense<0.000000e+00> : vector<8x32xf32>
    %65 = tpu.matmul %1, %64, %cst_31 {dimension_numbers = #tpu.dot_dimension_numbers<[1], [0], [0], [1], [0, 0, 1, 1], [], []>} : vector<8x3xf32>, vector<3x32xf32>, vector<8x32xf32> -> vector<8x32xf32>
    %c104 = arith.constant 104 : index
    %c0_32 = arith.constant 0 : index
    %66 = vector.load %arg3[%c104, %c0_32] : memref<576x128xf32, #tpu.memory_space<vmem>>, vector<3x32xf32>
    %cst_33 = arith.constant dense<0.000000e+00> : vector<8x32xf32>
    %67 = tpu.matmul %2, %66, %cst_33 {dimension_numbers = #tpu.dot_dimension_numbers<[1], [0], [0], [1], [0, 0, 1, 1], [], []>} : vector<8x3xf32>, vector<3x32xf32>, vector<8x32xf32> -> vector<8x32xf32>
    %68 = arith.addf %65, %67 : vector<8x32xf32>
    %c565 = arith.constant 565 : index
    %c0_34 = arith.constant 0 : index
    %69 = vector.load %arg3[%c565, %c0_34] : memref<576x128xf32, #tpu.memory_space<vmem>>, vector<1x32xf32>
    %70 = vector.broadcast %69 : vector<1x32xf32> to vector<8x32xf32>
    %71 = arith.addf %68, %70 : vector<8x32xf32>
    %cst_35 = arith.constant 0.000000e+00 : f32
    %72 = vector.broadcast %cst_35 : f32 to vector<8x32xf32>
    %73 = arith.maximumf %71, %72 : vector<8x32xf32>
    %cst_36 = arith.constant dense<0.000000e+00> : vector<8xf32>
    %74 = vector.multi_reduction <add>, %73, %cst_36 [1] : vector<8x32xf32> to vector<8xf32>
    %75 = vector.shape_cast %74 : vector<8xf32> to vector<8x1xf32>
    %cst_37 = arith.constant 3.200000e+01 : f32
    %76 = vector.broadcast %cst_37 : f32 to vector<8x1xf32>
    %77 = arith.divf %75, %76 : vector<8x1xf32>
    %78 = arith.mulf %73, %73 : vector<8x32xf32>
    %cst_38 = arith.constant dense<0.000000e+00> : vector<8xf32>
    %79 = vector.multi_reduction <add>, %78, %cst_38 [1] : vector<8x32xf32> to vector<8xf32>
    %80 = vector.shape_cast %79 : vector<8xf32> to vector<8x1xf32>
    %cst_39 = arith.constant 3.200000e+01 : f32
    %81 = vector.broadcast %cst_39 : f32 to vector<8x1xf32>
    %82 = arith.divf %80, %81 : vector<8x1xf32>
    %83 = arith.mulf %77, %77 : vector<8x1xf32>
    %84 = arith.subf %82, %83 : vector<8x1xf32>
    %85 = vector.broadcast %77 : vector<8x1xf32> to vector<8x32xf32>
    %86 = arith.subf %73, %85 : vector<8x32xf32>
    %cst_40 = arith.constant 9.99999974E-6 : f32
    %87 = vector.broadcast %cst_40 : f32 to vector<8x1xf32>
    %88 = arith.addf %84, %87 : vector<8x1xf32>
    %89 = math.rsqrt %88 : vector<8x1xf32>
    %90 = vector.broadcast %89 : vector<8x1xf32> to vector<8x32xf32>
    %91 = arith.mulf %86, %90 : vector<8x32xf32>
    %c566 = arith.constant 566 : index
    %c0_41 = arith.constant 0 : index
    %92 = vector.load %arg3[%c566, %c0_41] : memref<576x128xf32, #tpu.memory_space<vmem>>, vector<1x32xf32>
    %93 = vector.broadcast %92 : vector<1x32xf32> to vector<8x32xf32>
    %94 = arith.mulf %91, %93 : vector<8x32xf32>
    %c567 = arith.constant 567 : index
    %c0_42 = arith.constant 0 : index
    %95 = vector.load %arg3[%c567, %c0_42] : memref<576x128xf32, #tpu.memory_space<vmem>>, vector<1x32xf32>
    %96 = vector.broadcast %95 : vector<1x32xf32> to vector<8x32xf32>
    %97 = arith.addf %94, %96 : vector<8x32xf32>
    %c112 = arith.constant 112 : index
    %c0_43 = arith.constant 0 : index
    %98 = vector.load %arg3[%c112, %c0_43] : memref<576x128xf32, #tpu.memory_space<vmem>>, vector<32x32xf32>
    %cst_44 = arith.constant dense<0.000000e+00> : vector<8x32xf32>
    %99 = tpu.matmul %97, %98, %cst_44 {dimension_numbers = #tpu.dot_dimension_numbers<[1], [0], [0], [1], [0, 0, 1, 1], [], []>} : vector<8x32xf32>, vector<32x32xf32>, vector<8x32xf32> -> vector<8x32xf32>
    %c568 = arith.constant 568 : index
    %c0_45 = arith.constant 0 : index
    %100 = vector.load %arg3[%c568, %c0_45] : memref<576x128xf32, #tpu.memory_space<vmem>>, vector<1x32xf32>
    %101 = vector.broadcast %100 : vector<1x32xf32> to vector<8x32xf32>
    %102 = arith.addf %99, %101 : vector<8x32xf32>
    %cst_46 = arith.constant 0.000000e+00 : f32
    %103 = vector.broadcast %cst_46 : f32 to vector<8x32xf32>
    %104 = arith.maximumf %102, %103 : vector<8x32xf32>
    %c144 = arith.constant 144 : index
    %c0_47 = arith.constant 0 : index
    %105 = vector.load %arg3[%c144, %c0_47] : memref<576x128xf32, #tpu.memory_space<vmem>>, vector<32x64xf32>
    %cst_48 = arith.constant dense<0.000000e+00> : vector<8x64xf32>
    %106 = tpu.matmul %63, %105, %cst_48 {dimension_numbers = #tpu.dot_dimension_numbers<[1], [0], [0], [1], [0, 0, 1, 1], [], []>} : vector<8x32xf32>, vector<32x64xf32>, vector<8x64xf32> -> vector<8x64xf32>
    %c176 = arith.constant 176 : index
    %c0_49 = arith.constant 0 : index
    %107 = vector.load %arg3[%c176, %c0_49] : memref<576x128xf32, #tpu.memory_space<vmem>>, vector<32x64xf32>
    %cst_50 = arith.constant dense<0.000000e+00> : vector<8x64xf32>
    %108 = tpu.matmul %104, %107, %cst_50 {dimension_numbers = #tpu.dot_dimension_numbers<[1], [0], [0], [1], [0, 0, 1, 1], [], []>} : vector<8x32xf32>, vector<32x64xf32>, vector<8x64xf32> -> vector<8x64xf32>
    %109 = arith.addf %106, %108 : vector<8x64xf32>
    %c569 = arith.constant 569 : index
    %c0_51 = arith.constant 0 : index
    %110 = vector.load %arg3[%c569, %c0_51] : memref<576x128xf32, #tpu.memory_space<vmem>>, vector<1x64xf32>
    %111 = vector.broadcast %110 : vector<1x64xf32> to vector<8x64xf32>
    %112 = arith.addf %109, %111 : vector<8x64xf32>
    %cst_52 = arith.constant 0.000000e+00 : f32
    %113 = vector.broadcast %cst_52 : f32 to vector<8x64xf32>
    %114 = arith.maximumf %112, %113 : vector<8x64xf32>
    %cst_53 = arith.constant dense<0.000000e+00> : vector<8xf32>
    %115 = vector.multi_reduction <add>, %114, %cst_53 [1] : vector<8x64xf32> to vector<8xf32>
    %116 = vector.shape_cast %115 : vector<8xf32> to vector<8x1xf32>
    %cst_54 = arith.constant 6.400000e+01 : f32
    %117 = vector.broadcast %cst_54 : f32 to vector<8x1xf32>
    %118 = arith.divf %116, %117 : vector<8x1xf32>
    %119 = arith.mulf %114, %114 : vector<8x64xf32>
    %cst_55 = arith.constant dense<0.000000e+00> : vector<8xf32>
    %120 = vector.multi_reduction <add>, %119, %cst_55 [1] : vector<8x64xf32> to vector<8xf32>
    %121 = vector.shape_cast %120 : vector<8xf32> to vector<8x1xf32>
    %cst_56 = arith.constant 6.400000e+01 : f32
    %122 = vector.broadcast %cst_56 : f32 to vector<8x1xf32>
    %123 = arith.divf %121, %122 : vector<8x1xf32>
    %124 = arith.mulf %118, %118 : vector<8x1xf32>
    %125 = arith.subf %123, %124 : vector<8x1xf32>
    %126 = vector.broadcast %118 : vector<8x1xf32> to vector<8x64xf32>
    %127 = arith.subf %114, %126 : vector<8x64xf32>
    %cst_57 = arith.constant 9.99999974E-6 : f32
    %128 = vector.broadcast %cst_57 : f32 to vector<8x1xf32>
    %129 = arith.addf %125, %128 : vector<8x1xf32>
    %130 = math.rsqrt %129 : vector<8x1xf32>
    %131 = vector.broadcast %130 : vector<8x1xf32> to vector<8x64xf32>
    %132 = arith.mulf %127, %131 : vector<8x64xf32>
    %c570 = arith.constant 570 : index
    %c0_58 = arith.constant 0 : index
    %133 = vector.load %arg3[%c570, %c0_58] : memref<576x128xf32, #tpu.memory_space<vmem>>, vector<1x64xf32>
    %134 = vector.broadcast %133 : vector<1x64xf32> to vector<8x64xf32>
    %135 = arith.mulf %132, %134 : vector<8x64xf32>
    %c571 = arith.constant 571 : index
    %c0_59 = arith.constant 0 : index
    %136 = vector.load %arg3[%c571, %c0_59] : memref<576x128xf32, #tpu.memory_space<vmem>>, vector<1x64xf32>
    %137 = vector.broadcast %136 : vector<1x64xf32> to vector<8x64xf32>
    %138 = arith.addf %135, %137 : vector<8x64xf32>
    %c208 = arith.constant 208 : index
    %c0_60 = arith.constant 0 : index
    %139 = vector.load %arg3[%c208, %c0_60] : memref<576x128xf32, #tpu.memory_space<vmem>>, vector<64x32xf32>
    %c272 = arith.constant 272 : index
    %c0_61 = arith.constant 0 : index
    %140 = vector.load %arg3[%c272, %c0_61] : memref<576x128xf32, #tpu.memory_space<vmem>>, vector<32x32xf32>
    %cst_62 = arith.constant dense<0.000000e+00> : vector<8x32xf32>
    %141 = tpu.matmul %138, %139, %cst_62 {dimension_numbers = #tpu.dot_dimension_numbers<[1], [0], [0], [1], [0, 0, 1, 1], [], []>} : vector<8x64xf32>, vector<64x32xf32>, vector<8x32xf32> -> vector<8x32xf32>
    %cst_63 = arith.constant dense<0.000000e+00> : vector<8x32xf32>
    %142 = tpu.matmul %3, %140, %cst_63 {dimension_numbers = #tpu.dot_dimension_numbers<[1], [0], [0], [1], [0, 0, 1, 1], [], []>} : vector<8x32xf32>, vector<32x32xf32>, vector<8x32xf32> -> vector<8x32xf32>
    %143 = arith.addf %141, %142 : vector<8x32xf32>
    %c572 = arith.constant 572 : index
    %c0_64 = arith.constant 0 : index
    %144 = vector.load %arg3[%c572, %c0_64] : memref<576x128xf32, #tpu.memory_space<vmem>>, vector<1x32xf32>
    %145 = vector.broadcast %144 : vector<1x32xf32> to vector<8x32xf32>
    %146 = arith.addf %143, %145 : vector<8x32xf32>
    %147 = arith.negf %146 : vector<8x32xf32>
    %148 = math.exp %147 : vector<8x32xf32>
    %cst_65 = arith.constant 1.000000e+00 : f32
    %149 = vector.broadcast %cst_65 : f32 to vector<8x32xf32>
    %150 = arith.addf %149, %148 : vector<8x32xf32>
    %151 = arith.divf %149, %150 : vector<8x32xf32>
    %c208_66 = arith.constant 208 : index
    %c32_67 = arith.constant 32 : index
    %152 = vector.load %arg3[%c208_66, %c32_67] : memref<576x128xf32, #tpu.memory_space<vmem>>, vector<64x32xf32>
    %c272_68 = arith.constant 272 : index
    %c32_69 = arith.constant 32 : index
    %153 = vector.load %arg3[%c272_68, %c32_69] : memref<576x128xf32, #tpu.memory_space<vmem>>, vector<32x32xf32>
    %cst_70 = arith.constant dense<0.000000e+00> : vector<8x32xf32>
    %154 = tpu.matmul %138, %152, %cst_70 {dimension_numbers = #tpu.dot_dimension_numbers<[1], [0], [0], [1], [0, 0, 1, 1], [], []>} : vector<8x64xf32>, vector<64x32xf32>, vector<8x32xf32> -> vector<8x32xf32>
    %cst_71 = arith.constant dense<0.000000e+00> : vector<8x32xf32>
    %155 = tpu.matmul %3, %153, %cst_71 {dimension_numbers = #tpu.dot_dimension_numbers<[1], [0], [0], [1], [0, 0, 1, 1], [], []>} : vector<8x32xf32>, vector<32x32xf32>, vector<8x32xf32> -> vector<8x32xf32>
    %156 = arith.addf %154, %155 : vector<8x32xf32>
    %c573 = arith.constant 573 : index
    %c0_72 = arith.constant 0 : index
    %157 = vector.load %arg3[%c573, %c0_72] : memref<576x128xf32, #tpu.memory_space<vmem>>, vector<1x32xf32>
    %158 = vector.broadcast %157 : vector<1x32xf32> to vector<8x32xf32>
    %159 = arith.addf %156, %158 : vector<8x32xf32>
    %160 = arith.negf %159 : vector<8x32xf32>
    %161 = math.exp %160 : vector<8x32xf32>
    %cst_73 = arith.constant 1.000000e+00 : f32
    %162 = vector.broadcast %cst_73 : f32 to vector<8x32xf32>
    %163 = arith.addf %162, %161 : vector<8x32xf32>
    %164 = arith.divf %162, %163 : vector<8x32xf32>
    %c208_74 = arith.constant 208 : index
    %c64_75 = arith.constant 64 : index
    %165 = vector.load %arg3[%c208_74, %c64_75] : memref<576x128xf32, #tpu.memory_space<vmem>>, vector<64x32xf32>
    %c272_76 = arith.constant 272 : index
    %c64_77 = arith.constant 64 : index
    %166 = vector.load %arg3[%c272_76, %c64_77] : memref<576x128xf32, #tpu.memory_space<vmem>>, vector<32x32xf32>
    %cst_78 = arith.constant dense<0.000000e+00> : vector<8x32xf32>
    %167 = tpu.matmul %138, %165, %cst_78 {dimension_numbers = #tpu.dot_dimension_numbers<[1], [0], [0], [1], [0, 0, 1, 1], [], []>} : vector<8x64xf32>, vector<64x32xf32>, vector<8x32xf32> -> vector<8x32xf32>
    %cst_79 = arith.constant dense<0.000000e+00> : vector<8x32xf32>
    %168 = tpu.matmul %3, %166, %cst_79 {dimension_numbers = #tpu.dot_dimension_numbers<[1], [0], [0], [1], [0, 0, 1, 1], [], []>} : vector<8x32xf32>, vector<32x32xf32>, vector<8x32xf32> -> vector<8x32xf32>
    %169 = arith.addf %167, %168 : vector<8x32xf32>
    %c574 = arith.constant 574 : index
    %c0_80 = arith.constant 0 : index
    %170 = vector.load %arg3[%c574, %c0_80] : memref<576x128xf32, #tpu.memory_space<vmem>>, vector<1x32xf32>
    %171 = vector.broadcast %170 : vector<1x32xf32> to vector<8x32xf32>
    %172 = arith.addf %169, %171 : vector<8x32xf32>
    %173 = math.tanh %172 : vector<8x32xf32>
    %c208_81 = arith.constant 208 : index
    %c96_82 = arith.constant 96 : index
    %174 = vector.load %arg3[%c208_81, %c96_82] : memref<576x128xf32, #tpu.memory_space<vmem>>, vector<64x32xf32>
    %c272_83 = arith.constant 272 : index
    %c96_84 = arith.constant 96 : index
    %175 = vector.load %arg3[%c272_83, %c96_84] : memref<576x128xf32, #tpu.memory_space<vmem>>, vector<32x32xf32>
    %cst_85 = arith.constant dense<0.000000e+00> : vector<8x32xf32>
    %176 = tpu.matmul %138, %174, %cst_85 {dimension_numbers = #tpu.dot_dimension_numbers<[1], [0], [0], [1], [0, 0, 1, 1], [], []>} : vector<8x64xf32>, vector<64x32xf32>, vector<8x32xf32> -> vector<8x32xf32>
    %cst_86 = arith.constant dense<0.000000e+00> : vector<8x32xf32>
    %177 = tpu.matmul %3, %175, %cst_86 {dimension_numbers = #tpu.dot_dimension_numbers<[1], [0], [0], [1], [0, 0, 1, 1], [], []>} : vector<8x32xf32>, vector<32x32xf32>, vector<8x32xf32> -> vector<8x32xf32>
    %178 = arith.addf %176, %177 : vector<8x32xf32>
    %c575 = arith.constant 575 : index
    %c0_87 = arith.constant 0 : index
    %179 = vector.load %arg3[%c575, %c0_87] : memref<576x128xf32, #tpu.memory_space<vmem>>, vector<1x32xf32>
    %180 = vector.broadcast %179 : vector<1x32xf32> to vector<8x32xf32>
    %181 = arith.addf %178, %180 : vector<8x32xf32>
    %182 = arith.negf %181 : vector<8x32xf32>
    %183 = math.exp %182 : vector<8x32xf32>
    %cst_88 = arith.constant 1.000000e+00 : f32
    %184 = vector.broadcast %cst_88 : f32 to vector<8x32xf32>
    %185 = arith.addf %184, %183 : vector<8x32xf32>
    %186 = arith.divf %184, %185 : vector<8x32xf32>
    %187 = arith.mulf %164, %4 : vector<8x32xf32>
    %188 = arith.mulf %151, %173 : vector<8x32xf32>
    %189 = arith.addf %187, %188 : vector<8x32xf32>
    %190 = math.tanh %189 : vector<8x32xf32>
    %191 = arith.mulf %186, %190 : vector<8x32xf32>
    %c0_89 = arith.constant 0 : index
    %c0_90 = arith.constant 0 : index
    %192 = vector.load %arg4[%c0_89, %c0_90] : memref<40x256xf32, #tpu.memory_space<vmem>>, vector<32x256xf32>
    %cst_91 = arith.constant dense<0.000000e+00> : vector<8x256xf32>
    %193 = tpu.matmul %191, %192, %cst_91 {dimension_numbers = #tpu.dot_dimension_numbers<[1], [0], [0], [1], [0, 0, 1, 1], [], []>} : vector<8x32xf32>, vector<32x256xf32>, vector<8x256xf32> -> vector<8x256xf32>
    %c32_92 = arith.constant 32 : index
    %c0_93 = arith.constant 0 : index
    %194 = vector.load %arg4[%c32_92, %c0_93] : memref<40x256xf32, #tpu.memory_space<vmem>>, vector<1x256xf32>
    %195 = vector.broadcast %194 : vector<1x256xf32> to vector<8x256xf32>
    %196 = arith.addf %193, %195 : vector<8x256xf32>
    %cst_94 = arith.constant dense<0xFF800000> : vector<8xf32>
    %197 = vector.multi_reduction <maximumf>, %196, %cst_94 [1] : vector<8x256xf32> to vector<8xf32>
    %198 = vector.shape_cast %197 : vector<8xf32> to vector<8x1xf32>
    %199 = vector.broadcast %198 : vector<8x1xf32> to vector<8x256xf32>
    %200 = arith.subf %196, %199 : vector<8x256xf32>
    %201 = math.exp %200 : vector<8x256xf32>
    %c304 = arith.constant 304 : index
    %c0_95 = arith.constant 0 : index
    %202 = vector.load %arg3[%c304, %c0_95] : memref<576x128xf32, #tpu.memory_space<vmem>>, vector<256x4xf32>
    %c304_96 = arith.constant 304 : index
    %c3_97 = arith.constant 3 : index
    %203 = vector.load %arg3[%c304_96, %c3_97] : memref<576x128xf32, #tpu.memory_space<vmem>>, vector<256x1xf32>
    %cst_98 = arith.constant 0.000000e+00 : f32
    %204 = vector.broadcast %cst_98 : f32 to vector<8x1xf32>
    %cst_99 = arith.constant 1.000000e+00 : f32
    %205 = vector.broadcast %cst_99 : f32 to vector<8x1xf32>
    %c0_i32 = arith.constant 0 : i32
    %206 = arith.addf %204, %205 : vector<8x1xf32>
    %cst_100 = arith.constant 5.000000e-01 : f32
    %207 = vector.broadcast %cst_100 : f32 to vector<8x1xf32>
    %208 = arith.mulf %207, %206 : vector<8x1xf32>
    %209 = vector.broadcast %208 : vector<8x1xf32> to vector<8x256xf32>
    %210 = arith.cmpf ogt, %201, %209 : vector<8x256xf32>
    %211 = arith.extui %210 : vector<8x256xi1> to vector<8x256xi32>
    %212 = arith.sitofp %211 : vector<8x256xi32> to vector<8x256xf32>
    %cst_101 = arith.constant dense<0.000000e+00> : vector<8x1xf32>
    %213 = tpu.matmul %212, %203, %cst_101 {dimension_numbers = #tpu.dot_dimension_numbers<[1], [0], [0], [1], [0, 0, 1, 1], [], []>} : vector<8x256xf32>, vector<256x1xf32>, vector<8x1xf32> -> vector<8x1xf32>
    %cst_102 = arith.constant 5.000000e+01 : f32
    %214 = vector.broadcast %cst_102 : f32 to vector<8x1xf32>
    %215 = arith.cmpf oge, %213, %214 : vector<8x1xf32>
    %216 = arith.select %215, %208, %204 : vector<8x1xi1>, vector<8x1xf32>
    %217 = arith.select %215, %205, %208 : vector<8x1xi1>, vector<8x1xf32>
    %c1_i32 = arith.constant 1 : i32
    %218 = arith.addf %216, %217 : vector<8x1xf32>
    %cst_103 = arith.constant 5.000000e-01 : f32
    %219 = vector.broadcast %cst_103 : f32 to vector<8x1xf32>
    %220 = arith.mulf %219, %218 : vector<8x1xf32>
    %221 = vector.broadcast %220 : vector<8x1xf32> to vector<8x256xf32>
    %222 = arith.cmpf ogt, %201, %221 : vector<8x256xf32>
    %223 = arith.extui %222 : vector<8x256xi1> to vector<8x256xi32>
    %224 = arith.sitofp %223 : vector<8x256xi32> to vector<8x256xf32>
    %cst_104 = arith.constant dense<0.000000e+00> : vector<8x1xf32>
    %225 = tpu.matmul %224, %203, %cst_104 {dimension_numbers = #tpu.dot_dimension_numbers<[1], [0], [0], [1], [0, 0, 1, 1], [], []>} : vector<8x256xf32>, vector<256x1xf32>, vector<8x1xf32> -> vector<8x1xf32>
    %cst_105 = arith.constant 5.000000e+01 : f32
    %226 = vector.broadcast %cst_105 : f32 to vector<8x1xf32>
    %227 = arith.cmpf oge, %225, %226 : vector<8x1xf32>
    %228 = arith.select %227, %220, %216 : vector<8x1xi1>, vector<8x1xf32>
    %229 = arith.select %227, %217, %220 : vector<8x1xi1>, vector<8x1xf32>
    %c2_i32 = arith.constant 2 : i32
    %230 = arith.addf %228, %229 : vector<8x1xf32>
    %cst_106 = arith.constant 5.000000e-01 : f32
    %231 = vector.broadcast %cst_106 : f32 to vector<8x1xf32>
    %232 = arith.mulf %231, %230 : vector<8x1xf32>
    %233 = vector.broadcast %232 : vector<8x1xf32> to vector<8x256xf32>
    %234 = arith.cmpf ogt, %201, %233 : vector<8x256xf32>
    %235 = arith.extui %234 : vector<8x256xi1> to vector<8x256xi32>
    %236 = arith.sitofp %235 : vector<8x256xi32> to vector<8x256xf32>
    %cst_107 = arith.constant dense<0.000000e+00> : vector<8x1xf32>
    %237 = tpu.matmul %236, %203, %cst_107 {dimension_numbers = #tpu.dot_dimension_numbers<[1], [0], [0], [1], [0, 0, 1, 1], [], []>} : vector<8x256xf32>, vector<256x1xf32>, vector<8x1xf32> -> vector<8x1xf32>
    %cst_108 = arith.constant 5.000000e+01 : f32
    %238 = vector.broadcast %cst_108 : f32 to vector<8x1xf32>
    %239 = arith.cmpf oge, %237, %238 : vector<8x1xf32>
    %240 = arith.select %239, %232, %228 : vector<8x1xi1>, vector<8x1xf32>
    %241 = arith.select %239, %229, %232 : vector<8x1xi1>, vector<8x1xf32>
    %c3_i32 = arith.constant 3 : i32
    %242 = arith.addf %240, %241 : vector<8x1xf32>
    %cst_109 = arith.constant 5.000000e-01 : f32
    %243 = vector.broadcast %cst_109 : f32 to vector<8x1xf32>
    %244 = arith.mulf %243, %242 : vector<8x1xf32>
    %245 = vector.broadcast %244 : vector<8x1xf32> to vector<8x256xf32>
    %246 = arith.cmpf ogt, %201, %245 : vector<8x256xf32>
    %247 = arith.extui %246 : vector<8x256xi1> to vector<8x256xi32>
    %248 = arith.sitofp %247 : vector<8x256xi32> to vector<8x256xf32>
    %cst_110 = arith.constant dense<0.000000e+00> : vector<8x1xf32>
    %249 = tpu.matmul %248, %203, %cst_110 {dimension_numbers = #tpu.dot_dimension_numbers<[1], [0], [0], [1], [0, 0, 1, 1], [], []>} : vector<8x256xf32>, vector<256x1xf32>, vector<8x1xf32> -> vector<8x1xf32>
    %cst_111 = arith.constant 5.000000e+01 : f32
    %250 = vector.broadcast %cst_111 : f32 to vector<8x1xf32>
    %251 = arith.cmpf oge, %249, %250 : vector<8x1xf32>
    %252 = arith.select %251, %244, %240 : vector<8x1xi1>, vector<8x1xf32>
    %253 = arith.select %251, %241, %244 : vector<8x1xi1>, vector<8x1xf32>
    %c4_i32 = arith.constant 4 : i32
    %254 = arith.addf %252, %253 : vector<8x1xf32>
    %cst_112 = arith.constant 5.000000e-01 : f32
    %255 = vector.broadcast %cst_112 : f32 to vector<8x1xf32>
    %256 = arith.mulf %255, %254 : vector<8x1xf32>
    %257 = vector.broadcast %256 : vector<8x1xf32> to vector<8x256xf32>
    %258 = arith.cmpf ogt, %201, %257 : vector<8x256xf32>
    %259 = arith.extui %258 : vector<8x256xi1> to vector<8x256xi32>
    %260 = arith.sitofp %259 : vector<8x256xi32> to vector<8x256xf32>
    %cst_113 = arith.constant dense<0.000000e+00> : vector<8x1xf32>
    %261 = tpu.matmul %260, %203, %cst_113 {dimension_numbers = #tpu.dot_dimension_numbers<[1], [0], [0], [1], [0, 0, 1, 1], [], []>} : vector<8x256xf32>, vector<256x1xf32>, vector<8x1xf32> -> vector<8x1xf32>
    %cst_114 = arith.constant 5.000000e+01 : f32
    %262 = vector.broadcast %cst_114 : f32 to vector<8x1xf32>
    %263 = arith.cmpf oge, %261, %262 : vector<8x1xf32>
    %264 = arith.select %263, %256, %252 : vector<8x1xi1>, vector<8x1xf32>
    %265 = arith.select %263, %253, %256 : vector<8x1xi1>, vector<8x1xf32>
    %c5_i32 = arith.constant 5 : i32
    %266 = arith.addf %264, %265 : vector<8x1xf32>
    %cst_115 = arith.constant 5.000000e-01 : f32
    %267 = vector.broadcast %cst_115 : f32 to vector<8x1xf32>
    %268 = arith.mulf %267, %266 : vector<8x1xf32>
    %269 = vector.broadcast %268 : vector<8x1xf32> to vector<8x256xf32>
    %270 = arith.cmpf ogt, %201, %269 : vector<8x256xf32>
    %271 = arith.extui %270 : vector<8x256xi1> to vector<8x256xi32>
    %272 = arith.sitofp %271 : vector<8x256xi32> to vector<8x256xf32>
    %cst_116 = arith.constant dense<0.000000e+00> : vector<8x1xf32>
    %273 = tpu.matmul %272, %203, %cst_116 {dimension_numbers = #tpu.dot_dimension_numbers<[1], [0], [0], [1], [0, 0, 1, 1], [], []>} : vector<8x256xf32>, vector<256x1xf32>, vector<8x1xf32> -> vector<8x1xf32>
    %cst_117 = arith.constant 5.000000e+01 : f32
    %274 = vector.broadcast %cst_117 : f32 to vector<8x1xf32>
    %275 = arith.cmpf oge, %273, %274 : vector<8x1xf32>
    %276 = arith.select %275, %268, %264 : vector<8x1xi1>, vector<8x1xf32>
    %277 = arith.select %275, %265, %268 : vector<8x1xi1>, vector<8x1xf32>
    %c6_i32 = arith.constant 6 : i32
    %278 = arith.addf %276, %277 : vector<8x1xf32>
    %cst_118 = arith.constant 5.000000e-01 : f32
    %279 = vector.broadcast %cst_118 : f32 to vector<8x1xf32>
    %280 = arith.mulf %279, %278 : vector<8x1xf32>
    %281 = vector.broadcast %280 : vector<8x1xf32> to vector<8x256xf32>
    %282 = arith.cmpf ogt, %201, %281 : vector<8x256xf32>
    %283 = arith.extui %282 : vector<8x256xi1> to vector<8x256xi32>
    %284 = arith.sitofp %283 : vector<8x256xi32> to vector<8x256xf32>
    %cst_119 = arith.constant dense<0.000000e+00> : vector<8x1xf32>
    %285 = tpu.matmul %284, %203, %cst_119 {dimension_numbers = #tpu.dot_dimension_numbers<[1], [0], [0], [1], [0, 0, 1, 1], [], []>} : vector<8x256xf32>, vector<256x1xf32>, vector<8x1xf32> -> vector<8x1xf32>
    %cst_120 = arith.constant 5.000000e+01 : f32
    %286 = vector.broadcast %cst_120 : f32 to vector<8x1xf32>
    %287 = arith.cmpf oge, %285, %286 : vector<8x1xf32>
    %288 = arith.select %287, %280, %276 : vector<8x1xi1>, vector<8x1xf32>
    %289 = arith.select %287, %277, %280 : vector<8x1xi1>, vector<8x1xf32>
    %c7_i32 = arith.constant 7 : i32
    %290 = arith.addf %288, %289 : vector<8x1xf32>
    %cst_121 = arith.constant 5.000000e-01 : f32
    %291 = vector.broadcast %cst_121 : f32 to vector<8x1xf32>
    %292 = arith.mulf %291, %290 : vector<8x1xf32>
    %293 = vector.broadcast %292 : vector<8x1xf32> to vector<8x256xf32>
    %294 = arith.cmpf ogt, %201, %293 : vector<8x256xf32>
    %295 = arith.extui %294 : vector<8x256xi1> to vector<8x256xi32>
    %296 = arith.sitofp %295 : vector<8x256xi32> to vector<8x256xf32>
    %cst_122 = arith.constant dense<0.000000e+00> : vector<8x1xf32>
    %297 = tpu.matmul %296, %203, %cst_122 {dimension_numbers = #tpu.dot_dimension_numbers<[1], [0], [0], [1], [0, 0, 1, 1], [], []>} : vector<8x256xf32>, vector<256x1xf32>, vector<8x1xf32> -> vector<8x1xf32>
    %cst_123 = arith.constant 5.000000e+01 : f32
    %298 = vector.broadcast %cst_123 : f32 to vector<8x1xf32>
    %299 = arith.cmpf oge, %297, %298 : vector<8x1xf32>
    %300 = arith.select %299, %292, %288 : vector<8x1xi1>, vector<8x1xf32>
    %301 = arith.select %299, %289, %292 : vector<8x1xi1>, vector<8x1xf32>
    %c8_i32 = arith.constant 8 : i32
    %302 = arith.addf %300, %301 : vector<8x1xf32>
    %cst_124 = arith.constant 5.000000e-01 : f32
    %303 = vector.broadcast %cst_124 : f32 to vector<8x1xf32>
    %304 = arith.mulf %303, %302 : vector<8x1xf32>
    %305 = vector.broadcast %304 : vector<8x1xf32> to vector<8x256xf32>
    %306 = arith.cmpf ogt, %201, %305 : vector<8x256xf32>
    %307 = arith.extui %306 : vector<8x256xi1> to vector<8x256xi32>
    %308 = arith.sitofp %307 : vector<8x256xi32> to vector<8x256xf32>
    %cst_125 = arith.constant dense<0.000000e+00> : vector<8x1xf32>
    %309 = tpu.matmul %308, %203, %cst_125 {dimension_numbers = #tpu.dot_dimension_numbers<[1], [0], [0], [1], [0, 0, 1, 1], [], []>} : vector<8x256xf32>, vector<256x1xf32>, vector<8x1xf32> -> vector<8x1xf32>
    %cst_126 = arith.constant 5.000000e+01 : f32
    %310 = vector.broadcast %cst_126 : f32 to vector<8x1xf32>
    %311 = arith.cmpf oge, %309, %310 : vector<8x1xf32>
    %312 = arith.select %311, %304, %300 : vector<8x1xi1>, vector<8x1xf32>
    %313 = arith.select %311, %301, %304 : vector<8x1xi1>, vector<8x1xf32>
    %c9_i32 = arith.constant 9 : i32
    %314 = arith.addf %312, %313 : vector<8x1xf32>
    %cst_127 = arith.constant 5.000000e-01 : f32
    %315 = vector.broadcast %cst_127 : f32 to vector<8x1xf32>
    %316 = arith.mulf %315, %314 : vector<8x1xf32>
    %317 = vector.broadcast %316 : vector<8x1xf32> to vector<8x256xf32>
    %318 = arith.cmpf ogt, %201, %317 : vector<8x256xf32>
    %319 = arith.extui %318 : vector<8x256xi1> to vector<8x256xi32>
    %320 = arith.sitofp %319 : vector<8x256xi32> to vector<8x256xf32>
    %cst_128 = arith.constant dense<0.000000e+00> : vector<8x1xf32>
    %321 = tpu.matmul %320, %203, %cst_128 {dimension_numbers = #tpu.dot_dimension_numbers<[1], [0], [0], [1], [0, 0, 1, 1], [], []>} : vector<8x256xf32>, vector<256x1xf32>, vector<8x1xf32> -> vector<8x1xf32>
    %cst_129 = arith.constant 5.000000e+01 : f32
    %322 = vector.broadcast %cst_129 : f32 to vector<8x1xf32>
    %323 = arith.cmpf oge, %321, %322 : vector<8x1xf32>
    %324 = arith.select %323, %316, %312 : vector<8x1xi1>, vector<8x1xf32>
    %325 = arith.select %323, %313, %316 : vector<8x1xi1>, vector<8x1xf32>
    %c10_i32 = arith.constant 10 : i32
    %326 = arith.addf %324, %325 : vector<8x1xf32>
    %cst_130 = arith.constant 5.000000e-01 : f32
    %327 = vector.broadcast %cst_130 : f32 to vector<8x1xf32>
    %328 = arith.mulf %327, %326 : vector<8x1xf32>
    %329 = vector.broadcast %328 : vector<8x1xf32> to vector<8x256xf32>
    %330 = arith.cmpf ogt, %201, %329 : vector<8x256xf32>
    %331 = arith.extui %330 : vector<8x256xi1> to vector<8x256xi32>
    %332 = arith.sitofp %331 : vector<8x256xi32> to vector<8x256xf32>
    %cst_131 = arith.constant dense<0.000000e+00> : vector<8x1xf32>
    %333 = tpu.matmul %332, %203, %cst_131 {dimension_numbers = #tpu.dot_dimension_numbers<[1], [0], [0], [1], [0, 0, 1, 1], [], []>} : vector<8x256xf32>, vector<256x1xf32>, vector<8x1xf32> -> vector<8x1xf32>
    %cst_132 = arith.constant 5.000000e+01 : f32
    %334 = vector.broadcast %cst_132 : f32 to vector<8x1xf32>
    %335 = arith.cmpf oge, %333, %334 : vector<8x1xf32>
    %336 = arith.select %335, %328, %324 : vector<8x1xi1>, vector<8x1xf32>
    %337 = arith.select %335, %325, %328 : vector<8x1xi1>, vector<8x1xf32>
    %c11_i32 = arith.constant 11 : i32
    %338 = arith.addf %336, %337 : vector<8x1xf32>
    %cst_133 = arith.constant 5.000000e-01 : f32
    %339 = vector.broadcast %cst_133 : f32 to vector<8x1xf32>
    %340 = arith.mulf %339, %338 : vector<8x1xf32>
    %341 = vector.broadcast %340 : vector<8x1xf32> to vector<8x256xf32>
    %342 = arith.cmpf ogt, %201, %341 : vector<8x256xf32>
    %343 = arith.extui %342 : vector<8x256xi1> to vector<8x256xi32>
    %344 = arith.sitofp %343 : vector<8x256xi32> to vector<8x256xf32>
    %cst_134 = arith.constant dense<0.000000e+00> : vector<8x1xf32>
    %345 = tpu.matmul %344, %203, %cst_134 {dimension_numbers = #tpu.dot_dimension_numbers<[1], [0], [0], [1], [0, 0, 1, 1], [], []>} : vector<8x256xf32>, vector<256x1xf32>, vector<8x1xf32> -> vector<8x1xf32>
    %cst_135 = arith.constant 5.000000e+01 : f32
    %346 = vector.broadcast %cst_135 : f32 to vector<8x1xf32>
    %347 = arith.cmpf oge, %345, %346 : vector<8x1xf32>
    %348 = arith.select %347, %340, %336 : vector<8x1xi1>, vector<8x1xf32>
    %349 = arith.select %347, %337, %340 : vector<8x1xi1>, vector<8x1xf32>
    %c12_i32 = arith.constant 12 : i32
    %350 = arith.addf %348, %349 : vector<8x1xf32>
    %cst_136 = arith.constant 5.000000e-01 : f32
    %351 = vector.broadcast %cst_136 : f32 to vector<8x1xf32>
    %352 = arith.mulf %351, %350 : vector<8x1xf32>
    %353 = vector.broadcast %352 : vector<8x1xf32> to vector<8x256xf32>
    %354 = arith.cmpf ogt, %201, %353 : vector<8x256xf32>
    %355 = arith.extui %354 : vector<8x256xi1> to vector<8x256xi32>
    %356 = arith.sitofp %355 : vector<8x256xi32> to vector<8x256xf32>
    %cst_137 = arith.constant dense<0.000000e+00> : vector<8x1xf32>
    %357 = tpu.matmul %356, %203, %cst_137 {dimension_numbers = #tpu.dot_dimension_numbers<[1], [0], [0], [1], [0, 0, 1, 1], [], []>} : vector<8x256xf32>, vector<256x1xf32>, vector<8x1xf32> -> vector<8x1xf32>
    %cst_138 = arith.constant 5.000000e+01 : f32
    %358 = vector.broadcast %cst_138 : f32 to vector<8x1xf32>
    %359 = arith.cmpf oge, %357, %358 : vector<8x1xf32>
    %360 = arith.select %359, %352, %348 : vector<8x1xi1>, vector<8x1xf32>
    %361 = arith.select %359, %349, %352 : vector<8x1xi1>, vector<8x1xf32>
    %c13_i32 = arith.constant 13 : i32
    %362 = arith.addf %360, %361 : vector<8x1xf32>
    %cst_139 = arith.constant 5.000000e-01 : f32
    %363 = vector.broadcast %cst_139 : f32 to vector<8x1xf32>
    %364 = arith.mulf %363, %362 : vector<8x1xf32>
    %365 = vector.broadcast %364 : vector<8x1xf32> to vector<8x256xf32>
    %366 = arith.cmpf ogt, %201, %365 : vector<8x256xf32>
    %367 = arith.extui %366 : vector<8x256xi1> to vector<8x256xi32>
    %368 = arith.sitofp %367 : vector<8x256xi32> to vector<8x256xf32>
    %cst_140 = arith.constant dense<0.000000e+00> : vector<8x1xf32>
    %369 = tpu.matmul %368, %203, %cst_140 {dimension_numbers = #tpu.dot_dimension_numbers<[1], [0], [0], [1], [0, 0, 1, 1], [], []>} : vector<8x256xf32>, vector<256x1xf32>, vector<8x1xf32> -> vector<8x1xf32>
    %cst_141 = arith.constant 5.000000e+01 : f32
    %370 = vector.broadcast %cst_141 : f32 to vector<8x1xf32>
    %371 = arith.cmpf oge, %369, %370 : vector<8x1xf32>
    %372 = arith.select %371, %364, %360 : vector<8x1xi1>, vector<8x1xf32>
    %373 = arith.select %371, %361, %364 : vector<8x1xi1>, vector<8x1xf32>
    %c14_i32 = arith.constant 14 : i32
    %374 = arith.addf %372, %373 : vector<8x1xf32>
    %cst_142 = arith.constant 5.000000e-01 : f32
    %375 = vector.broadcast %cst_142 : f32 to vector<8x1xf32>
    %376 = arith.mulf %375, %374 : vector<8x1xf32>
    %377 = vector.broadcast %376 : vector<8x1xf32> to vector<8x256xf32>
    %378 = arith.cmpf ogt, %201, %377 : vector<8x256xf32>
    %379 = arith.extui %378 : vector<8x256xi1> to vector<8x256xi32>
    %380 = arith.sitofp %379 : vector<8x256xi32> to vector<8x256xf32>
    %cst_143 = arith.constant dense<0.000000e+00> : vector<8x1xf32>
    %381 = tpu.matmul %380, %203, %cst_143 {dimension_numbers = #tpu.dot_dimension_numbers<[1], [0], [0], [1], [0, 0, 1, 1], [], []>} : vector<8x256xf32>, vector<256x1xf32>, vector<8x1xf32> -> vector<8x1xf32>
    %cst_144 = arith.constant 5.000000e+01 : f32
    %382 = vector.broadcast %cst_144 : f32 to vector<8x1xf32>
    %383 = arith.cmpf oge, %381, %382 : vector<8x1xf32>
    %384 = arith.select %383, %376, %372 : vector<8x1xi1>, vector<8x1xf32>
    %385 = arith.select %383, %373, %376 : vector<8x1xi1>, vector<8x1xf32>
    %c15_i32 = arith.constant 15 : i32
    %386 = arith.addf %384, %385 : vector<8x1xf32>
    %cst_145 = arith.constant 5.000000e-01 : f32
    %387 = vector.broadcast %cst_145 : f32 to vector<8x1xf32>
    %388 = arith.mulf %387, %386 : vector<8x1xf32>
    %389 = vector.broadcast %388 : vector<8x1xf32> to vector<8x256xf32>
    %390 = arith.cmpf ogt, %201, %389 : vector<8x256xf32>
    %391 = arith.extui %390 : vector<8x256xi1> to vector<8x256xi32>
    %392 = arith.sitofp %391 : vector<8x256xi32> to vector<8x256xf32>
    %cst_146 = arith.constant dense<0.000000e+00> : vector<8x1xf32>
    %393 = tpu.matmul %392, %203, %cst_146 {dimension_numbers = #tpu.dot_dimension_numbers<[1], [0], [0], [1], [0, 0, 1, 1], [], []>} : vector<8x256xf32>, vector<256x1xf32>, vector<8x1xf32> -> vector<8x1xf32>
    %cst_147 = arith.constant 5.000000e+01 : f32
    %394 = vector.broadcast %cst_147 : f32 to vector<8x1xf32>
    %395 = arith.cmpf oge, %393, %394 : vector<8x1xf32>
    %396 = arith.select %395, %388, %384 : vector<8x1xi1>, vector<8x1xf32>
    %397 = arith.select %395, %385, %388 : vector<8x1xi1>, vector<8x1xf32>
    %398 = vector.broadcast %396 : vector<8x1xf32> to vector<8x256xf32>
    %399 = arith.cmpf ogt, %201, %398 : vector<8x256xf32>
    %cst_148 = arith.constant 0.000000e+00 : f32
    %400 = vector.broadcast %cst_148 : f32 to vector<8x256xf32>
    %401 = arith.select %399, %201, %400 : vector<8x256xi1>, vector<8x256xf32>
    %cst_149 = arith.constant dense<0.000000e+00> : vector<8x4xf32>
    %402 = tpu.matmul %401, %202, %cst_149 {dimension_numbers = #tpu.dot_dimension_numbers<[1], [0], [0], [1], [0, 0, 1, 1], [], []>} : vector<8x256xf32>, vector<256x4xf32>, vector<8x4xf32> -> vector<8x4xf32>
    %403 = vector.extract_strided_slice %402 {offsets = [0, 0], sizes = [8, 3], strides = [1, 1]} : vector<8x4xf32> to vector<8x3xf32>
    %404 = arith.mulf %403, %403 : vector<8x3xf32>
    %cst_150 = arith.constant dense<0.000000e+00> : vector<8xf32>
    %405 = vector.multi_reduction <add>, %404, %cst_150 [1] : vector<8x3xf32> to vector<8xf32>
    %406 = vector.shape_cast %405 : vector<8xf32> to vector<8x1xf32>
    %cst_151 = arith.constant 9.99999996E-13 : f32
    %407 = vector.broadcast %cst_151 : f32 to vector<8x1xf32>
    %408 = arith.addf %406, %407 : vector<8x1xf32>
    %409 = math.rsqrt %408 : vector<8x1xf32>
    %410 = vector.broadcast %409 : vector<8x1xf32> to vector<8x3xf32>
    %411 = arith.mulf %403, %410 : vector<8x3xf32>
    %cst_152 = arith.constant 0.000000e+00 : f32
    %412 = vector.broadcast %cst_152 : f32 to vector<8x29xf32>
    %cst_153 = arith.constant 0.000000e+00 : f32
    %413 = vector.broadcast %cst_153 : f32 to vector<8x32xf32>
    %414 = tpu.concatenate %411, %412, %191, %189, %413 in 1 : vector<8x3xf32>, vector<8x29xf32>, vector<8x32xf32>, vector<8x32xf32>, vector<8x32xf32> -> vector<8x128xf32>
    %c0_154 = arith.constant 0 : index
    %c0_155 = arith.constant 0 : index
    %415 = vector.load %arg5[%c0_154, %c0_155] : memref<8x128xf32, #tpu.memory_space<vmem>>, vector<8x128xf32>
    tpu.vector_store %arg5[%c0_154, %c0_155], %414 {strides = array<i32>} : memref<8x128xf32, #tpu.memory_space<vmem>>, vector<8x128xf32>,
    return
  }
  func.func @transform_0(%arg0: i32) -> (i32, i32) {
    %c0_i32 = arith.constant 0 : i32
    %c0_i32_0 = arith.constant 0 : i32
    return %arg0, %c0_i32 : i32, i32
  }
  func.func @transform_1(%arg0: i32) -> (i32, i32) {
    %c0_i32 = arith.constant 0 : i32
    %c0_i32_0 = arith.constant 0 : i32
    return %arg0, %c0_i32 : i32, i32
  }
  func.func @transform_2(%arg0: i32) -> (i32, i32) {
    %c0_i32 = arith.constant 0 : i32
    %c0_i32_0 = arith.constant 0 : i32
    %c0_i32_1 = arith.constant 0 : i32
    return %c0_i32, %c0_i32_0 : i32, i32
  }
  func.func @transform_3(%arg0: i32) -> (i32, i32) {
    %c0_i32 = arith.constant 0 : i32
    %c0_i32_0 = arith.constant 0 : i32
    %c0_i32_1 = arith.constant 0 : i32
    return %c0_i32, %c0_i32_0 : i32, i32
  }
  func.func @transform_4(%arg0: i32) -> (i32, i32) {
    %c0_i32 = arith.constant 0 : i32
    %c0_i32_0 = arith.constant 0 : i32
    return %arg0, %c0_i32 : i32, i32
  }
}

</mosaic_0001>

<bundles_post_ra>
// kernel: tpu_custom_call.1
= control target key start
LH: loop header
LB: loop body
LE: loop exit
PB: predicated region body
PF: predicated region fallthrough
CT: control target
= control target key end

     0   :  { %9 = vsyncpa [#allocation3], 0  ;;  %s3427_s0 = inlined_call_operand.hbm [shape: f32[8,64], index: 0, kind: input, shape index: {}]   ;;  %s3428_s1 = inlined_call_operand.hbm [shape: f32[8,128], index: 1, kind: input, shape index: {}]   ;;  %s3429_s2 = inlined_call_operand.hbm [shape: f32[576,128], index: 2, kind: input, shape index: {}]   ;;  %s3430_s3 = inlined_call_operand.hbm [shape: f32[40,256], index: 3, kind: input, shape index: {}]   ;;  %s3431_s4 = inlined_call_operand.hbm [shape: f32[8,128], index: 4, kind: output, shape index: {}]  }
   0x1   :  { %10 = vsyncpa [#allocation6], 0 }
   0x2   :  { %11 = vsyncpa [#allocation9], 0  ;;  %s29_s17 = sshll.u32 %s3428_s1, 4  ;;  %s30_s17 = int_to_ptr.hbm [resolvable:$true] %s29_s17 }
   0x3   :  { %12 = vsyncpa [#allocation4], 0  ;;  %s2503_s18 = smov [#allocation5]   ;;  %s18_s22 = sshll.u32 %s3427_s0, 4  ;;  %s19_s22 = int_to_ptr.hbm [resolvable:$true] %s18_s22 }
   0x4   :  { %s31_s19 = sshll.u32 %s2503_s18, 4  ;;  %s2504_s23 = smov [#allocation2]   ;;  %s32_s19 = int_to_ptr.vmem [resolvable:$true] %s31_s19 }
   0x5   :  { %34 = dma.hbm_to_vmem [thread:$0]  %s30_s17, 128, %s32_s19, [#allocation6]  }
   0x6   :  { %s20_s24 = sshll.u32 %s2504_s23, 4  ;;  %s39_s27 = sshll.u32 %s3429_s2, 4  ;;  %s21_s24 = int_to_ptr.vmem [resolvable:$true] %s20_s24  ;;  %s40_s27 = int_to_ptr.hbm [resolvable:$true] %s39_s27 }
   0x7   :  { %23 = dma.hbm_to_vmem [thread:$0]  %s19_s22, 128, %s21_s24, [#allocation3]  }
   0x8   :  { %s2505_s1 = smov [#allocation7]   ;;  %s52_s5 = sshll.u32 %s3430_s3, 4  ;;  %s53_s5 = int_to_ptr.hbm [resolvable:$true] %s52_s5 }
   0x9   :  { %s41_s28 = sshll.u32 %s2505_s1, 4  ;;  %s2506_s6 = smov 128   ;;  %s42_s28 = int_to_ptr.vmem [resolvable:$true] %s41_s28 }
   0xa   :  { %s2507_s0 = smov 8   ;;  %s2508_s7 = smov [#allocation8]  }
   0xb   :  { %47 = dma.hbm_to_vmem [thread:$0]  %s40_s27, 9216, %s42_s28, [#allocation6], %s2506_s6, %s2506_s6, %s2507_s0  }
   0xc   :  { %s54_s8 = sshll.u32 %s2508_s7, 4  ;;  %s2509_s9 = smov 256   ;;  %s55_s8 = int_to_ptr.vmem [resolvable:$true] %s54_s8 }
   0xd   :  { %s2510_s10 = smov 16  }
   0xe   :  { %60 = dma.hbm_to_vmem [thread:$0]  %s53_s5, 1280, %s55_s8, [#allocation9], %s2509_s9, %s2509_s9, %s2510_s10  }
   0xf   :  { %2495 = dma.done.wait [#allocation3], 128  }
  0x10   :  { %2496 = vsyncadd [#allocation3], 4294967168 }
  0x11   :  { %2497 = dma.done.wait [#allocation6], 9344  }
  0x12   :  { %2498 = vsyncadd [#allocation6], 4294957952 }
  0x13   :  { %2499 = dma.done.wait [#allocation9], 1280  }
  0x14   :  { %2500 = vsyncadd [#allocation9], 4294966016  ;;  %vm216_vm0 = vcmask 1042432   ;;  %v2559_v0 = vld [vmem:[#allocation5] sm:$0xff]  ;;  %v210_v1 = vld [vmem:[#allocation7 + $0x68] sm:$0x7] }
  0x15   :  { %v209_v2 = vld [vmem:[#allocation7 + $0x60] sm:$0x7]  ;;  %s2511_s2 = smov 125   ;;  %2015 = vmatpush.msk.msra.mxu2 %vm216_vm0, %v210_v1  ;;  %vm156_vm1 = vcmask 23552   ;;  %v89_v3 = vld [vmem:[#allocation7 + $0x38] sm:$0xff]  ;;  %v88_v4 = vld [vmem:[#allocation7 + $0x30] sm:$0xff]  ;;  %v155_v32 = vmul.f32 %v2559_v0, %v2559_v0 }
  0x16   :  { %212 = vrot.lane.b32.xlu0 %v2559_v0, %s2511_s2  ;;  %2017 = vmatpush.msk.msra.mxu3 %vm216_vm0, %v209_v2  ;;  %v87_v5 = vld [vmem:[#allocation7 + $0x28] sm:$0xff]  ;;  %v77_v6 = vld [vmem:[#allocation2] sm:$0xff]  ;;  %v86_v7 = vld [vmem:[#allocation7 + $0x20] sm:$0xff]  ;;  %vm92_vm2 = vcmask 523264   ;;  %vm117_vm3 = vcmask 261120   ;;  %v2512_v34 = vmov 32.0  }
  0x17   :  { %2018 = vmatmul.msk.f32.vlgmr.msra.gmra.mxu3 %vm156_vm1, %v2559_v0  ;;  %104 = vmatpush.msra.mxu0 %v89_v3  ;;  %v79_v8 = vmax.f32 %v77_v6, 0.0  ;;  %v85_v9 = vld [vmem:[#allocation7 + $0x18] sm:$0xff]  ;;  %v84_v10 = vld [vmem:[#allocation7 + $0x10] sm:$0xff]  ;;  %v83_v12 = vld [vmem:[#allocation7 + $0x8] sm:$0xff]  ;;  %v157_v33 = vsel %vm156_vm1, %v155_v32, 0.0  ;;  %2309 = vrcp.f32 %v2512_v34  ;;  %s2513_s3 = smov 96  }
  0x18   :  { %v82_v13 = vld [vmem:[#allocation7] sm:$0xff]  ;;  %v2294_v16 = vld [vmem:[#allocation7 + $0x230] ss:$0 sm:$0xff]  ;;  %v2293_v23 = vld [vmem:[#allocation7 + $0x235] ss:$0 sm:$0xff]  ;;  %s2514_s11 = smov 64  }
  0x19   :  { %105 = vmatpush.msra.mxu0 %v88_v4  ;;  %v80_v11 = vmin.f32 %v79_v8, 10.0  ;;  %v302_v39 = vld [vmem:[#allocation7 + $0x88] sm:$0xff]  ;;  %v301_v41 = vld [vmem:[#allocation7 + $0x80] sm:$0xff]  ;;  %v300_v42 = vld [vmem:[#allocation7 + $0x78] sm:$0xff]  ;;  %s2515_s12 = smov 32   ;;  %s2521_s13 = smov [#allocation10]  }
  0x1a   :  { %320 = vmatpush.msrb.mxu2 %v302_v39  ;;  %v299_v44 = vld [vmem:[#allocation7 + $0x70] sm:$0xff]  ;;  %v178_v48 = vld [vmem:[#allocation7 + $0x58] sm:$0xff]  ;;  %v176_v52 = vld [vmem:[#allocation7 + $0x48] sm:$0xff]  ;;  %s1999_s14 = sshll.u32 %s2521_s13, 4  ;;  %s2001_s17 = sshll.u32 %s3431_s4, 4  ;;  %s2000_s14 = int_to_ptr.vmem [resolvable:$true] %s1999_s14  ;;  %s2002_s17 = int_to_ptr.hbm [resolvable:$true] %s2001_s17 }
  0x1b   :  { %106 = vmatpush.msra.mxu0 %v87_v5  ;;  %v81_v14 = vmul.f32 0.1, %v80_v11  ;;  %v177_v49 = vld [vmem:[#allocation7 + $0x50] sm:$0xff]  ;;  %197 = vmatpush.msra.mxu1 %v178_v48  ;;  %v175_v54 = vld [vmem:[#allocation7 + $0x40] sm:$0xff]  ;;  %v334_v32 = vld [vmem:[#allocation7 + $0xb8] sm:$0xff] }
  0x1c   :  { %321 = vmatpush.msrb.mxu2 %v301_v41  ;;  %v2295_v8 = vld [vmem:[#allocation7 + $0x236] ss:$0 sm:$0xff]  ;;  %v430_v41 = vld [vmem:[#allocation7 + $0x100] sm:$0xff] }
  0x1d   :  { %107 = vmatpush.msra.mxu0 %v86_v7  ;;  %v2310_v35 = vpop.eup %2309  ;;  %198 = vmatpush.msra.mxu1 %v177_v49  ;;  %v333_v34 = vld [vmem:[#allocation7 + $0xb0] sm:$0xff] }
  0x1e   :  { %v122_v36 = vmul.f32 32.0, %v2310_v35  ;;  %vm126_vm4 = vweird.f32 %v2310_v35  ;;  %322 = vmatpush.msrb.mxu2 %v300_v42  ;;  %v2590_v42 = vld [vmem:[#allocation7 + $0x120] sm:$0xff]  ;;  %v428_v49 = vld [vmem:[#allocation7 + $0xf0] sm:$0xff] }
  0x1f   :  { %108 = vmatpush.msra.mxu0 %v85_v9  ;;  %199 = vmatpush.msra.mxu1 %v176_v52  ;;  %v2603_v52 = vld [vmem:[#allocation7 + $0x118] sm:$0xff] }
  0x20   :  { %v123_v37 = vsub.f32 1.0, %v122_v36  ;;  %323 = vmatpush.msrb.mxu2 %v299_v44  ;;  %v2135_v44 = vpack.i.bf16 %v430_v41, %v2590_v42 }
  0x21   :  { %109 = vmatpush.msra.mxu0 %v84_v10  ;;  %200 = vmatpush.msra.mxu1 %v175_v54 }
  0x22   :  { %v124_v38 = vmul.f32 %v2310_v35, %v123_v37  ;;  %v331_v37 = vld [vmem:[#allocation7 + $0xa0] sm:$0xff] }
  0x23   :  { %110 = vmatpush.msra.mxu0 %v83_v12  ;;  %v2296_v12 = vld [vmem:[#allocation7 + $0x237] ss:$0 sm:$0xff] }
  0x24   :  { %v125_v40 = vadd.f32 %v2310_v35, %v124_v38  ;;  %v330_v38 = vld [vmem:[#allocation7 + $0x98] sm:$0xff] }
  0x25   :  { %111 = vmatpush.msra.mxu0 %v82_v13 }
  0x26   :  { %2013 = vmatmul.msk.f32.vlgmr.msra.gmra.mxu0 %vm92_vm2, %v81_v14  ;;  %v127_v43 = vsel %vm126_vm4, %v2310_v35, %v125_v40  ;;  %v332_v35 = vld [vmem:[#allocation7 + $0xa8] sm:$0xff]  ;;  %v329_v40 = vld [vmem:[#allocation7 + $0x90] sm:$0xff] }
  0x27   :  { %375 = vmatpush.msrb.mxu1 %v332_v35 }
  0x29   :  { %376 = vmatpush.msrb.mxu1 %v331_v37 }
  0x2b   :  { %377 = vmatpush.msrb.mxu1 %v330_v38 }
  0x2d   :  { %378 = vmatpush.msrb.mxu1 %v329_v40 }
  0x88   :  { %v213_v15 = vpop.permute.xlu0 %212 }
  0x89   :  { %2016 = vmatmul.msk.f32.vlgmr.msra.gmra.mxu2 %vm156_vm1, %v213_v15 }
  0x9a   :  { %v262_v22 = vpop.f32.mrf.mxu3 }
  0xa3   :  { %v113_v17 = vpop.f32.mrf.mxu0 }
  0xa4   :  { %v114_v18 = vadd.f32 %v2294_v16, %v113_v17 }
  0xa6   :  { %v2567_v19 = vmax.f32 %v114_v18, 0.0 }
  0xa8   :  { %v129_v20 = vmul.f32 %v2567_v19, %v2567_v19  ;;  %v118_v31 = vsel %vm117_vm3, %v2567_v19, 0.0 }
  0xaa   :  { %v130_v21 = vsel %vm117_vm3, %v129_v20, 0.0 }
  0xab   :  { %131 = vadd.xlane.f32.xlu2 %v130_v21  ;;  %v2297_v21 = vld [vmem:[#allocation7 + $0x231] ss:$0 sm:$0xff] }
  0xb3   :  { %158 = vadd.xlane.f32.xlu2 %v157_v33 }
  0xcb   :  { %436 = vrot.lane.b32.xlu2 %v2559_v0, %s2513_s3 }
 0x10c   :  { %v237_v24 = vpop.f32.mrf.mxu2 }
 0x10d   :  { %v263_v25 = vadd.f32 %v262_v22, %v237_v24  ;;  %v2298_v24 = vld [vmem:[#allocation7 + $0x232] ss:$0 sm:$0xff] }
 0x10f   :  { %v267_v26 = vadd.f32 %v2293_v23, %v263_v25 }
 0x111   :  { %v2572_v27 = vmax.f32 %v267_v26, 0.0 }
 0x113   :  { %v269_v28 = vsel %vm117_vm3, %v2572_v27, 0.0  ;;  %v273_v29 = vmul.f32 %v2572_v27, %v2572_v27 }
 0x114   :  { %270 = vadd.xlane.f32.xlu0 %v269_v28  ;;  %v335_v28 = vld [vmem:[#allocation7 + $0xc0] sm:$0xff] }
 0x115   :  { %v274_v30 = vsel %vm117_vm3, %v273_v29, 0.0 }
 0x116   :  { %275 = vadd.xlane.f32.xlu1 %v274_v30 }
 0x11e   :  { %119 = vadd.xlane.f32.xlu1 %v118_v31  ;;  %v132_v56 = vpop.xlane.xlu2 %131 }
 0x11f   :  { %v133_v59 = vmul.f32 %v132_v56, %v127_v43  ;;  %v2610_v56 = vld [vmem:[#allocation7 + $0x110] sm:$0xff] }
 0x126   :  { %v159_v29 = vpop.xlane.xlu2 %158 }
 0x127   :  { %vm167_vm11 = vcmp.eq.f32.partialorder %v159_v29, inf  ;;  %vm169_vm12 = vcmp.eq.f32.partialorder %v159_v29, 0.0 }
 0x128   :  { %2136 = vrot.lane.b32.xlu0 %v2135_v44, %s2514_s11 }
 0x187   :  { %v271_v45 = vpop.xlane.xlu0 %270 }
 0x188   :  { %v272_v46 = vmul.f32 %v271_v45, %v127_v43  ;;  %v2593_v45 = vld [vmem:[#allocation7 + $0x128] sm:$0xff] }
 0x189   :  { %v276_v47 = vpop.xlane.xlu1 %275  ;;  %452 = vmatpush.msra.mxu2 %v2593_v45 }
 0x18a   :  { %v278_v50 = vmul.f32 %v272_v46, %v272_v46  ;;  %v277_v51 = vmul.f32 %v276_v47, %v127_v43  ;;  %v280_v7 = vsub.f32 %v2572_v27, %v272_v46  ;;  %v336_v27 = vld [vmem:[#allocation7 + $0xc8] sm:$0xff] }
 0x18b   :  { %352 = vmatpush.msrb.mxu3 %v336_v27  ;;  %453 = vmatpush.msra.mxu2 %v2590_v42 }
 0x18c   :  { %v279_v53 = vsub.f32 %v277_v51, %v278_v50  ;;  %v170_v50 = vand.u32 2147483648, %v159_v29  ;;  %v429_v51 = vld [vmem:[#allocation7 + $0xf8] sm:$0xff] }
 0x18d   :  { %353 = vmatpush.msrb.mxu3 %v335_v28  ;;  %v2606_v54 = vpack.i.bf16 %v428_v49, %v429_v51  ;;  %454 = vmatpush.msra.mxu2 %v2603_v52 }
 0x18e   :  { %v281_v55 = vadd.f32 1e-05, %v279_v53 }
 0x18f   :  { %354 = vmatpush.msrb.mxu3 %v334_v32  ;;  %455 = vmatpush.msra.mxu2 %v2610_v56 }
 0x190   :  { %2311 = vrsqrt.f32 %v281_v55  ;;  %vm288_vm6 = vweird.f32 %v281_v55 }
 0x191   :  { %v120_v57 = vpop.xlane.xlu1 %119  ;;  %355 = vmatpush.msrb.mxu3 %v333_v34 }
 0x192   :  { %v128_v58 = vmul.f32 %v127_v43, %v120_v57  ;;  %v431_v43 = vld [vmem:[#allocation7 + $0x108] sm:$0xff] }
 0x193   :  { %v2595_v46 = vpack.i.bf16 %v430_v41, %v431_v43  ;;  %471 = vmatpush.msra.mxu3 %v431_v43  ;;  %v2125_v48 = vpack.i.bf16 %v431_v43, %v2593_v45 }
 0x194   :  { %v134_v60 = vmul.f32 %v128_v58, %v128_v58  ;;  %v136_v20 = vsub.f32 %v2567_v19, %v128_v58  ;;  %v2613_v58 = vld [vmem:[#allocation7 + $0xe8] sm:$0xff] }
 0x195   :  { %2121 = vrot.lane.b32.xlu1 %v2595_v46, %s2513_s3  ;;  %2126 = vrot.lane.b32.xlu2 %v2125_v48, %s2514_s11  ;;  %v2190_v35 = vpack.i.bf16 %v2613_v58, %v2593_v45 }
 0x196   :  { %v2312_v61 = vpop.eup %2311  ;;  %v135_v62 = vsub.f32 %v133_v59, %v134_v60  ;;  %472 = vmatpush.msra.mxu3 %v430_v41  ;;  %v2619_v60 = vld [vmem:[#allocation7 + $0xe0] sm:$0xff]  ;;  %2161 = vrot.lane.b32.xlu0 %v2595_v46, %s2515_s12 }
 0x197   :  { %v283_v63 = vmul.f32 %v2312_v61, %v281_v55  ;;  %vm289_vm5 = vweird.f32 %v2312_v61  ;;  %v2140_v55 = vpack.i.bf16 %v429_v51, %v2603_v52 }
 0x198   :  { %v137_v1 = vadd.f32 1e-05, %v135_v62  ;;  %vm290_vm7 = vmor %vm288_vm6, %vm289_vm5  ;;  %473 = vmatpush.msra.mxu3 %v429_v51  ;;  %v2145_v62 = vpack.i.bf16 %v2619_v60, %v2613_v58 }
 0x199   :  { %v284_v2 = vmul.f32 %v2312_v61, %v283_v63 }
 0x19a   :  { %2313 = vrsqrt.f32 %v137_v1  ;;  %vm144_vm9 = vweird.f32 %v137_v1  ;;  %474 = vmatpush.msra.mxu3 %v428_v49 }
 0x19b   :  { %v285_v3 = vmul.f32 0.5, %v284_v2  ;;  %2315 = vrsqrt.f32 %v159_v29  ;;  %v2628_v2 = vld [vmem:[#allocation7 + $0xd0] sm:$0xff] }
 0x19c   :  { %475 = vmatpush.msra.mxu3 %v2613_v58 }
 0x19d   :  { %v286_v4 = vsub.f32 1.5, %v285_v3  ;;  %2131 = vrot.lane.b32.xlu1 %v2606_v54, %s2513_s3  ;;  %2141 = vrot.lane.b32.xlu2 %v2140_v55, %s2514_s11  ;;  %v2299_v3 = vld [vmem:[#allocation7 + $0x238] ss:$0 sm:$0xff] }
 0x19e   :  { %476 = vmatpush.msra.mxu3 %v2619_v60 }
 0x19f   :  { %v287_v5 = vmul.f32 %v2312_v61, %v286_v4 }
 0x1a0   :  { %v2314_v6 = vpop.eup %2313 }
 0x1a1   :  { %v291_v9 = vsel %vm290_vm7, %v2312_v61, %v287_v5  ;;  %v139_v10 = vmul.f32 %v2314_v6, %v137_v1  ;;  %vm145_vm8 = vweird.f32 %v2314_v6  ;;  %v2316_v19 = vpop.eup %2315  ;;  %v2622_v61 = vld [vmem:[#allocation7 + $0xd8] sm:$0xff]  ;;  %v2150_v1 = vpack.i.bf16 %v428_v49, %v2610_v56  ;;  %v2300_v5 = vld [vmem:[#allocation7 + $0x233] ss:$0 sm:$0xff] }
 0x1a2   :  { %v292_v11 = vmul.f32 %v291_v9, %v280_v7  ;;  %vm146_vm10 = vmor %vm144_vm9, %vm145_vm8  ;;  %v161_v30 = vmul.f32 %v2316_v19, %v159_v29  ;;  %477 = vmatpush.msra.mxu3 %v2622_v61 }
 0x1a3   :  { %v140_v13 = vmul.f32 %v2314_v6, %v139_v10  ;;  %v2301_v10 = vld [vmem:[#allocation7 + $0x234] ss:$0 sm:$0xff] }
 0x1a4   :  { %v295_v14 = vmul.f32 %v2295_v8, %v292_v11  ;;  %v162_v31 = vmul.f32 %v2316_v19, %v161_v30  ;;  %478 = vmatpush.msra.mxu3 %v2628_v2  ;;  %v2165_v11 = vpack.i.bf16 %v2593_v45, %v2622_v61  ;;  %v2302_v30 = vld [vmem:[#allocation7 + $0x239] ss:$0 sm:$0xff]  ;;  %v2205_v45 = vpack.i.bf16 %v2628_v2, %v2610_v56 }
 0x1a5   :  { %v141_v15 = vmul.f32 0.5, %v140_v13  ;;  %2146 = vrot.lane.b32.xlu1 %v2145_v62, %s2513_s3  ;;  %2151 = vrot.lane.b32.xlu2 %v2150_v1, %s2514_s11 }
 0x1a6   :  { %v298_v16 = vadd.f32 %v2296_v12, %v295_v14  ;;  %v163_v33 = vmul.f32 0.5, %v162_v31 }
 0x1a7   :  { %v142_v17 = vsub.f32 1.5, %v141_v15 }
 0x1a8   :  { %2019 = vmatmul.msk.f32.vlgmr.msrb.gmra.mxu2 %vm117_vm3, %v298_v16  ;;  %v164_v36 = vsub.f32 1.5, %v163_v33  ;;  %v2170_v16 = vpack.i.bf16 %v2590_v42, %v2628_v2 }
 0x1a9   :  { %v143_v18 = vmul.f32 %v2314_v6, %v142_v17  ;;  %v2642_v17 = vpop.permute.xlu2 %436 }
 0x1aa   :  { %v165_v39 = vmul.f32 %v2316_v19, %v164_v36 }
 0x1ab   :  { %v147_v22 = vsel %vm146_vm10, %v2314_v6, %v143_v18 }
 0x1ac   :  { %v148_v23 = vmul.f32 %v147_v22, %v136_v20  ;;  %v166_v47 = vmul.f32 %v165_v39, %v159_v29 }
 0x1ad   :  { %2156 = vrot.lane.b32.xlu1 %v2145_v62, %s2514_s11  ;;  %2166 = vrot.lane.b32.xlu2 %v2165_v11, %s2513_s3 }
 0x1ae   :  { %v151_v25 = vmul.f32 %v2297_v21, %v148_v23  ;;  %v168_v53 = vsel %vm167_vm11, %v159_v29, %v166_v47  ;;  %v2137_v21 = vpop.permute.xlu0 %2136 }
 0x1af   :  { %v171_v57 = vsel %vm169_vm12, %v170_v50, %v168_v53  ;;  %v2138_v22 = vunpack.i.l.bf16 %v2137_v21  ;;  %v2139_v29 = vunpack.i.h.bf16 %v2137_v21 }
 0x1b0   :  { %v154_v26 = vadd.f32 %v2298_v24, %v151_v25  ;;  %v172_v59 = vmul.f32 0.1, %v171_v57  ;;  %2022 = vmatmul.msk.f32.vlgmr.msra.gmra.mxu2 %vm117_vm3, %v2642_v17  ;;  %v2175_v24 = vpack.i.bf16 %v2628_v2, %v2622_v61 }
 0x1b2   :  { %2014 = vmatmul.msk.f32.vlgmr.msra.gmra.mxu1 %vm117_vm3, %v154_v26  ;;  %v173_v63 = vmax.f32 %v172_v59, 0.0  ;;  %2176 = vrot.lane.b32.xlu0 %v2175_v24, %s2514_s11 }
 0x1b4   :  { %v174_v4 = vmin.f32 %v173_v63, 1.0  ;;  %v2185_v63 = vpack.i.bf16 %v2610_v56, %v2603_v52  ;;  %v2516_v56 = vmov 64.0  }
 0x1b5   :  { %2171 = vrot.lane.b32.xlu1 %v2170_v16, %s2513_s3  ;;  %2317 = vrcp.f32 %v2516_v56 }
 0x1b6   :  { %v181_v9 = vmul.f32 %v2300_v5, %v174_v4  ;;  %v2200_v4 = vpack.i.bf16 %v2622_v61, %v2603_v52  ;;  %v2195_v5 = vpack.i.bf16 %v2619_v60, %v2590_v42 }
 0x1ba   :  { %2191 = vrot.lane.b32.xlu0 %v2190_v35, %s2515_s12 }
 0x1c2   :  { %2206 = vrot.lane.b32.xlu0 %v2205_v45, %s2515_s12 }
 0x1ef   :  { %v2127_v18 = vpop.permute.xlu2 %2126 }
 0x1f0   :  { %v2128_v20 = vunpack.i.l.bf16 %v2127_v18  ;;  %v2129_v27 = vunpack.i.h.bf16 %v2127_v18 }
 0x1f2   :  { %639 = vmatpush.msrb.mxu2 %v2128_v20 }
 0x1f4   :  { %640 = vmatpush.msrb.mxu2 %v2138_v22 }
 0x1f7   :  { %v2142_v23 = vpop.permute.xlu2 %2141 }
 0x1f8   :  { %v2143_v25 = vunpack.i.l.bf16 %v2142_v23  ;;  %v2144_v19 = vunpack.i.h.bf16 %v2142_v23 }
 0x1fa   :  { %641 = vmatpush.msrb.mxu2 %v2143_v25 }
 0x1ff   :  { %v2152_v26 = vpop.permute.xlu2 %2151 }
 0x200   :  { %v2153_v28 = vunpack.i.l.bf16 %v2152_v26  ;;  %v2154_v31 = vunpack.i.h.bf16 %v2152_v26 }
 0x202   :  { %642 = vmatpush.msrb.mxu2 %v2153_v28 }
 0x203   :  { %2028 = vmatmul.msk.f32.vlgmr.msrb.gmra.mxu2 %vm117_vm3, %v2642_v17 }
 0x204   :  { %679 = vmatpush.msra.mxu2 %v2129_v27 }
 0x206   :  { %680 = vmatpush.msra.mxu2 %v2139_v29 }
 0x207   :  { %v2122_v36 = vpop.permute.xlu1 %2121  ;;  %v2167_v47 = vpop.permute.xlu2 %2166 }
 0x208   :  { %681 = vmatpush.msra.mxu2 %v2144_v19  ;;  %v2124_v37 = vunpack.i.h.bf16 %v2122_v36  ;;  %v2123_v38 = vunpack.i.l.bf16 %v2122_v36  ;;  %v2169_v50 = vunpack.i.h.bf16 %v2167_v47  ;;  %v2168_v57 = vunpack.i.l.bf16 %v2167_v47  ;;  %v2304_v36 = vld [vmem:[#allocation7 + $0x23b] ss:$0 sm:$0xff] }
 0x20a   :  { %682 = vmatpush.msra.mxu2 %v2154_v31  ;;  %533 = vmatpush.msrb.mxu0 %v2169_v50  ;;  %v2303_v31 = vld [vmem:[#allocation7 + $0x23a] ss:$0 sm:$0xff] }
 0x20f   :  { %v2132_v46 = vpop.permute.xlu1 %2131 }
 0x210   :  { %v2134_v48 = vunpack.i.h.bf16 %v2132_v46  ;;  %v2133_v49 = vunpack.i.l.bf16 %v2132_v46 }
 0x217   :  { %v2147_v51 = vpop.permute.xlu1 %2146 }
 0x218   :  { %v2149_v53 = vunpack.i.h.bf16 %v2147_v51  ;;  %v2148_v55 = vunpack.i.l.bf16 %v2147_v51 }
 0x21f   :  { %v2157_v58 = vpop.permute.xlu1 %2156 }
 0x220   :  { %v2159_v59 = vunpack.i.h.bf16 %v2157_v58  ;;  %v2158_v62 = vunpack.i.l.bf16 %v2157_v58 }
 0x222   :  { %683 = vmatpush.msra.mxu2 %v2158_v62 }
 0x224   :  { %684 = vmatpush.msra.mxu2 %v2159_v59 }
 0x227   :  { %v2172_v1 = vpop.permute.xlu1 %2171 }
 0x228   :  { %v2173_v2 = vunpack.i.l.bf16 %v2172_v1 }
 0x22b   :  { %v325_v6 = vpop.f32.mrf.mxu2 }
 0x22c   :  { %v326_v7 = vadd.f32 %v2299_v3, %v325_v6  ;;  %v2174_v3 = vunpack.i.h.bf16 %v2172_v1  ;;  %v2162_v6 = vpop.permute.xlu0 %2161 }
 0x22d   :  { %v2164_v45 = vunpack.i.h.bf16 %v2162_v6 }
 0x22e   :  { %v328_v8 = vmax.f32 %v326_v7, 0.0  ;;  %534 = vmatpush.msrb.mxu0 %v2174_v3 }
 0x22f   :  { %v202_v12 = vpop.f32.mrf.mxu1 }
 0x230   :  { %v203_v13 = vadd.f32 %v202_v12, %v181_v9  ;;  %2020 = vmatmul.msk.f32.vlgmr.msrb.gmra.mxu3 %vm117_vm3, %v328_v8 }
 0x231   :  { %581 = vmatpush.msrb.mxu3 %v2123_v38 }
 0x232   :  { %v207_v14 = vadd.f32 %v2301_v10, %v203_v13 }
 0x233   :  { %582 = vmatpush.msrb.mxu3 %v2124_v37 }
 0x234   :  { %v208_v15 = vmax.f32 %v207_v14, 0.0  ;;  %v2177_v9 = vpop.permute.xlu0 %2176 }
 0x235   :  { %583 = vmatpush.msrb.mxu3 %v2133_v49  ;;  %v2178_v52 = vunpack.i.l.bf16 %v2177_v9  ;;  %v2179_v61 = vunpack.i.h.bf16 %v2177_v9  ;;  %v807_v9 = vld [vmem:[#allocation8 + $0x30] sm:$0xff] }
 0x236   :  { %2021 = vmatmul.msk.f32.vlgmr.msrb.gmra.mxu1 %vm117_vm3, %v208_v15 }
 0x237   :  { %584 = vmatpush.msrb.mxu3 %v2134_v48  ;;  %685 = vmatpush.msra.mxu2 %v2178_v52 }
 0x238   :  { %831 = vmatpush.msra.mxu1 %v807_v9  ;;  %v891_v9 = vld [vmem:[#allocation7 + $0x1e8] sm:$0xff] }
 0x239   :  { %585 = vmatpush.msrb.mxu3 %v2148_v55  ;;  %686 = vmatpush.msra.mxu2 %v2179_v61  ;;  %v806_v61 = vld [vmem:[#allocation8 + $0x28] sm:$0xff] }
 0x23b   :  { %586 = vmatpush.msrb.mxu3 %v2149_v53  ;;  %v457_v53 = vpop.f32.mrf.mxu2 }
 0x23c   :  { %v2192_v42 = vpop.permute.xlu0 %2191 }
 0x23d   :  { %587 = vmatpush.msrb.mxu3 %v2168_v57  ;;  %v2193_v12 = vunpack.i.l.bf16 %v2192_v42  ;;  %v2194_v48 = vunpack.i.h.bf16 %v2192_v42  ;;  %v2305_v57 = vld [vmem:[#allocation7 + $0x23c] ss:$0 sm:$0xff]  ;;  %v805_v42 = vld [vmem:[#allocation8 + $0x20] sm:$0xff] }
 0x23e   :  { %832 = vmatpush.msra.mxu1 %v805_v42 }
 0x23f   :  { %588 = vmatpush.msrb.mxu3 %v2173_v2  ;;  %719 = vmatpush.msrb.mxu2 %v2193_v12  ;;  %v2307_v2 = vld [vmem:[#allocation7 + $0x23d] ss:$0 sm:$0xff] }
 0x240   :  { %v804_v12 = vld [vmem:[#allocation8 + $0x18] sm:$0xff] }
 0x244   :  { %v2207_v38 = vpop.permute.xlu0 %2206 }
 0x245   :  { %v2209_v51 = vunpack.i.h.bf16 %v2207_v38 }
 0x286   :  { %v644_v55 = vpop.f32.mrf.mxu2 }
 0x2b3   :  { %v357_v32 = vpop.f32.mrf.mxu3  ;;  %v380_v33 = vpop.f32.mrf.mxu1 }
 0x2b4   :  { %v381_v34 = vadd.f32 %v380_v33, %v357_v32 }
 0x2b6   :  { %v385_v39 = vadd.f32 %v2302_v30, %v381_v34 }
 0x2b8   :  { %v2656_v40 = vmax.f32 %v385_v39, 0.0 }
 0x2ba   :  { %v387_v41 = vsel %vm92_vm2, %v2656_v40, 0.0  ;;  %v398_v43 = vmul.f32 %v2656_v40, %v2656_v40 }
 0x2bb   :  { %388 = vadd.xlane.f32.xlu1 %v387_v41  ;;  %v2163_v41 = vunpack.i.l.bf16 %v2162_v6 }
 0x2bc   :  { %v399_v44 = vsel %vm92_vm2, %v398_v43, 0.0 }
 0x2bd   :  { %400 = vadd.xlane.f32.xlu2 %v399_v44  ;;  %v2208_v44 = vunpack.i.l.bf16 %v2207_v38 }
 0x2d4   :  { %2186 = vrot.lane.b32.xlu1 %v2185_v63, %s2513_s3 }
 0x2d5   :  { %2181 = vrot.lane.b32.xlu2 %v2606_v54, %s2515_s12  ;;  %v2318_v54 = vpop.eup %2317 }
 0x2d6   :  { %v391_v7 = vmul.f32 64.0, %v2318_v54  ;;  %vm395_vm13 = vweird.f32 %v2318_v54 }
 0x2d8   :  { %v392_v8 = vsub.f32 1.0, %v391_v7  ;;  %v2308_v7 = vld [vmem:[#allocation7 + $0x23f] ss:$0 sm:$0xff] }
 0x2da   :  { %v393_v10 = vmul.f32 %v2318_v54, %v392_v8  ;;  %v808_v8 = vld [vmem:[#allocation8 + $0x38] sm:$0xff] }
 0x2dc   :  { %2201 = vrot.lane.b32.xlu1 %v2200_v4, %s2515_s12  ;;  %v394_v11 = vadd.f32 %v2318_v54, %v393_v10 }
 0x2dd   :  { %2196 = vrot.lane.b32.xlu2 %v2195_v5, %s2515_s12 }
 0x2de   :  { %v396_v60 = vsel %vm395_vm13, %v2318_v54, %v394_v11 }
 0x2e5   :  { %793 = vrot.lane.b32.xlu2 %v2559_v0, %s2514_s11 }
 0x32e   :  { %v389_v13 = vpop.xlane.xlu1 %388 }
 0x32f   :  { %v397_v14 = vmul.f32 %v396_v60, %v389_v13  ;;  %v803_v13 = vld [vmem:[#allocation8 + $0x10] sm:$0xff] }
 0x330   :  { %v401_v0 = vpop.xlane.xlu2 %400  ;;  %833 = vmatpush.msra.mxu1 %v803_v13 }
 0x331   :  { %v403_v15 = vmul.f32 %v397_v14, %v397_v14  ;;  %v402_v16 = vmul.f32 %v401_v0, %v396_v60  ;;  %v405_v30 = vsub.f32 %v2656_v40, %v397_v14  ;;  %v802_v14 = vld [vmem:[#allocation8 + $0x8] sm:$0xff]  ;;  %v801_v0 = vld [vmem:[#allocation8] sm:$0xff] }
 0x332   :  { %834 = vmatpush.msra.mxu1 %v801_v0  ;;  %v874_v0 = vld [vmem:[#allocation7 + $0x160] sm:$0xff] }
 0x333   :  { %v404_v18 = vsub.f32 %v402_v16, %v403_v15 }
 0x335   :  { %v406_v20 = vadd.f32 1e-05, %v404_v18 }
 0x337   :  { %2319 = vrsqrt.f32 %v406_v20  ;;  %vm413_vm15 = vweird.f32 %v406_v20 }
 0x338   :  { %v2182_v21 = vpop.permute.xlu2 %2181 }
 0x339   :  { %v2183_v46 = vunpack.i.l.bf16 %v2182_v21  ;;  %v2184_v47 = vunpack.i.h.bf16 %v2182_v21  ;;  %v882_v21 = vld [vmem:[#allocation7 + $0x1a0] sm:$0xff] }
 0x33d   :  { %v2320_v22 = vpop.eup %2319 }
 0x33e   :  { %v408_v23 = vmul.f32 %v2320_v22, %v406_v20  ;;  %vm414_vm14 = vweird.f32 %v2320_v22 }
 0x33f   :  { %vm415_vm0 = vmor %vm413_vm15, %vm414_vm14 }
 0x340   :  { %v409_v24 = vmul.f32 %v2320_v22, %v408_v23  ;;  %v2197_v25 = vpop.permute.xlu2 %2196 }
 0x341   :  { %v2198_v26 = vunpack.i.l.bf16 %v2197_v25  ;;  %v2199_v49 = vunpack.i.h.bf16 %v2197_v25  ;;  %v883_v25 = vld [vmem:[#allocation7 + $0x1a8] sm:$0xff] }
 0x342   :  { %v410_v27 = vmul.f32 0.5, %v409_v24 }
 0x343   :  { %720 = vmatpush.msrb.mxu2 %v2198_v26  ;;  %v899_v26 = vld [vmem:[#allocation7 + $0x228] sm:$0xff] }
 0x344   :  { %v411_v28 = vsub.f32 1.5, %v410_v27  ;;  %v2306_v27 = vld [vmem:[#allocation7 + $0x23e] ss:$0 sm:$0xff] }
 0x346   :  { %v412_v29 = vmul.f32 %v2320_v22, %v411_v28  ;;  %v2187_v19 = vpop.permute.xlu1 %2186 }
 0x347   :  { %v2188_v32 = vunpack.i.l.bf16 %v2187_v19  ;;  %v2189_v33 = vunpack.i.h.bf16 %v2187_v19  ;;  %v2210_v19 = vpack.i.bf16 %v899_v26, %v883_v25  ;;  %v889_v25 = vld [vmem:[#allocation7 + $0x1d8] sm:$0xff] }
 0x348   :  { %v416_v34 = vsel %vm415_vm0, %v2320_v22, %v412_v29  ;;  %v898_v22 = vld [vmem:[#allocation7 + $0x220] sm:$0xff]  ;;  %v879_v29 = vld [vmem:[#allocation7 + $0x188] sm:$0xff] }
 0x349   :  { %v417_v35 = vmul.f32 %v416_v34, %v405_v30  ;;  %535 = vmatpush.msrb.mxu0 %v2188_v32  ;;  %v2215_v24 = vpack.i.bf16 %v898_v22, %v882_v21  ;;  %v881_v32 = vld [vmem:[#allocation7 + $0x198] sm:$0xff]  ;;  %2211 = vrot.lane.b32.xlu1 %v2210_v19, %s2511_s2  ;;  %v888_v19 = vld [vmem:[#allocation7 + $0x1d0] sm:$0xff] }
 0x34b   :  { %v420_v37 = vmul.f32 %v2303_v31, %v417_v35  ;;  %536 = vmatpush.msrb.mxu0 %v2189_v33  ;;  %2216 = vrot.lane.b32.xlu0 %v2215_v24, %s2511_s2  ;;  %v895_v31 = vld [vmem:[#allocation7 + $0x208] sm:$0xff]  ;;  %v897_v33 = vld [vmem:[#allocation7 + $0x218] sm:$0xff] }
 0x34c   :  { %2025 = vmatmul.msk.f32.vlgmr.msrb.gmra.mxu0 %vm117_vm3, %v2642_v17  ;;  %v2220_v35 = vpack.i.bf16 %v897_v33, %v881_v32  ;;  %v873_v24 = vld [vmem:[#allocation7 + $0x158] sm:$0xff] }
 0x34d   :  { %v423_v39 = vadd.f32 %v2304_v36, %v420_v37  ;;  %v880_v36 = vld [vmem:[#allocation7 + $0x190] sm:$0xff] }
 0x34e   :  { %v2202_v43 = vpop.permute.xlu1 %2201  ;;  %v896_v37 = vld [vmem:[#allocation7 + $0x210] sm:$0xff]  ;;  %2221 = vrot.lane.b32.xlu2 %v2220_v35, %s2511_s2  ;;  %v887_v35 = vld [vmem:[#allocation7 + $0x1c8] sm:$0xff] }
 0x34f   :  { %2023 = vmatmul.msk.f32.vlgmr.msra.gmra.mxu3 %vm92_vm2, %v423_v39  ;;  %2029 = vmatmul.msk.f32.vlgmr.msra.gmra.mxu2 %vm92_vm2, %v423_v39  ;;  %v2203_v40 = vunpack.i.l.bf16 %v2202_v43  ;;  %v2204_v50 = vunpack.i.h.bf16 %v2202_v43 }
 0x350   :  { %759 = vmatpush.msra.mxu3 %v2163_v41 }
 0x351   :  { %721 = vmatpush.msrb.mxu2 %v2203_v40 }
 0x352   :  { %760 = vmatpush.msra.mxu3 %v2164_v45  ;;  %v894_v45 = vld [vmem:[#allocation7 + $0x200] sm:$0xff] }
 0x353   :  { %722 = vmatpush.msrb.mxu2 %v2208_v44  ;;  %v878_v44 = vld [vmem:[#allocation7 + $0x180] sm:$0xff] }
 0x354   :  { %761 = vmatpush.msra.mxu3 %v2183_v46 }
 0x355   :  { %851 = vmatpush.msra.mxu2 %v808_v8  ;;  %v875_v8 = vld [vmem:[#allocation7 + $0x168] sm:$0xff] }
 0x356   :  { %762 = vmatpush.msra.mxu3 %v2184_v47 }
 0x357   :  { %2026 = vmatmul.msk.f32.vlgmr.msrb.gmra.mxu3 %vm92_vm2, %v423_v39  ;;  %2030 = vmatmul.msk.f32.vlgmr.msrb.gmra.mxu2 %vm117_vm3, %v2642_v17 }
 0x358   :  { %763 = vmatpush.msra.mxu3 %v2194_v48  ;;  %852 = vmatpush.msra.mxu2 %v806_v61  ;;  %v2225_v48 = vpack.i.bf16 %v896_v37, %v880_v36  ;;  %v870_v37 = vld [vmem:[#allocation7 + $0x140] sm:$0xff] }
 0x35a   :  { %764 = vmatpush.msra.mxu3 %v2199_v49  ;;  %853 = vmatpush.msra.mxu2 %v804_v12 }
 0x35b   :  { %2226 = vrot.lane.b32.xlu1 %v2225_v48, %s2511_s2 }
 0x35c   :  { %765 = vmatpush.msra.mxu3 %v2204_v50  ;;  %854 = vmatpush.msra.mxu2 %v802_v14  ;;  %v2250_v14 = vpack.i.bf16 %v891_v9, %v875_v8 }
 0x35e   :  { %766 = vmatpush.msra.mxu3 %v2209_v51 }
 0x35f   :  { %2031 = vmatmul.msk.f32.vlgmr.msra.gmra.mxu3 %vm92_vm2, %v423_v39  ;;  %v2230_v39 = vpack.i.bf16 %v895_v31, %v879_v29  ;;  %v872_v29 = vld [vmem:[#allocation7 + $0x150] sm:$0xff] }
 0x360   :  { %v2265_v33 = vpack.i.bf16 %v888_v19, %v872_v29 }
 0x361   :  { %2231 = vrot.lane.b32.xlu0 %v2230_v39, %s2511_s2 }
 0x3c9   :  { %v538_v3 = vpop.f32.mrf.mxu0 }
 0x3d2   :  { %v480_v58 = vpop.f32.mrf.mxu3  ;;  %v688_v1 = vpop.f32.mrf.mxu2 }
 0x3d3   :  { %v481_v59 = vadd.f32 %v480_v58, %v457_v53  ;;  %v689_v30 = vadd.f32 %v688_v1, %v644_v55  ;;  %v2235_v53 = vpack.i.bf16 %v894_v45, %v878_v44  ;;  %v876_v58 = vld [vmem:[#allocation7 + $0x170] sm:$0xff] }
 0x3d4   :  { %v868_v44 = vld [vmem:[#allocation7 + $0x130] sm:$0xff] }
 0x3d5   :  { %v485_v62 = vadd.f32 %v2305_v57, %v481_v59  ;;  %v693_v43 = vadd.f32 %v2306_v27, %v689_v30  ;;  %v892_v59 = vld [vmem:[#allocation7 + $0x1f0] sm:$0xff]  ;;  %2236 = vrot.lane.b32.xlu2 %v2235_v53, %s2511_s2 }
 0x3d6   :  { %v884_v45 = vld [vmem:[#allocation7 + $0x1b0] sm:$0xff] }
 0x3d7   :  { %v2024_v63 = vmul.f32 -1.442695, %v485_v62 }
 0x3d9   :  { %2321 = vpow2.f32 %v2024_v63 }
 0x3da   :  { %v590_v17 = vpop.f32.mrf.mxu3  ;;  %v724_v10 = vpop.f32.mrf.mxu2 }
 0x3db   :  { %v591_v4 = vadd.f32 %v590_v17, %v538_v3  ;;  %v877_v3 = vld [vmem:[#allocation7 + $0x178] sm:$0xff] }
 0x3dc   :  { %v893_v17 = vld [vmem:[#allocation7 + $0x1f8] sm:$0xff] }
 0x3dd   :  { %v595_v5 = vadd.f32 %v2307_v2, %v591_v4  ;;  %2251 = vrot.lane.b32.xlu2 %v2250_v14, %s2511_s2 }
 0x3df   :  { %v2322_v56 = vpop.eup %2321  ;;  %v2027_v54 = vmul.f32 -1.442695, %v595_v5  ;;  %v2245_v5 = vpack.i.bf16 %v892_v59, %v876_v58 }
 0x3e0   :  { %v2688_v6 = vadd.f32 1.0, %v2322_v56 }
 0x3e1   :  { %2323 = vpow2.f32 %v2027_v54  ;;  %v794_v54 = vpop.permute.xlu2 %793  ;;  %2246 = vrot.lane.b32.xlu0 %v2245_v5, %s2511_s2 }
 0x3e2   :  { %2325 = vrcp.f32 %v2688_v6  ;;  %v768_v11 = vpop.f32.mrf.mxu3  ;;  %v501_v49 = vand.u32 2147483648, %v2688_v6  ;;  %vm495_vm5 = vweird.f32 %v2688_v6  ;;  %v499_v50 = vand.u32 2147483647, %v2688_v6 }
 0x3e3   :  { %v769_v52 = vadd.f32 %v768_v11, %v724_v10 }
 0x3e4   :  { %v502_v2 = vor.u32 1.1754944e-38, %v501_v49  ;;  %vm500_vm8 = vcmp.eq.f32.partialorder %v499_v50, 8.507059e+37  ;;  %v2212_v49 = vpop.permute.xlu1 %2211 }
 0x3e5   :  { %v773_v60 = vadd.f32 %v2308_v7, %v769_v52  ;;  %v2240_v52 = vpack.i.bf16 %v893_v17, %v877_v3  ;;  %v2751_v53 = vunpack.i.h.bf16 %v2212_v49  ;;  %v2753_v55 = vunpack.i.l.bf16 %v2212_v49 }
 0x3e6   :  { %v2518_v49 = vmov 0  }
 0x3e7   :  { %v2324_v15 = vpop.eup %2323  ;;  %v2032_v16 = vmul.f32 -1.442695, %v773_v60  ;;  %2241 = vrot.lane.b32.xlu1 %v2240_v52, %s2511_s2  ;;  %1034 = vmatpush.msra.mxu0 %v2753_v55 }
 0x3e8   :  { %v2691_v18 = vpop.eup %2325  ;;  %v2693_v20 = vadd.f32 1.0, %v2324_v15  ;;  %v890_v15 = vld [vmem:[#allocation7 + $0x1e0] sm:$0xff]  ;;  %1054 = vmatpush.msrb.mxu1 %v2751_v53  ;;  %1090 = vmatpush.msrb.mxu2 %v2753_v55 }
 0x3e9   :  { %2327 = vpow2.f32 %v2032_v16  ;;  %v491_v23 = vmul.f32 %v2691_v18, %v2688_v6  ;;  %vm496_vm4 = vweird.f32 %v2691_v18  ;;  %v2255_v22 = vpack.i.bf16 %v890_v15, %v874_v0  ;;  %v2222_v48 = vpop.permute.xlu2 %2221  ;;  %1110 = vmatpush.msrb.mxu3 %v2751_v53  ;;  %2290 = vset.pattern.permute.xlu2 %v2518_v49 }
 0x3ea   :  { %2329 = vrcp.f32 %v2693_v20  ;;  %vm2712_vm6 = vmor %vm495_vm5, %vm496_vm4  ;;  %v611_v57 = vand.u32 2147483648, %v2693_v20  ;;  %v609_v1 = vand.u32 2147483647, %v2693_v20  ;;  %vm605_vm9 = vweird.f32 %v2693_v20  ;;  %2291 = vset.pattern.permute.xlu0 %v2518_v49  ;;  %2292 = vset.pattern.permute.xlu1 %v2518_v49 }
 0x3eb   :  { %v492_v28 = vsub.f32 1.0, %v491_v23  ;;  %2256 = vrot.lane.b32.xlu0 %v2255_v22, %s2511_s2  ;;  %v2757_v58 = vunpack.i.l.bf16 %v2222_v48 }
 0x3ec   :  { %v612_v7 = vor.u32 1.1754944e-38, %v611_v57  ;;  %vm610_vm11 = vcmp.eq.f32.partialorder %v609_v1, 8.507059e+37  ;;  %v2755_v57 = vunpack.i.h.bf16 %v2222_v48  ;;  %v2517_v48 = vmov 1.0  }
 0x3ed   :  { %v493_v34 = vmul.f32 %v2691_v18, %v492_v28  ;;  %v2260_v28 = vpack.i.bf16 %v889_v25, %v873_v24 }
 0x3ef   :  { %v2328_v38 = vpop.eup %2327  ;;  %v494_v46 = vadd.f32 %v2691_v18, %v493_v34  ;;  %2261 = vrot.lane.b32.xlu2 %v2260_v28, %s2511_s2  ;;  %v871_v34 = vld [vmem:[#allocation7 + $0x148] sm:$0xff] }
 0x3f0   :  { %v2330_v41 = vpop.eup %2329  ;;  %v2702_v40 = vadd.f32 1.0, %v2328_v38  ;;  %v2270_v36 = vpack.i.bf16 %v887_v35, %v871_v34  ;;  %v886_v38 = vld [vmem:[#allocation7 + $0x1c0] sm:$0xff] }
 0x3f1   :  { %v601_v47 = vmul.f32 %v2330_v41, %v2693_v20  ;;  %v498_v62 = vsel %vm2712_vm6, %v2691_v18, %v494_v46  ;;  %vm606_vm7 = vweird.f32 %v2330_v41  ;;  %v2275_v39 = vpack.i.bf16 %v886_v38, %v870_v37 }
 0x3f2   :  { %2331 = vrcp.f32 %v2702_v40  ;;  %v503_v6 = vsel %vm500_vm8, %v502_v2, %v498_v62  ;;  %vm607_vm10 = vmor %vm605_vm9, %vm606_vm7  ;;  %v789_v21 = vand.u32 2147483648, %v2702_v40  ;;  %vm783_vm13 = vweird.f32 %v2702_v40 }
 0x3f3   :  { %v602_v51 = vsub.f32 1.0, %v601_v47  ;;  %2333 = vtanh.f32 %v693_v43  ;;  %v787_v23 = vand.u32 2147483647, %v2702_v40  ;;  %2266 = vrot.lane.b32.xlu0 %v2265_v33, %s2511_s2  ;;  %v885_v43 = vld [vmem:[#allocation7 + $0x1b8] sm:$0xff]  ;;  %v2285_v46 = vpack.i.bf16 %v884_v45, %v868_v44  ;;  %v2217_v47 = vpop.permute.xlu0 %2216 }
 0x3f4   :  { %v790_v27 = vor.u32 1.1754944e-38, %v789_v21  ;;  %v2747_v50 = vunpack.i.h.bf16 %v2217_v47 }
 0x3f5   :  { %v603_v63 = vmul.f32 %v2330_v41, %v602_v51  ;;  %vm788_vm15 = vcmp.eq.f32.partialorder %v787_v23, 8.507059e+37  ;;  %v2749_v51 = vunpack.i.l.bf16 %v2217_v47 }
 0x3f6   :  { %1055 = vmatpush.msrb.mxu1 %v2747_v50  ;;  %1111 = vmatpush.msrb.mxu3 %v2747_v50 }
 0x3f7   :  { %v604_v4 = vadd.f32 %v2330_v41, %v603_v63  ;;  %2271 = vrot.lane.b32.xlu2 %v2270_v36, %s2511_s2  ;;  %1035 = vmatpush.msra.mxu0 %v2749_v51  ;;  %v2227_v63 = vpop.permute.xlu1 %2226 }
 0x3f8   :  { %v2332_v56 = vpop.eup %2331  ;;  %1091 = vmatpush.msrb.mxu2 %v2749_v51  ;;  %1056 = vmatpush.msrb.mxu1 %v2755_v57  ;;  %v2775_v3 = vunpack.i.h.bf16 %v2227_v63  ;;  %v2777_v17 = vunpack.i.l.bf16 %v2227_v63 }
 0x3f9   :  { %v779_v10 = vmul.f32 %v2332_v56, %v2702_v40  ;;  %v608_v11 = vsel %vm607_vm10, %v2330_v41, %v604_v4  ;;  %v2334_v61 = vpop.eup %2333  ;;  %vm784_vm12 = vweird.f32 %v2332_v56  ;;  %v869_v41 = vld [vmem:[#allocation7 + $0x138] sm:$0xff]  ;;  %1036 = vmatpush.msra.mxu0 %v2757_v58  ;;  %1112 = vmatpush.msrb.mxu3 %v2755_v57 }
 0x3fa   :  { %v613_v42 = vsel %vm610_vm11, %v612_v7, %v608_v11  ;;  %v797_v13 = vmul.f32 %v2334_v61, %v503_v6  ;;  %vm785_vm14 = vmor %vm783_vm13, %vm784_vm12  ;;  %v2280_v40 = vpack.i.bf16 %v885_v43, %v869_v41  ;;  %1092 = vmatpush.msrb.mxu2 %v2757_v58  ;;  %1057 = vmatpush.msrb.mxu1 %v2775_v3  ;;  %v810_v61 = vld [vmem:[#allocation8 + $0x40] ss:$8 sm:$0x3] }
 0x3fb   :  { %v780_v60 = vsub.f32 1.0, %v779_v10  ;;  %v796_v12 = vmul.f32 %v794_v54, %v613_v42  ;;  %2276 = vrot.lane.b32.xlu0 %v2275_v39, %s2511_s2  ;;  %v2232_v59 = vpop.permute.xlu0 %2231  ;;  %1037 = vmatpush.msra.mxu0 %v2777_v17  ;;  %v812_v42 = vperm.slane %v810_v61, 0 }
 0x3fc   :  { %v2771_v1 = vunpack.i.h.bf16 %v2232_v59  ;;  %v2773_v2 = vunpack.i.l.bf16 %v2232_v59  ;;  %1093 = vmatpush.msrb.mxu2 %v2777_v17  ;;  %1113 = vmatpush.msrb.mxu3 %v2775_v3 }
 0x3fd   :  { %v781_v16 = vmul.f32 %v2332_v56, %v780_v60  ;;  %v2726_v18 = vadd.f32 %v797_v13, %v796_v12  ;;  %v813_v60 = vperm.slane %v810_v61, 1 }
 0x3fe   :  { %1038 = vmatpush.msra.mxu0 %v2773_v2  ;;  %1058 = vmatpush.msrb.mxu1 %v2771_v1 }
 0x3ff   :  { %v782_v20 = vadd.f32 %v2332_v56, %v781_v16  ;;  %2335 = vtanh.f32 %v2726_v18  ;;  %2281 = vrot.lane.b32.xlu2 %v2280_v40, %s2511_s2  ;;  %1094 = vmatpush.msrb.mxu2 %v2773_v2 }
 0x400   :  { %1114 = vmatpush.msrb.mxu3 %v2771_v1 }
 0x401   :  { %v786_v26 = vsel %vm785_vm14, %v2332_v56, %v782_v20 }
 0x402   :  { %v791_v31 = vsel %vm788_vm15, %v790_v27, %v786_v26 }
 0x403   :  { %2286 = vrot.lane.b32.xlu0 %v2285_v46, %s2511_s2 }
 0x405   :  { %v2336_v30 = vpop.eup %2335 }
 0x406   :  { %v2735_v32 = vmul.f32 %v2336_v30, %v791_v31 }
 0x408   :  { %2033 = vmatmul.msk.f32.vlgmr.msra.gmra.mxu1 %vm117_vm3, %v2735_v32  ;;  %2034 = vmatmul.msk.f32.vlgmr.msra.gmra.mxu2 %vm117_vm3, %v2735_v32 }
 0x42f   :  { %v2237_v62 = vpop.permute.xlu2 %2236 }
 0x430   :  { %v2779_v4 = vunpack.i.h.bf16 %v2237_v62  ;;  %v2781_v5 = vunpack.i.l.bf16 %v2237_v62 }
 0x432   :  { %1039 = vmatpush.msra.mxu0 %v2781_v5  ;;  %1059 = vmatpush.msrb.mxu1 %v2779_v4 }
 0x433   :  { %1095 = vmatpush.msrb.mxu2 %v2781_v5  ;;  %1115 = vmatpush.msrb.mxu3 %v2779_v4 }
 0x437   :  { %v2252_v54 = vpop.permute.xlu2 %2251 }
 0x438   :  { %v2803_v11 = vunpack.i.h.bf16 %v2252_v54  ;;  %v2805_v52 = vunpack.i.l.bf16 %v2252_v54 }
 0x449   :  { %v2262_v13 = vpop.permute.xlu2 %2261 }
 0x44a   :  { %v2821_v16 = vunpack.i.h.bf16 %v2262_v13  ;;  %v2823_v20 = vunpack.i.l.bf16 %v2262_v13 }
 0x451   :  { %v2272_v26 = vpop.permute.xlu2 %2271 }
 0x452   :  { %v2845_v29 = vunpack.i.h.bf16 %v2272_v26  ;;  %v2847_v19 = vunpack.i.l.bf16 %v2272_v26 }
 0x453   :  { %v2247_v56 = vpop.permute.xlu0 %2246 }
 0x454   :  { %v2795_v7 = vunpack.i.h.bf16 %v2247_v56  ;;  %v2797_v8 = vunpack.i.l.bf16 %v2247_v56  ;;  %v2519_v56 = vmov 0.0  }
 0x459   :  { %v2242_v6 = vpop.permute.xlu1 %2241  ;;  %v2282_v31 = vpop.permute.xlu2 %2281 }
 0x45a   :  { %v2799_v9 = vunpack.i.h.bf16 %v2242_v6  ;;  %v2801_v10 = vunpack.i.l.bf16 %v2242_v6  ;;  %v2861_v35 = vunpack.i.h.bf16 %v2282_v31  ;;  %v2863_v36 = vunpack.i.l.bf16 %v2282_v31 }
 0x45b   :  { %v2520_v6 = vmov 0.5  }
 0x45c   :  { %1040 = vmatpush.msra.mxu0 %v2801_v10  ;;  %1060 = vmatpush.msrb.mxu1 %v2799_v9 }
 0x45d   :  { %1096 = vmatpush.msrb.mxu2 %v2801_v10  ;;  %1116 = vmatpush.msrb.mxu3 %v2799_v9  ;;  %v2257_v12 = vpop.permute.xlu0 %2256 }
 0x45e   :  { %1041 = vmatpush.msra.mxu0 %v2797_v8  ;;  %1061 = vmatpush.msrb.mxu1 %v2795_v7  ;;  %v2817_v0 = vunpack.i.h.bf16 %v2257_v12  ;;  %v2819_v15 = vunpack.i.l.bf16 %v2257_v12 }
 0x45f   :  { %1097 = vmatpush.msrb.mxu2 %v2797_v8  ;;  %1117 = vmatpush.msrb.mxu3 %v2795_v7 }
 0x460   :  { %1042 = vmatpush.msra.mxu0 %v2805_v52  ;;  %1062 = vmatpush.msrb.mxu1 %v2803_v11 }
 0x461   :  { %1098 = vmatpush.msrb.mxu2 %v2805_v52  ;;  %1118 = vmatpush.msrb.mxu3 %v2803_v11 }
 0x462   :  { %1043 = vmatpush.msra.mxu0 %v2819_v15  ;;  %1063 = vmatpush.msrb.mxu1 %v2817_v0 }
 0x463   :  { %1099 = vmatpush.msrb.mxu2 %v2819_v15  ;;  %1119 = vmatpush.msrb.mxu3 %v2817_v0 }
 0x464   :  { %1044 = vmatpush.msra.mxu0 %v2823_v20  ;;  %1064 = vmatpush.msrb.mxu1 %v2821_v16 }
 0x465   :  { %1100 = vmatpush.msrb.mxu2 %v2823_v20  ;;  %1120 = vmatpush.msrb.mxu3 %v2821_v16  ;;  %v2267_v25 = vpop.permute.xlu0 %2266 }
 0x466   :  { %v2841_v27 = vunpack.i.h.bf16 %v2267_v25  ;;  %v2843_v28 = vunpack.i.l.bf16 %v2267_v25 }
 0x468   :  { %1045 = vmatpush.msra.mxu0 %v2843_v28  ;;  %1065 = vmatpush.msrb.mxu1 %v2841_v27 }
 0x469   :  { %1101 = vmatpush.msrb.mxu2 %v2843_v28  ;;  %1121 = vmatpush.msrb.mxu3 %v2841_v27 }
 0x46a   :  { %1046 = vmatpush.msra.mxu0 %v2847_v19  ;;  %1066 = vmatpush.msrb.mxu1 %v2845_v29 }
 0x46b   :  { %1102 = vmatpush.msrb.mxu2 %v2847_v19  ;;  %1122 = vmatpush.msrb.mxu3 %v2845_v29 }
 0x46d   :  { %v2277_v30 = vpop.permute.xlu0 %2276 }
 0x46e   :  { %v2857_v33 = vunpack.i.h.bf16 %v2277_v30  ;;  %v2859_v34 = vunpack.i.l.bf16 %v2277_v30 }
 0x470   :  { %1047 = vmatpush.msra.mxu0 %v2859_v34  ;;  %1067 = vmatpush.msrb.mxu1 %v2857_v33 }
 0x471   :  { %1103 = vmatpush.msrb.mxu2 %v2859_v34  ;;  %1123 = vmatpush.msrb.mxu3 %v2857_v33 }
 0x472   :  { %1048 = vmatpush.msra.mxu0 %v2863_v36  ;;  %1068 = vmatpush.msrb.mxu1 %v2861_v35 }
 0x473   :  { %1104 = vmatpush.msrb.mxu2 %v2863_v36  ;;  %1124 = vmatpush.msrb.mxu3 %v2861_v35 }
 0x475   :  { %v2287_v37 = vpop.permute.xlu0 %2286 }
 0x476   :  { %v2873_v38 = vunpack.i.h.bf16 %v2287_v37  ;;  %v2875_v39 = vunpack.i.l.bf16 %v2287_v37 }
 0x478   :  { %1049 = vmatpush.msra.mxu0 %v2875_v39  ;;  %1069 = vmatpush.msrb.mxu1 %v2873_v38 }
 0x479   :  { %1105 = vmatpush.msrb.mxu2 %v2875_v39  ;;  %1125 = vmatpush.msrb.mxu3 %v2873_v38 }
 0x47a   :  { %1146 = vmatpush.msrb.mxu0 %v2753_v55  ;;  %1166 = vmatpush.msra.mxu1 %v2751_v53 }
 0x47b   :  { %1202 = vmatpush.msra.mxu2 %v2753_v55  ;;  %1222 = vmatpush.msra.mxu3 %v2751_v53 }
 0x47c   :  { %1147 = vmatpush.msrb.mxu0 %v2749_v51  ;;  %1167 = vmatpush.msra.mxu1 %v2747_v50 }
 0x47d   :  { %1203 = vmatpush.msra.mxu2 %v2749_v51  ;;  %1223 = vmatpush.msra.mxu3 %v2747_v50 }
 0x47e   :  { %1148 = vmatpush.msrb.mxu0 %v2757_v58  ;;  %1168 = vmatpush.msra.mxu1 %v2755_v57 }
 0x47f   :  { %1204 = vmatpush.msra.mxu2 %v2757_v58  ;;  %1224 = vmatpush.msra.mxu3 %v2755_v57 }
 0x480   :  { %1149 = vmatpush.msrb.mxu0 %v2777_v17  ;;  %1169 = vmatpush.msra.mxu1 %v2775_v3 }
 0x481   :  { %1205 = vmatpush.msra.mxu2 %v2777_v17  ;;  %1225 = vmatpush.msra.mxu3 %v2775_v3 }
 0x482   :  { %1150 = vmatpush.msrb.mxu0 %v2773_v2  ;;  %1170 = vmatpush.msra.mxu1 %v2771_v1 }
 0x483   :  { %1206 = vmatpush.msra.mxu2 %v2773_v2  ;;  %1226 = vmatpush.msra.mxu3 %v2771_v1 }
 0x484   :  { %1151 = vmatpush.msrb.mxu0 %v2781_v5  ;;  %1171 = vmatpush.msra.mxu1 %v2779_v4 }
 0x485   :  { %v836_v14 = vpop.f32.mrf.mxu1  ;;  %1207 = vmatpush.msra.mxu2 %v2781_v5  ;;  %1227 = vmatpush.msra.mxu3 %v2779_v4 }
 0x486   :  { %v2829_v22 = vadd.f32 %v836_v14, %v812_v42  ;;  %1152 = vmatpush.msrb.mxu0 %v2801_v10  ;;  %1172 = vmatpush.msra.mxu1 %v2799_v9 }
 0x487   :  { %1208 = vmatpush.msra.mxu2 %v2801_v10  ;;  %1228 = vmatpush.msra.mxu3 %v2799_v9 }
 0x488   :  { %1153 = vmatpush.msrb.mxu0 %v2797_v8  ;;  %1173 = vmatpush.msra.mxu1 %v2795_v7 }
 0x489   :  { %1209 = vmatpush.msra.mxu2 %v2797_v8  ;;  %1229 = vmatpush.msra.mxu3 %v2795_v7 }
 0x48a   :  { %1154 = vmatpush.msrb.mxu0 %v2805_v52  ;;  %1174 = vmatpush.msra.mxu1 %v2803_v11 }
 0x48b   :  { %v856_v21 = vpop.f32.mrf.mxu2  ;;  %1210 = vmatpush.msra.mxu2 %v2805_v52  ;;  %1230 = vmatpush.msra.mxu3 %v2803_v11 }
 0x48c   :  { %v2831_v23 = vadd.f32 %v856_v21, %v813_v60  ;;  %1155 = vmatpush.msrb.mxu0 %v2819_v15  ;;  %1175 = vmatpush.msra.mxu1 %v2817_v0 }
 0x48d   :  { %1211 = vmatpush.msra.mxu2 %v2819_v15  ;;  %1231 = vmatpush.msra.mxu3 %v2817_v0 }
 0x48e   :  { %v859_v24 = vmax.f32 %v2829_v22, %v2831_v23  ;;  %1156 = vmatpush.msrb.mxu0 %v2823_v20  ;;  %1176 = vmatpush.msra.mxu1 %v2821_v16 }
 0x48f   :  { %1212 = vmatpush.msra.mxu2 %v2823_v20  ;;  %1232 = vmatpush.msra.mxu3 %v2821_v16 }
 0x490   :  { %860 = vmax.xlane.f32.xlu1 %v859_v24  ;;  %1157 = vmatpush.msrb.mxu0 %v2843_v28 }
 0x491   :  { %1177 = vmatpush.msra.mxu1 %v2841_v27  ;;  %1213 = vmatpush.msra.mxu2 %v2843_v28 }
 0x492   :  { %1233 = vmatpush.msra.mxu3 %v2841_v27  ;;  %1158 = vmatpush.msrb.mxu0 %v2847_v19 }
 0x493   :  { %1178 = vmatpush.msra.mxu1 %v2845_v29  ;;  %1214 = vmatpush.msra.mxu2 %v2847_v19 }
 0x494   :  { %1234 = vmatpush.msra.mxu3 %v2845_v29  ;;  %1159 = vmatpush.msrb.mxu0 %v2859_v34 }
 0x495   :  { %1179 = vmatpush.msra.mxu1 %v2857_v33  ;;  %1215 = vmatpush.msra.mxu2 %v2859_v34 }
 0x496   :  { %1235 = vmatpush.msra.mxu3 %v2857_v33  ;;  %1160 = vmatpush.msrb.mxu0 %v2863_v36 }
 0x497   :  { %1180 = vmatpush.msra.mxu1 %v2861_v35  ;;  %1216 = vmatpush.msra.mxu2 %v2863_v36 }
 0x498   :  { %1236 = vmatpush.msra.mxu3 %v2861_v35  ;;  %1161 = vmatpush.msrb.mxu0 %v2875_v39 }
 0x499   :  { %1181 = vmatpush.msra.mxu1 %v2873_v38  ;;  %1217 = vmatpush.msra.mxu2 %v2875_v39 }
 0x49a   :  { %1237 = vmatpush.msra.mxu3 %v2873_v38 }
 0x503   :  { %v861_v41 = vpop.xlane.xlu1 %860 }
 0x504   :  { %v862_v43 = vsub.f32 %v2829_v22, %v861_v41  ;;  %v863_v40 = vsub.f32 %v2831_v23, %v861_v41 }
 0x506   :  { %v864_v44 = vmul.f32 1.442695, %v862_v43  ;;  %v866_v45 = vmul.f32 1.442695, %v863_v40 }
 0x508   :  { %2337 = vpow2.f32 %v864_v44 }
 0x509   :  { %2339 = vpow2.f32 %v866_v45 }
 0x50e   :  { %v2947_v46 = vpop.eup %2337 }
 0x50f   :  { %v2949_v47 = vpop.eup %2339  ;;  %vm900_vm0 = vcmp.gt.f32.partialorder %v2947_v46, 0.5 }
 0x510   :  { %2037 = vmatmul.msk.f32.vlgmr.msra.gmra.mxu0 %vm900_vm0, %v2517_v48  ;;  %vm901_vm4 = vcmp.gt.f32.partialorder %v2949_v47, 0.5 }
 0x511   :  { %2038 = vmatmul.msk.f32.vlgmr.msrb.gmra.mxu1 %vm901_vm4, %v2517_v48  ;;  %1258 = vmatpush.msra.mxu0 %v2753_v55 }
 0x512   :  { %1278 = vmatpush.msrb.mxu1 %v2751_v53 }
 0x513   :  { %1259 = vmatpush.msra.mxu0 %v2749_v51 }
 0x514   :  { %1279 = vmatpush.msrb.mxu1 %v2747_v50 }
 0x515   :  { %1260 = vmatpush.msra.mxu0 %v2757_v58 }
 0x516   :  { %1280 = vmatpush.msrb.mxu1 %v2755_v57 }
 0x517   :  { %1261 = vmatpush.msra.mxu0 %v2777_v17 }
 0x518   :  { %1281 = vmatpush.msrb.mxu1 %v2775_v3 }
 0x519   :  { %1262 = vmatpush.msra.mxu0 %v2773_v2 }
 0x51a   :  { %1282 = vmatpush.msrb.mxu1 %v2771_v1 }
 0x51b   :  { %1263 = vmatpush.msra.mxu0 %v2781_v5 }
 0x51c   :  { %1283 = vmatpush.msrb.mxu1 %v2779_v4 }
 0x51d   :  { %1264 = vmatpush.msra.mxu0 %v2801_v10 }
 0x51e   :  { %1284 = vmatpush.msrb.mxu1 %v2799_v9 }
 0x51f   :  { %1265 = vmatpush.msra.mxu0 %v2797_v8 }
 0x520   :  { %1285 = vmatpush.msrb.mxu1 %v2795_v7 }
 0x521   :  { %1266 = vmatpush.msra.mxu0 %v2805_v52 }
 0x522   :  { %1286 = vmatpush.msrb.mxu1 %v2803_v11 }
 0x523   :  { %1267 = vmatpush.msra.mxu0 %v2819_v15 }
 0x524   :  { %1287 = vmatpush.msrb.mxu1 %v2817_v0 }
 0x525   :  { %1268 = vmatpush.msra.mxu0 %v2823_v20 }
 0x526   :  { %1288 = vmatpush.msrb.mxu1 %v2821_v16 }
 0x527   :  { %1269 = vmatpush.msra.mxu0 %v2843_v28 }
 0x528   :  { %1289 = vmatpush.msrb.mxu1 %v2841_v27 }
 0x529   :  { %1270 = vmatpush.msra.mxu0 %v2847_v19 }
 0x52a   :  { %1290 = vmatpush.msrb.mxu1 %v2845_v29 }
 0x52b   :  { %1271 = vmatpush.msra.mxu0 %v2859_v34 }
 0x52c   :  { %1291 = vmatpush.msrb.mxu1 %v2857_v33 }
 0x52d   :  { %1272 = vmatpush.msra.mxu0 %v2863_v36 }
 0x52e   :  { %1292 = vmatpush.msrb.mxu1 %v2861_v35 }
 0x52f   :  { %1273 = vmatpush.msra.mxu0 %v2875_v39 }
 0x530   :  { %1293 = vmatpush.msrb.mxu1 %v2873_v38 }
 0x58d   :  { %v1051_v59 = vpop.f32.mrf.mxu0 }
 0x58e   :  { %v1071_v62 = vpop.f32.mrf.mxu1 }
 0x58f   :  { %v1072_v63 = vadd.f32 %v1071_v62, %v1051_v59 }
 0x591   :  { %vm1074_vm5 = vcmp.ge.f32.partialorder %v1072_v63, 50.0 }
 0x592   :  { %v1075_v54 = vsel %vm1074_vm5, 0.5, %v2519_v56  ;;  %v1076_v61 = vsel %vm1074_vm5, 1.0, %v2520_v6 }
 0x593   :  { %v1077_v42 = vadd.f32 %v1076_v61, %v1075_v54 }
 0x595   :  { %v1078_v60 = vmul.f32 0.5, %v1077_v42 }
 0x597   :  { %1081 = vperm.xlu2 %2290, %v1078_v60  }
 0x5f1   :  { %v1082_v12 = vpop.permute.xlu2 %1081 }
 0x5f2   :  { %vm1084_vm6 = vcmp.gt.f32.partialorder %v2947_v46, %v1082_v12  ;;  %vm1085_vm7 = vcmp.gt.f32.partialorder %v2949_v47, %v1082_v12 }
 0x5f3   :  { %2041 = vmatmul.msk.f32.vlgmr.msrb.gmra.mxu2 %vm1084_vm6, %v2517_v48  ;;  %2042 = vmatmul.msk.f32.vlgmr.msrb.gmra.mxu3 %vm1085_vm7, %v2517_v48 }
 0x5f4   :  { %1314 = vmatpush.msrb.mxu2 %v2753_v55  ;;  %1334 = vmatpush.msrb.mxu3 %v2751_v53 }
 0x5f6   :  { %1315 = vmatpush.msrb.mxu2 %v2749_v51  ;;  %1335 = vmatpush.msrb.mxu3 %v2747_v50 }
 0x5f8   :  { %1316 = vmatpush.msrb.mxu2 %v2757_v58  ;;  %1336 = vmatpush.msrb.mxu3 %v2755_v57 }
 0x5fa   :  { %1317 = vmatpush.msrb.mxu2 %v2777_v17  ;;  %1337 = vmatpush.msrb.mxu3 %v2775_v3 }
 0x5fc   :  { %1318 = vmatpush.msrb.mxu2 %v2773_v2  ;;  %1338 = vmatpush.msrb.mxu3 %v2771_v1 }
 0x5fe   :  { %1319 = vmatpush.msrb.mxu2 %v2781_v5  ;;  %1339 = vmatpush.msrb.mxu3 %v2779_v4 }
 0x600   :  { %1320 = vmatpush.msrb.mxu2 %v2801_v10  ;;  %1340 = vmatpush.msrb.mxu3 %v2799_v9 }
 0x602   :  { %1321 = vmatpush.msrb.mxu2 %v2797_v8  ;;  %1341 = vmatpush.msrb.mxu3 %v2795_v7 }
 0x604   :  { %1322 = vmatpush.msrb.mxu2 %v2805_v52  ;;  %1342 = vmatpush.msrb.mxu3 %v2803_v11 }
 0x606   :  { %1323 = vmatpush.msrb.mxu2 %v2819_v15  ;;  %1343 = vmatpush.msrb.mxu3 %v2817_v0 }
 0x608   :  { %1324 = vmatpush.msrb.mxu2 %v2823_v20  ;;  %1344 = vmatpush.msrb.mxu3 %v2821_v16 }
 0x60a   :  { %1325 = vmatpush.msrb.mxu2 %v2843_v28  ;;  %1345 = vmatpush.msrb.mxu3 %v2841_v27 }
 0x60c   :  { %1326 = vmatpush.msrb.mxu2 %v2847_v19  ;;  %1346 = vmatpush.msrb.mxu3 %v2845_v29 }
 0x60e   :  { %1327 = vmatpush.msrb.mxu2 %v2859_v34  ;;  %1347 = vmatpush.msrb.mxu3 %v2857_v33 }
 0x610   :  { %1328 = vmatpush.msrb.mxu2 %v2863_v36  ;;  %1348 = vmatpush.msrb.mxu3 %v2861_v35 }
 0x612   :  { %1329 = vmatpush.msrb.mxu2 %v2875_v39  ;;  %1349 = vmatpush.msrb.mxu3 %v2873_v38 }
 0x676   :  { %v1107_v13 = vpop.f32.mrf.mxu2  ;;  %v1127_v14 = vpop.f32.mrf.mxu3 }
 0x677   :  { %v1128_v21 = vadd.f32 %v1127_v14, %v1107_v13 }
 0x679   :  { %vm1130_vm8 = vcmp.ge.f32.partialorder %v1128_v21, 50.0 }
 0x67a   :  { %v1131_v22 = vsel %vm1130_vm8, %v1078_v60, %v1075_v54  ;;  %v1132_v23 = vsel %vm1130_vm8, %v1076_v61, %v1078_v60 }
 0x67b   :  { %v1133_v24 = vadd.f32 %v1132_v23, %v1131_v22 }
 0x67d   :  { %v1134_v25 = vmul.f32 0.5, %v1133_v24 }
 0x67f   :  { %1137 = vperm.xlu0 %2291, %v1134_v25  }
 0x6f1   :  { %v1138_v26 = vpop.permute.xlu0 %1137 }
 0x6f2   :  { %vm1140_vm9 = vcmp.gt.f32.partialorder %v2947_v46, %v1138_v26  ;;  %vm1141_vm10 = vcmp.gt.f32.partialorder %v2949_v47, %v1138_v26 }
 0x6f3   :  { %2045 = vmatmul.msk.f32.vlgmr.msrb.gmra.mxu0 %vm1140_vm9, %v2517_v48  ;;  %2046 = vmatmul.msk.f32.vlgmr.msra.gmra.mxu1 %vm1141_vm10, %v2517_v48 }
 0x6f4   :  { %1370 = vmatpush.msrb.mxu0 %v2753_v55  ;;  %1390 = vmatpush.msra.mxu1 %v2751_v53 }
 0x6f6   :  { %1371 = vmatpush.msrb.mxu0 %v2749_v51  ;;  %1391 = vmatpush.msra.mxu1 %v2747_v50 }
 0x6f8   :  { %1372 = vmatpush.msrb.mxu0 %v2757_v58  ;;  %1392 = vmatpush.msra.mxu1 %v2755_v57 }
 0x6fa   :  { %1373 = vmatpush.msrb.mxu0 %v2777_v17  ;;  %1393 = vmatpush.msra.mxu1 %v2775_v3 }
 0x6fc   :  { %1374 = vmatpush.msrb.mxu0 %v2773_v2  ;;  %1394 = vmatpush.msra.mxu1 %v2771_v1 }
 0x6fe   :  { %1375 = vmatpush.msrb.mxu0 %v2781_v5  ;;  %1395 = vmatpush.msra.mxu1 %v2779_v4 }
 0x700   :  { %1376 = vmatpush.msrb.mxu0 %v2801_v10  ;;  %1396 = vmatpush.msra.mxu1 %v2799_v9 }
 0x702   :  { %1377 = vmatpush.msrb.mxu0 %v2797_v8  ;;  %1397 = vmatpush.msra.mxu1 %v2795_v7 }
 0x704   :  { %1378 = vmatpush.msrb.mxu0 %v2805_v52  ;;  %1398 = vmatpush.msra.mxu1 %v2803_v11 }
 0x706   :  { %1379 = vmatpush.msrb.mxu0 %v2819_v15  ;;  %1399 = vmatpush.msra.mxu1 %v2817_v0 }
 0x708   :  { %1380 = vmatpush.msrb.mxu0 %v2823_v20  ;;  %1400 = vmatpush.msra.mxu1 %v2821_v16 }
 0x70a   :  { %1381 = vmatpush.msrb.mxu0 %v2843_v28  ;;  %1401 = vmatpush.msra.mxu1 %v2841_v27 }
 0x70c   :  { %1382 = vmatpush.msrb.mxu0 %v2847_v19  ;;  %1402 = vmatpush.msra.mxu1 %v2845_v29 }
 0x70e   :  { %1383 = vmatpush.msrb.mxu0 %v2859_v34  ;;  %1403 = vmatpush.msra.mxu1 %v2857_v33 }
 0x710   :  { %1384 = vmatpush.msrb.mxu0 %v2863_v36  ;;  %1404 = vmatpush.msra.mxu1 %v2861_v35 }
 0x712   :  { %1385 = vmatpush.msrb.mxu0 %v2875_v39  ;;  %1405 = vmatpush.msra.mxu1 %v2873_v38 }
 0x770   :  { %v1163_v30 = vpop.f32.mrf.mxu0  ;;  %v1183_v31 = vpop.f32.mrf.mxu1 }
 0x771   :  { %v1184_v37 = vadd.f32 %v1183_v31, %v1163_v30 }
 0x773   :  { %vm1186_vm11 = vcmp.ge.f32.partialorder %v1184_v37, 50.0 }
 0x774   :  { %v1187_v41 = vsel %vm1186_vm11, %v1134_v25, %v1131_v22  ;;  %v1188_v43 = vsel %vm1186_vm11, %v1132_v23, %v1134_v25 }
 0x775   :  { %v1189_v40 = vadd.f32 %v1188_v43, %v1187_v41 }
 0x777   :  { %v1190_v44 = vmul.f32 0.5, %v1189_v40 }
 0x779   :  { %1193 = vperm.xlu2 %2290, %v1190_v44  }
 0x7d3   :  { %v1194_v45 = vpop.permute.xlu2 %1193 }
 0x7d4   :  { %vm1196_vm12 = vcmp.gt.f32.partialorder %v2947_v46, %v1194_v45  ;;  %vm1197_vm13 = vcmp.gt.f32.partialorder %v2949_v47, %v1194_v45 }
 0x7d5   :  { %2049 = vmatmul.msk.f32.vlgmr.msra.gmra.mxu2 %vm1196_vm12, %v2517_v48  ;;  %2050 = vmatmul.msk.f32.vlgmr.msra.gmra.mxu3 %vm1197_vm13, %v2517_v48 }
 0x7d6   :  { %1426 = vmatpush.msra.mxu2 %v2753_v55  ;;  %1446 = vmatpush.msra.mxu3 %v2751_v53 }
 0x7d8   :  { %1427 = vmatpush.msra.mxu2 %v2749_v51  ;;  %1447 = vmatpush.msra.mxu3 %v2747_v50 }
 0x7da   :  { %1428 = vmatpush.msra.mxu2 %v2757_v58  ;;  %1448 = vmatpush.msra.mxu3 %v2755_v57 }
 0x7dc   :  { %1429 = vmatpush.msra.mxu2 %v2777_v17  ;;  %1449 = vmatpush.msra.mxu3 %v2775_v3 }
 0x7de   :  { %1430 = vmatpush.msra.mxu2 %v2773_v2  ;;  %1450 = vmatpush.msra.mxu3 %v2771_v1 }
 0x7e0   :  { %1431 = vmatpush.msra.mxu2 %v2781_v5  ;;  %1451 = vmatpush.msra.mxu3 %v2779_v4 }
 0x7e2   :  { %1432 = vmatpush.msra.mxu2 %v2801_v10  ;;  %1452 = vmatpush.msra.mxu3 %v2799_v9 }
 0x7e4   :  { %1433 = vmatpush.msra.mxu2 %v2797_v8  ;;  %1453 = vmatpush.msra.mxu3 %v2795_v7 }
 0x7e6   :  { %1434 = vmatpush.msra.mxu2 %v2805_v52  ;;  %1454 = vmatpush.msra.mxu3 %v2803_v11 }
 0x7e8   :  { %1435 = vmatpush.msra.mxu2 %v2819_v15  ;;  %1455 = vmatpush.msra.mxu3 %v2817_v0 }
 0x7ea   :  { %1436 = vmatpush.msra.mxu2 %v2823_v20  ;;  %1456 = vmatpush.msra.mxu3 %v2821_v16 }
 0x7ec   :  { %1437 = vmatpush.msra.mxu2 %v2843_v28  ;;  %1457 = vmatpush.msra.mxu3 %v2841_v27 }
 0x7ee   :  { %1438 = vmatpush.msra.mxu2 %v2847_v19  ;;  %1458 = vmatpush.msra.mxu3 %v2845_v29 }
 0x7f0   :  { %1439 = vmatpush.msra.mxu2 %v2859_v34  ;;  %1459 = vmatpush.msra.mxu3 %v2857_v33 }
 0x7f2   :  { %1440 = vmatpush.msra.mxu2 %v2863_v36  ;;  %1460 = vmatpush.msra.mxu3 %v2861_v35 }
 0x7f4   :  { %1441 = vmatpush.msra.mxu2 %v2875_v39  ;;  %1461 = vmatpush.msra.mxu3 %v2873_v38 }
 0x858   :  { %v1219_v49 = vpop.f32.mrf.mxu2  ;;  %v1239_v59 = vpop.f32.mrf.mxu3 }
 0x859   :  { %v1240_v62 = vadd.f32 %v1239_v59, %v1219_v49 }
 0x85b   :  { %vm1242_vm14 = vcmp.ge.f32.partialorder %v1240_v62, 50.0 }
 0x85c   :  { %v1243_v63 = vsel %vm1242_vm14, %v1190_v44, %v1187_v41  ;;  %v1244_v56 = vsel %vm1242_vm14, %v1188_v43, %v1190_v44 }
 0x85d   :  { %v1245_v54 = vadd.f32 %v1244_v56, %v1243_v63 }
 0x85f   :  { %v1246_v6 = vmul.f32 0.5, %v1245_v54 }
 0x861   :  { %1249 = vperm.xlu1 %2292, %v1246_v6  }
 0x8d3   :  { %v1250_v61 = vpop.permute.xlu1 %1249 }
 0x8d4   :  { %vm1252_vm15 = vcmp.gt.f32.partialorder %v2947_v46, %v1250_v61  ;;  %vm1253_vm0 = vcmp.gt.f32.partialorder %v2949_v47, %v1250_v61 }
 0x8d5   :  { %2053 = vmatmul.msk.f32.vlgmr.msra.gmra.mxu0 %vm1252_vm15, %v2517_v48  ;;  %2054 = vmatmul.msk.f32.vlgmr.msrb.gmra.mxu1 %vm1253_vm0, %v2517_v48 }
 0x8d6   :  { %1482 = vmatpush.msra.mxu0 %v2753_v55  ;;  %1502 = vmatpush.msrb.mxu1 %v2751_v53 }
 0x8d8   :  { %1483 = vmatpush.msra.mxu0 %v2749_v51  ;;  %1503 = vmatpush.msrb.mxu1 %v2747_v50 }
 0x8da   :  { %1484 = vmatpush.msra.mxu0 %v2757_v58  ;;  %1504 = vmatpush.msrb.mxu1 %v2755_v57 }
 0x8dc   :  { %1485 = vmatpush.msra.mxu0 %v2777_v17  ;;  %1505 = vmatpush.msrb.mxu1 %v2775_v3 }
 0x8de   :  { %1486 = vmatpush.msra.mxu0 %v2773_v2  ;;  %1506 = vmatpush.msrb.mxu1 %v2771_v1 }
 0x8e0   :  { %1487 = vmatpush.msra.mxu0 %v2781_v5  ;;  %1507 = vmatpush.msrb.mxu1 %v2779_v4 }
 0x8e2   :  { %1488 = vmatpush.msra.mxu0 %v2801_v10  ;;  %1508 = vmatpush.msrb.mxu1 %v2799_v9 }
 0x8e4   :  { %1489 = vmatpush.msra.mxu0 %v2797_v8  ;;  %1509 = vmatpush.msrb.mxu1 %v2795_v7 }
 0x8e6   :  { %1490 = vmatpush.msra.mxu0 %v2805_v52  ;;  %1510 = vmatpush.msrb.mxu1 %v2803_v11 }
 0x8e8   :  { %1491 = vmatpush.msra.mxu0 %v2819_v15  ;;  %1511 = vmatpush.msrb.mxu1 %v2817_v0 }
 0x8ea   :  { %1492 = vmatpush.msra.mxu0 %v2823_v20  ;;  %1512 = vmatpush.msrb.mxu1 %v2821_v16 }
 0x8ec   :  { %1493 = vmatpush.msra.mxu0 %v2843_v28  ;;  %1513 = vmatpush.msrb.mxu1 %v2841_v27 }
 0x8ee   :  { %1494 = vmatpush.msra.mxu0 %v2847_v19  ;;  %1514 = vmatpush.msrb.mxu1 %v2845_v29 }
 0x8f0   :  { %1495 = vmatpush.msra.mxu0 %v2859_v34  ;;  %1515 = vmatpush.msrb.mxu1 %v2857_v33 }
 0x8f2   :  { %1496 = vmatpush.msra.mxu0 %v2863_v36  ;;  %1516 = vmatpush.msrb.mxu1 %v2861_v35 }
 0x8f4   :  { %1497 = vmatpush.msra.mxu0 %v2875_v39  ;;  %1517 = vmatpush.msrb.mxu1 %v2873_v38 }
 0x952   :  { %v1275_v42 = vpop.f32.mrf.mxu0  ;;  %v1295_v60 = vpop.f32.mrf.mxu1 }
 0x953   :  { %v1296_v12 = vadd.f32 %v1295_v60, %v1275_v42 }
 0x955   :  { %vm1298_vm4 = vcmp.ge.f32.partialorder %v1296_v12, 50.0 }
 0x956   :  { %v1299_v13 = vsel %vm1298_vm4, %v1246_v6, %v1243_v63  ;;  %v1300_v14 = vsel %vm1298_vm4, %v1244_v56, %v1246_v6 }
 0x957   :  { %v1301_v21 = vadd.f32 %v1300_v14, %v1299_v13 }
 0x959   :  { %v1302_v22 = vmul.f32 0.5, %v1301_v21 }
 0x95b   :  { %1305 = vperm.xlu2 %2290, %v1302_v22  }
 0x9b5   :  { %v1306_v23 = vpop.permute.xlu2 %1305 }
 0x9b6   :  { %vm1308_vm5 = vcmp.gt.f32.partialorder %v2947_v46, %v1306_v23  ;;  %vm1309_vm6 = vcmp.gt.f32.partialorder %v2949_v47, %v1306_v23 }
 0x9b7   :  { %2057 = vmatmul.msk.f32.vlgmr.msrb.gmra.mxu2 %vm1308_vm5, %v2517_v48  ;;  %2058 = vmatmul.msk.f32.vlgmr.msrb.gmra.mxu3 %vm1309_vm6, %v2517_v48 }
 0x9b8   :  { %1538 = vmatpush.msrb.mxu2 %v2753_v55  ;;  %1558 = vmatpush.msrb.mxu3 %v2751_v53 }
 0x9ba   :  { %1539 = vmatpush.msrb.mxu2 %v2749_v51  ;;  %1559 = vmatpush.msrb.mxu3 %v2747_v50 }
 0x9bc   :  { %1540 = vmatpush.msrb.mxu2 %v2757_v58  ;;  %1560 = vmatpush.msrb.mxu3 %v2755_v57 }
 0x9be   :  { %1541 = vmatpush.msrb.mxu2 %v2777_v17  ;;  %1561 = vmatpush.msrb.mxu3 %v2775_v3 }
 0x9c0   :  { %1542 = vmatpush.msrb.mxu2 %v2773_v2  ;;  %1562 = vmatpush.msrb.mxu3 %v2771_v1 }
 0x9c2   :  { %1543 = vmatpush.msrb.mxu2 %v2781_v5  ;;  %1563 = vmatpush.msrb.mxu3 %v2779_v4 }
 0x9c4   :  { %1544 = vmatpush.msrb.mxu2 %v2801_v10  ;;  %1564 = vmatpush.msrb.mxu3 %v2799_v9 }
 0x9c6   :  { %1545 = vmatpush.msrb.mxu2 %v2797_v8  ;;  %1565 = vmatpush.msrb.mxu3 %v2795_v7 }
 0x9c8   :  { %1546 = vmatpush.msrb.mxu2 %v2805_v52  ;;  %1566 = vmatpush.msrb.mxu3 %v2803_v11 }
 0x9ca   :  { %1547 = vmatpush.msrb.mxu2 %v2819_v15  ;;  %1567 = vmatpush.msrb.mxu3 %v2817_v0 }
 0x9cc   :  { %1548 = vmatpush.msrb.mxu2 %v2823_v20  ;;  %1568 = vmatpush.msrb.mxu3 %v2821_v16 }
 0x9ce   :  { %1549 = vmatpush.msrb.mxu2 %v2843_v28  ;;  %1569 = vmatpush.msrb.mxu3 %v2841_v27 }
 0x9d0   :  { %1550 = vmatpush.msrb.mxu2 %v2847_v19  ;;  %1570 = vmatpush.msrb.mxu3 %v2845_v29 }
 0x9d2   :  { %1551 = vmatpush.msrb.mxu2 %v2859_v34  ;;  %1571 = vmatpush.msrb.mxu3 %v2857_v33 }
 0x9d4   :  { %1552 = vmatpush.msrb.mxu2 %v2863_v36  ;;  %1572 = vmatpush.msrb.mxu3 %v2861_v35 }
 0x9d6   :  { %1553 = vmatpush.msrb.mxu2 %v2875_v39  ;;  %1573 = vmatpush.msrb.mxu3 %v2873_v38 }
 0xa3a   :  { %v1331_v24 = vpop.f32.mrf.mxu2  ;;  %v1351_v25 = vpop.f32.mrf.mxu3 }
 0xa3b   :  { %v1352_v26 = vadd.f32 %v1351_v25, %v1331_v24 }
 0xa3d   :  { %vm1354_vm7 = vcmp.ge.f32.partialorder %v1352_v26, 50.0 }
 0xa3e   :  { %v1355_v30 = vsel %vm1354_vm7, %v1302_v22, %v1299_v13  ;;  %v1356_v31 = vsel %vm1354_vm7, %v1300_v14, %v1302_v22 }
 0xa3f   :  { %v1357_v37 = vadd.f32 %v1356_v31, %v1355_v30 }
 0xa41   :  { %v1358_v41 = vmul.f32 0.5, %v1357_v37 }
 0xa43   :  { %1361 = vperm.xlu0 %2291, %v1358_v41  }
 0xab5   :  { %v1362_v43 = vpop.permute.xlu0 %1361 }
 0xab6   :  { %vm1364_vm8 = vcmp.gt.f32.partialorder %v2947_v46, %v1362_v43  ;;  %vm1365_vm9 = vcmp.gt.f32.partialorder %v2949_v47, %v1362_v43 }
 0xab7   :  { %2061 = vmatmul.msk.f32.vlgmr.msrb.gmra.mxu0 %vm1364_vm8, %v2517_v48  ;;  %2062 = vmatmul.msk.f32.vlgmr.msra.gmra.mxu1 %vm1365_vm9, %v2517_v48 }
 0xab8   :  { %1594 = vmatpush.msrb.mxu0 %v2753_v55  ;;  %1614 = vmatpush.msra.mxu1 %v2751_v53 }
 0xaba   :  { %1595 = vmatpush.msrb.mxu0 %v2749_v51  ;;  %1615 = vmatpush.msra.mxu1 %v2747_v50 }
 0xabc   :  { %1596 = vmatpush.msrb.mxu0 %v2757_v58  ;;  %1616 = vmatpush.msra.mxu1 %v2755_v57 }
 0xabe   :  { %1597 = vmatpush.msrb.mxu0 %v2777_v17  ;;  %1617 = vmatpush.msra.mxu1 %v2775_v3 }
 0xac0   :  { %1598 = vmatpush.msrb.mxu0 %v2773_v2  ;;  %1618 = vmatpush.msra.mxu1 %v2771_v1 }
 0xac2   :  { %1599 = vmatpush.msrb.mxu0 %v2781_v5  ;;  %1619 = vmatpush.msra.mxu1 %v2779_v4 }
 0xac4   :  { %1600 = vmatpush.msrb.mxu0 %v2801_v10  ;;  %1620 = vmatpush.msra.mxu1 %v2799_v9 }
 0xac6   :  { %1601 = vmatpush.msrb.mxu0 %v2797_v8  ;;  %1621 = vmatpush.msra.mxu1 %v2795_v7 }
 0xac8   :  { %1602 = vmatpush.msrb.mxu0 %v2805_v52  ;;  %1622 = vmatpush.msra.mxu1 %v2803_v11 }
 0xaca   :  { %1603 = vmatpush.msrb.mxu0 %v2819_v15  ;;  %1623 = vmatpush.msra.mxu1 %v2817_v0 }
 0xacc   :  { %1604 = vmatpush.msrb.mxu0 %v2823_v20  ;;  %1624 = vmatpush.msra.mxu1 %v2821_v16 }
 0xace   :  { %1605 = vmatpush.msrb.mxu0 %v2843_v28  ;;  %1625 = vmatpush.msra.mxu1 %v2841_v27 }
 0xad0   :  { %1606 = vmatpush.msrb.mxu0 %v2847_v19  ;;  %1626 = vmatpush.msra.mxu1 %v2845_v29 }
 0xad2   :  { %1607 = vmatpush.msrb.mxu0 %v2859_v34  ;;  %1627 = vmatpush.msra.mxu1 %v2857_v33 }
 0xad4   :  { %1608 = vmatpush.msrb.mxu0 %v2863_v36  ;;  %1628 = vmatpush.msra.mxu1 %v2861_v35 }
 0xad6   :  { %1609 = vmatpush.msrb.mxu0 %v2875_v39  ;;  %1629 = vmatpush.msra.mxu1 %v2873_v38 }
 0xb34   :  { %v1387_v40 = vpop.f32.mrf.mxu0  ;;  %v1407_v44 = vpop.f32.mrf.mxu1 }
 0xb35   :  { %v1408_v45 = vadd.f32 %v1407_v44, %v1387_v40 }
 0xb37   :  { %vm1410_vm10 = vcmp.ge.f32.partialorder %v1408_v45, 50.0 }
 0xb38   :  { %v1411_v49 = vsel %vm1410_vm10, %v1358_v41, %v1355_v30  ;;  %v1412_v59 = vsel %vm1410_vm10, %v1356_v31, %v1358_v41 }
 0xb39   :  { %v1413_v62 = vadd.f32 %v1412_v59, %v1411_v49 }
 0xb3b   :  { %v1414_v63 = vmul.f32 0.5, %v1413_v62 }
 0xb3d   :  { %1417 = vperm.xlu2 %2290, %v1414_v63  }
 0xb97   :  { %v1418_v56 = vpop.permute.xlu2 %1417 }
 0xb98   :  { %vm1420_vm11 = vcmp.gt.f32.partialorder %v2947_v46, %v1418_v56  ;;  %vm1421_vm12 = vcmp.gt.f32.partialorder %v2949_v47, %v1418_v56 }
 0xb99   :  { %2065 = vmatmul.msk.f32.vlgmr.msra.gmra.mxu2 %vm1420_vm11, %v2517_v48  ;;  %2066 = vmatmul.msk.f32.vlgmr.msra.gmra.mxu3 %vm1421_vm12, %v2517_v48 }
 0xb9a   :  { %1650 = vmatpush.msra.mxu2 %v2753_v55  ;;  %1670 = vmatpush.msra.mxu3 %v2751_v53 }
 0xb9c   :  { %1651 = vmatpush.msra.mxu2 %v2749_v51  ;;  %1671 = vmatpush.msra.mxu3 %v2747_v50 }
 0xb9e   :  { %1652 = vmatpush.msra.mxu2 %v2757_v58  ;;  %1672 = vmatpush.msra.mxu3 %v2755_v57 }
 0xba0   :  { %1653 = vmatpush.msra.mxu2 %v2777_v17  ;;  %1673 = vmatpush.msra.mxu3 %v2775_v3 }
 0xba2   :  { %1654 = vmatpush.msra.mxu2 %v2773_v2  ;;  %1674 = vmatpush.msra.mxu3 %v2771_v1 }
 0xba4   :  { %1655 = vmatpush.msra.mxu2 %v2781_v5  ;;  %1675 = vmatpush.msra.mxu3 %v2779_v4 }
 0xba6   :  { %1656 = vmatpush.msra.mxu2 %v2801_v10  ;;  %1676 = vmatpush.msra.mxu3 %v2799_v9 }
 0xba8   :  { %1657 = vmatpush.msra.mxu2 %v2797_v8  ;;  %1677 = vmatpush.msra.mxu3 %v2795_v7 }
 0xbaa   :  { %1658 = vmatpush.msra.mxu2 %v2805_v52  ;;  %1678 = vmatpush.msra.mxu3 %v2803_v11 }
 0xbac   :  { %1659 = vmatpush.msra.mxu2 %v2819_v15  ;;  %1679 = vmatpush.msra.mxu3 %v2817_v0 }
 0xbae   :  { %1660 = vmatpush.msra.mxu2 %v2823_v20  ;;  %1680 = vmatpush.msra.mxu3 %v2821_v16 }
 0xbb0   :  { %1661 = vmatpush.msra.mxu2 %v2843_v28  ;;  %1681 = vmatpush.msra.mxu3 %v2841_v27 }
 0xbb2   :  { %1662 = vmatpush.msra.mxu2 %v2847_v19  ;;  %1682 = vmatpush.msra.mxu3 %v2845_v29 }
 0xbb4   :  { %1663 = vmatpush.msra.mxu2 %v2859_v34  ;;  %1683 = vmatpush.msra.mxu3 %v2857_v33 }
 0xbb6   :  { %1664 = vmatpush.msra.mxu2 %v2863_v36  ;;  %1684 = vmatpush.msra.mxu3 %v2861_v35 }
 0xbb8   :  { %1665 = vmatpush.msra.mxu2 %v2875_v39  ;;  %1685 = vmatpush.msra.mxu3 %v2873_v38 }
 0xc1c   :  { %v1443_v54 = vpop.f32.mrf.mxu2  ;;  %v1463_v6 = vpop.f32.mrf.mxu3 }
 0xc1d   :  { %v1464_v61 = vadd.f32 %v1463_v6, %v1443_v54 }
 0xc1f   :  { %vm1466_vm13 = vcmp.ge.f32.partialorder %v1464_v61, 50.0 }
 0xc20   :  { %v1467_v42 = vsel %vm1466_vm13, %v1414_v63, %v1411_v49  ;;  %v1468_v60 = vsel %vm1466_vm13, %v1412_v59, %v1414_v63 }
 0xc21   :  { %v1469_v12 = vadd.f32 %v1468_v60, %v1467_v42 }
 0xc23   :  { %v1470_v13 = vmul.f32 0.5, %v1469_v12  ;;  %v2367_v12 = vld [vmem:[#allocation7 + $0x148] sm:$0xff] }
 0xc25   :  { %1473 = vperm.xlu0 %2291, %v1470_v13  }
 0xc97   :  { %v1474_v14 = vpop.permute.xlu0 %1473 }
 0xc98   :  { %vm1476_vm14 = vcmp.gt.f32.partialorder %v2947_v46, %v1474_v14  ;;  %vm1477_vm15 = vcmp.gt.f32.partialorder %v2949_v47, %v1474_v14  ;;  %v2369_v14 = vld [vmem:[#allocation7 + $0x140] sm:$0xff] }
 0xc99   :  { %2069 = vmatmul.msk.f32.vlgmr.msra.gmra.mxu0 %vm1476_vm14, %v2517_v48  ;;  %2070 = vmatmul.msk.f32.vlgmr.msrb.gmra.mxu1 %vm1477_vm15, %v2517_v48 }
 0xc9a   :  { %1706 = vmatpush.msra.mxu0 %v2753_v55  ;;  %1726 = vmatpush.msrb.mxu1 %v2751_v53 }
 0xc9c   :  { %1707 = vmatpush.msra.mxu0 %v2749_v51  ;;  %1727 = vmatpush.msrb.mxu1 %v2747_v50 }
 0xc9e   :  { %1708 = vmatpush.msra.mxu0 %v2757_v58  ;;  %1728 = vmatpush.msrb.mxu1 %v2755_v57 }
 0xca0   :  { %1709 = vmatpush.msra.mxu0 %v2777_v17  ;;  %1729 = vmatpush.msrb.mxu1 %v2775_v3 }
 0xca2   :  { %1710 = vmatpush.msra.mxu0 %v2773_v2  ;;  %1730 = vmatpush.msrb.mxu1 %v2771_v1 }
 0xca4   :  { %1711 = vmatpush.msra.mxu0 %v2781_v5  ;;  %1731 = vmatpush.msrb.mxu1 %v2779_v4 }
 0xca6   :  { %1712 = vmatpush.msra.mxu0 %v2801_v10  ;;  %1732 = vmatpush.msrb.mxu1 %v2799_v9 }
 0xca8   :  { %1713 = vmatpush.msra.mxu0 %v2797_v8  ;;  %1733 = vmatpush.msrb.mxu1 %v2795_v7 }
 0xcaa   :  { %1714 = vmatpush.msra.mxu0 %v2805_v52  ;;  %1734 = vmatpush.msrb.mxu1 %v2803_v11 }
 0xcac   :  { %1715 = vmatpush.msra.mxu0 %v2819_v15  ;;  %1735 = vmatpush.msrb.mxu1 %v2817_v0 }
 0xcae   :  { %1716 = vmatpush.msra.mxu0 %v2823_v20  ;;  %1736 = vmatpush.msrb.mxu1 %v2821_v16 }
 0xcb0   :  { %1717 = vmatpush.msra.mxu0 %v2843_v28  ;;  %1737 = vmatpush.msrb.mxu1 %v2841_v27 }
 0xcb2   :  { %1718 = vmatpush.msra.mxu0 %v2847_v19  ;;  %1738 = vmatpush.msrb.mxu1 %v2845_v29 }
 0xcb4   :  { %1719 = vmatpush.msra.mxu0 %v2859_v34  ;;  %1739 = vmatpush.msrb.mxu1 %v2857_v33 }
 0xcb6   :  { %1720 = vmatpush.msra.mxu0 %v2863_v36  ;;  %1740 = vmatpush.msrb.mxu1 %v2861_v35 }
 0xcb8   :  { %1721 = vmatpush.msra.mxu0 %v2875_v39  ;;  %1741 = vmatpush.msrb.mxu1 %v2873_v38 }
 0xd16   :  { %v1499_v21 = vpop.f32.mrf.mxu0  ;;  %v1519_v22 = vpop.f32.mrf.mxu1 }
 0xd17   :  { %v1520_v23 = vadd.f32 %v1519_v22, %v1499_v21  ;;  %v2370_v21 = vld [vmem:[#allocation7 + $0x1c0] sm:$0xff]  ;;  %v2371_v22 = vld [vmem:[#allocation7 + $0x138] sm:$0xff] }
 0xd19   :  { %vm1522_vm0 = vcmp.ge.f32.partialorder %v1520_v23, 50.0  ;;  %v2372_v23 = vld [vmem:[#allocation7 + $0x1b8] sm:$0xff] }
 0xd1a   :  { %v1523_v24 = vsel %vm1522_vm0, %v1470_v13, %v1467_v42  ;;  %v1524_v25 = vsel %vm1522_vm0, %v1468_v60, %v1470_v13  ;;  %v2368_v13 = vld [vmem:[#allocation7 + $0x1c8] sm:$0xff] }
 0xd1b   :  { %v1525_v26 = vadd.f32 %v1524_v25, %v1523_v24 }
 0xd1d   :  { %v1526_v30 = vmul.f32 0.5, %v1525_v26 }
 0xd1f   :  { %1529 = vperm.xlu2 %2290, %v1526_v30  }
 0xd79   :  { %v1530_v31 = vpop.permute.xlu2 %1529 }
 0xd7a   :  { %vm1532_vm4 = vcmp.gt.f32.partialorder %v2947_v46, %v1530_v31  ;;  %vm1533_vm5 = vcmp.gt.f32.partialorder %v2949_v47, %v1530_v31 }
 0xd7b   :  { %2073 = vmatmul.msk.f32.vlgmr.msrb.gmra.mxu2 %vm1532_vm4, %v2517_v48  ;;  %2074 = vmatmul.msk.f32.vlgmr.msrb.gmra.mxu3 %vm1533_vm5, %v2517_v48 }
 0xd7c   :  { %1762 = vmatpush.msrb.mxu2 %v2753_v55  ;;  %1782 = vmatpush.msrb.mxu3 %v2751_v53 }
 0xd7e   :  { %1763 = vmatpush.msrb.mxu2 %v2749_v51  ;;  %1783 = vmatpush.msrb.mxu3 %v2747_v50 }
 0xd80   :  { %1764 = vmatpush.msrb.mxu2 %v2757_v58  ;;  %1784 = vmatpush.msrb.mxu3 %v2755_v57 }
 0xd82   :  { %1765 = vmatpush.msrb.mxu2 %v2777_v17  ;;  %1785 = vmatpush.msrb.mxu3 %v2775_v3 }
 0xd84   :  { %1766 = vmatpush.msrb.mxu2 %v2773_v2  ;;  %1786 = vmatpush.msrb.mxu3 %v2771_v1 }
 0xd86   :  { %1767 = vmatpush.msrb.mxu2 %v2781_v5  ;;  %1787 = vmatpush.msrb.mxu3 %v2779_v4 }
 0xd88   :  { %1768 = vmatpush.msrb.mxu2 %v2801_v10  ;;  %1788 = vmatpush.msrb.mxu3 %v2799_v9 }
 0xd8a   :  { %1769 = vmatpush.msrb.mxu2 %v2797_v8  ;;  %1789 = vmatpush.msrb.mxu3 %v2795_v7 }
 0xd8c   :  { %1770 = vmatpush.msrb.mxu2 %v2805_v52  ;;  %1790 = vmatpush.msrb.mxu3 %v2803_v11 }
 0xd8e   :  { %1771 = vmatpush.msrb.mxu2 %v2819_v15  ;;  %1791 = vmatpush.msrb.mxu3 %v2817_v0 }
 0xd90   :  { %1772 = vmatpush.msrb.mxu2 %v2823_v20  ;;  %1792 = vmatpush.msrb.mxu3 %v2821_v16 }
 0xd92   :  { %1773 = vmatpush.msrb.mxu2 %v2843_v28  ;;  %1793 = vmatpush.msrb.mxu3 %v2841_v27 }
 0xd94   :  { %1774 = vmatpush.msrb.mxu2 %v2847_v19  ;;  %1794 = vmatpush.msrb.mxu3 %v2845_v29 }
 0xd96   :  { %1775 = vmatpush.msrb.mxu2 %v2859_v34  ;;  %1795 = vmatpush.msrb.mxu3 %v2857_v33 }
 0xd98   :  { %1776 = vmatpush.msrb.mxu2 %v2863_v36  ;;  %1796 = vmatpush.msrb.mxu3 %v2861_v35 }
 0xd9a   :  { %1777 = vmatpush.msrb.mxu2 %v2875_v39  ;;  %1797 = vmatpush.msrb.mxu3 %v2873_v38 }
 0xdfe   :  { %v1555_v37 = vpop.f32.mrf.mxu2  ;;  %v1575_v41 = vpop.f32.mrf.mxu3 }
 0xdff   :  { %v1576_v43 = vadd.f32 %v1575_v41, %v1555_v37 }
 0xe01   :  { %vm1578_vm6 = vcmp.ge.f32.partialorder %v1576_v43, 50.0 }
 0xe02   :  { %v1579_v40 = vsel %vm1578_vm6, %v1526_v30, %v1523_v24  ;;  %v1580_v44 = vsel %vm1578_vm6, %v1524_v25, %v1526_v30  ;;  %v2373_v24 = vld [vmem:[#allocation7 + $0x130] sm:$0xff] }
 0xe03   :  { %v1581_v45 = vadd.f32 %v1580_v44, %v1579_v40  ;;  %v2374_v25 = vld [vmem:[#allocation7 + $0x1b0] sm:$0xff] }
 0xe05   :  { %v1582_v49 = vmul.f32 0.5, %v1581_v45 }
 0xe07   :  { %1585 = vperm.xlu1 %2292, %v1582_v49  }
 0xe79   :  { %v1586_v59 = vpop.permute.xlu1 %1585 }
 0xe7a   :  { %vm1588_vm7 = vcmp.gt.f32.partialorder %v2947_v46, %v1586_v59  ;;  %vm1589_vm8 = vcmp.gt.f32.partialorder %v2949_v47, %v1586_v59 }
 0xe7b   :  { %2077 = vmatmul.msk.f32.vlgmr.msrb.gmra.mxu0 %vm1588_vm7, %v2517_v48  ;;  %2078 = vmatmul.msk.f32.vlgmr.msra.gmra.mxu1 %vm1589_vm8, %v2517_v48 }
 0xe7c   :  { %1818 = vmatpush.msrb.mxu0 %v2753_v55  ;;  %1838 = vmatpush.msra.mxu1 %v2751_v53 }
 0xe7e   :  { %1819 = vmatpush.msrb.mxu0 %v2749_v51  ;;  %1839 = vmatpush.msra.mxu1 %v2747_v50 }
 0xe80   :  { %1820 = vmatpush.msrb.mxu0 %v2757_v58  ;;  %1840 = vmatpush.msra.mxu1 %v2755_v57 }
 0xe82   :  { %1821 = vmatpush.msrb.mxu0 %v2777_v17  ;;  %1841 = vmatpush.msra.mxu1 %v2775_v3 }
 0xe84   :  { %1822 = vmatpush.msrb.mxu0 %v2773_v2  ;;  %1842 = vmatpush.msra.mxu1 %v2771_v1 }
 0xe86   :  { %1823 = vmatpush.msrb.mxu0 %v2781_v5  ;;  %1843 = vmatpush.msra.mxu1 %v2779_v4 }
 0xe88   :  { %1824 = vmatpush.msrb.mxu0 %v2801_v10  ;;  %1844 = vmatpush.msra.mxu1 %v2799_v9 }
 0xe8a   :  { %1825 = vmatpush.msrb.mxu0 %v2797_v8  ;;  %1845 = vmatpush.msra.mxu1 %v2795_v7 }
 0xe8c   :  { %1826 = vmatpush.msrb.mxu0 %v2805_v52  ;;  %1846 = vmatpush.msra.mxu1 %v2803_v11 }
 0xe8e   :  { %1827 = vmatpush.msrb.mxu0 %v2819_v15  ;;  %1847 = vmatpush.msra.mxu1 %v2817_v0 }
 0xe90   :  { %1828 = vmatpush.msrb.mxu0 %v2823_v20  ;;  %1848 = vmatpush.msra.mxu1 %v2821_v16 }
 0xe92   :  { %1829 = vmatpush.msrb.mxu0 %v2843_v28  ;;  %1849 = vmatpush.msra.mxu1 %v2841_v27 }
 0xe94   :  { %1830 = vmatpush.msrb.mxu0 %v2847_v19  ;;  %1850 = vmatpush.msra.mxu1 %v2845_v29 }
 0xe96   :  { %1831 = vmatpush.msrb.mxu0 %v2859_v34  ;;  %1851 = vmatpush.msra.mxu1 %v2857_v33 }
 0xe98   :  { %1832 = vmatpush.msrb.mxu0 %v2863_v36  ;;  %1852 = vmatpush.msra.mxu1 %v2861_v35 }
 0xe9a   :  { %1833 = vmatpush.msrb.mxu0 %v2875_v39  ;;  %1853 = vmatpush.msra.mxu1 %v2873_v38 }
 0xef8   :  { %v1611_v62 = vpop.f32.mrf.mxu0  ;;  %v1631_v63 = vpop.f32.mrf.mxu1 }
 0xef9   :  { %v1632_v56 = vadd.f32 %v1631_v63, %v1611_v62 }
 0xefb   :  { %vm1634_vm9 = vcmp.ge.f32.partialorder %v1632_v56, 50.0 }
 0xefc   :  { %v1635_v54 = vsel %vm1634_vm9, %v1582_v49, %v1579_v40  ;;  %v1636_v6 = vsel %vm1634_vm9, %v1580_v44, %v1582_v49 }
 0xefd   :  { %v1637_v61 = vadd.f32 %v1636_v6, %v1635_v54 }
 0xeff   :  { %v1638_v42 = vmul.f32 0.5, %v1637_v61 }
 0xf01   :  { %1641 = vperm.xlu0 %2291, %v1638_v42  }
 0xf73   :  { %v1642_v60 = vpop.permute.xlu0 %1641 }
 0xf74   :  { %vm1644_vm10 = vcmp.gt.f32.partialorder %v2947_v46, %v1642_v60  ;;  %vm1645_vm11 = vcmp.gt.f32.partialorder %v2949_v47, %v1642_v60 }
 0xf75   :  { %2081 = vmatmul.msk.f32.vlgmr.msra.gmra.mxu2 %vm1644_vm10, %v2517_v48  ;;  %2082 = vmatmul.msk.f32.vlgmr.msra.gmra.mxu3 %vm1645_vm11, %v2517_v48 }
 0xf76   :  { %1874 = vmatpush.msra.mxu2 %v2753_v55  ;;  %1894 = vmatpush.msra.mxu3 %v2751_v53 }
 0xf78   :  { %1875 = vmatpush.msra.mxu2 %v2749_v51  ;;  %1895 = vmatpush.msra.mxu3 %v2747_v50 }
 0xf7a   :  { %1876 = vmatpush.msra.mxu2 %v2757_v58  ;;  %1896 = vmatpush.msra.mxu3 %v2755_v57 }
 0xf7c   :  { %1877 = vmatpush.msra.mxu2 %v2777_v17  ;;  %1897 = vmatpush.msra.mxu3 %v2775_v3  ;;  %v2343_v3 = vld [vmem:[#allocation7 + $0x1a8] sm:$0xff] }
 0xf7d   :  { %v2344_v17 = vld [vmem:[#allocation7 + $0x228] sm:$0xff] }
 0xf7e   :  { %1878 = vmatpush.msra.mxu2 %v2773_v2  ;;  %1898 = vmatpush.msra.mxu3 %v2771_v1 }
 0xf80   :  { %1879 = vmatpush.msra.mxu2 %v2781_v5  ;;  %1899 = vmatpush.msra.mxu3 %v2779_v4  ;;  %v2345_v4 = vld [vmem:[#allocation7 + $0x1a0] sm:$0xff] }
 0xf81   :  { %v2346_v5 = vld [vmem:[#allocation7 + $0x220] sm:$0xff] }
 0xf82   :  { %1880 = vmatpush.msra.mxu2 %v2801_v10  ;;  %1900 = vmatpush.msra.mxu3 %v2799_v9  ;;  %v2349_v9 = vld [vmem:[#allocation7 + $0x190] sm:$0xff] }
 0xf83   :  { %v2350_v10 = vld [vmem:[#allocation7 + $0x210] sm:$0xff] }
 0xf84   :  { %1881 = vmatpush.msra.mxu2 %v2797_v8  ;;  %1901 = vmatpush.msra.mxu3 %v2795_v7  ;;  %v2347_v7 = vld [vmem:[#allocation7 + $0x198] sm:$0xff] }
 0xf85   :  { %v2348_v8 = vld [vmem:[#allocation7 + $0x218] sm:$0xff] }
 0xf86   :  { %1882 = vmatpush.msra.mxu2 %v2805_v52  ;;  %1902 = vmatpush.msra.mxu3 %v2803_v11  ;;  %v2351_v11 = vld [vmem:[#allocation7 + $0x188] sm:$0xff] }
 0xf87   :  { %v2352_v52 = vld [vmem:[#allocation7 + $0x208] sm:$0xff] }
 0xf88   :  { %1883 = vmatpush.msra.mxu2 %v2819_v15  ;;  %1903 = vmatpush.msra.mxu3 %v2817_v0  ;;  %v2353_v0 = vld [vmem:[#allocation7 + $0x180] sm:$0xff] }
 0xf89   :  { %v2354_v15 = vld [vmem:[#allocation7 + $0x200] sm:$0xff] }
 0xf8a   :  { %1884 = vmatpush.msra.mxu2 %v2823_v20  ;;  %1904 = vmatpush.msra.mxu3 %v2821_v16  ;;  %v2355_v16 = vld [vmem:[#allocation7 + $0x178] sm:$0xff] }
 0xf8b   :  { %v2356_v20 = vld [vmem:[#allocation7 + $0x1f8] sm:$0xff] }
 0xf8c   :  { %1885 = vmatpush.msra.mxu2 %v2843_v28  ;;  %1905 = vmatpush.msra.mxu3 %v2841_v27  ;;  %v2357_v27 = vld [vmem:[#allocation7 + $0x170] sm:$0xff] }
 0xf8d   :  { %v2358_v28 = vld [vmem:[#allocation7 + $0x1f0] sm:$0xff] }
 0xf8e   :  { %1886 = vmatpush.msra.mxu2 %v2847_v19  ;;  %1906 = vmatpush.msra.mxu3 %v2845_v29  ;;  %v2359_v29 = vld [vmem:[#allocation7 + $0x168] sm:$0xff] }
 0xf8f   :  { %v2360_v19 = vld [vmem:[#allocation7 + $0x1e8] sm:$0xff] }
 0xf90   :  { %1887 = vmatpush.msra.mxu2 %v2859_v34  ;;  %1907 = vmatpush.msra.mxu3 %v2857_v33  ;;  %v2361_v33 = vld [vmem:[#allocation7 + $0x160] sm:$0xff] }
 0xf91   :  { %v2362_v34 = vld [vmem:[#allocation7 + $0x1e0] sm:$0xff] }
 0xf92   :  { %1888 = vmatpush.msra.mxu2 %v2863_v36  ;;  %1908 = vmatpush.msra.mxu3 %v2861_v35  ;;  %v2363_v35 = vld [vmem:[#allocation7 + $0x158] sm:$0xff] }
 0xf93   :  { %v2364_v36 = vld [vmem:[#allocation7 + $0x1d8] sm:$0xff] }
 0xf94   :  { %1889 = vmatpush.msra.mxu2 %v2875_v39  ;;  %1909 = vmatpush.msra.mxu3 %v2873_v38  ;;  %v2365_v38 = vld [vmem:[#allocation7 + $0x150] sm:$0xff] }
 0xf95   :  { %v2366_v39 = vld [vmem:[#allocation7 + $0x1d0] sm:$0xff] }
 0xff8   :  { %v1667_v50 = vpop.f32.mrf.mxu2  ;;  %v1687_v51 = vpop.f32.mrf.mxu3 }
 0xff9   :  { %v1688_v53 = vadd.f32 %v1687_v51, %v1667_v50 }
 0xffb   :  { %vm1690_vm12 = vcmp.ge.f32.partialorder %v1688_v53, 50.0 }
 0xffc   :  { %v3383_v55 = vsel %vm1690_vm12, %v1638_v42, %v1635_v54  ;;  %v3385_v57 = vsel %vm1690_vm12, %v1636_v6, %v1638_v42 }
 0xffd   :  { %v1693_v58 = vadd.f32 %v3385_v57, %v3383_v55 }
 0xfff   :  { %v3389_v1 = vmul.f32 0.5, %v1693_v58 }
0x1001   :  { %1697 = vperm.xlu2 %2290, %v3389_v1  }
0x105b   :  { %v1698_v2 = vpop.permute.xlu2 %1697 }
0x105c   :  { %vm1700_vm13 = vcmp.gt.f32.partialorder %v2947_v46, %v1698_v2  ;;  %vm1701_vm14 = vcmp.gt.f32.partialorder %v2949_v47, %v1698_v2 }
0x105d   :  { %2085 = vmatmul.msk.f32.vlgmr.msra.gmra.mxu0 %vm1700_vm13, %v2517_v48  ;;  %2086 = vmatmul.msk.f32.vlgmr.msrb.gmra.mxu1 %vm1701_vm14, %v2517_v48 }
0x105e   :  { %1925 = vmatpush.msra.mxu0 %v2343_v3  ;;  %1945 = vmatpush.msrb.mxu1 %v2344_v17 }
0x1060   :  { %1926 = vmatpush.msra.mxu0 %v2345_v4  ;;  %1946 = vmatpush.msrb.mxu1 %v2346_v5 }
0x1062   :  { %1927 = vmatpush.msra.mxu0 %v2347_v7  ;;  %1947 = vmatpush.msrb.mxu1 %v2348_v8 }
0x1064   :  { %1928 = vmatpush.msra.mxu0 %v2349_v9  ;;  %1948 = vmatpush.msrb.mxu1 %v2350_v10 }
0x1066   :  { %1929 = vmatpush.msra.mxu0 %v2351_v11  ;;  %1949 = vmatpush.msrb.mxu1 %v2352_v52 }
0x1068   :  { %1930 = vmatpush.msra.mxu0 %v2353_v0  ;;  %1950 = vmatpush.msrb.mxu1 %v2354_v15 }
0x106a   :  { %1931 = vmatpush.msra.mxu0 %v2355_v16  ;;  %1951 = vmatpush.msrb.mxu1 %v2356_v20 }
0x106c   :  { %1932 = vmatpush.msra.mxu0 %v2357_v27  ;;  %1952 = vmatpush.msrb.mxu1 %v2358_v28 }
0x106e   :  { %1933 = vmatpush.msra.mxu0 %v2359_v29  ;;  %1953 = vmatpush.msrb.mxu1 %v2360_v19 }
0x1070   :  { %1934 = vmatpush.msra.mxu0 %v2361_v33  ;;  %1954 = vmatpush.msrb.mxu1 %v2362_v34 }
0x1072   :  { %1935 = vmatpush.msra.mxu0 %v2363_v35  ;;  %1955 = vmatpush.msrb.mxu1 %v2364_v36 }
0x1074   :  { %1936 = vmatpush.msra.mxu0 %v2365_v38  ;;  %1956 = vmatpush.msrb.mxu1 %v2366_v39 }
0x1076   :  { %1937 = vmatpush.msra.mxu0 %v2367_v12  ;;  %1957 = vmatpush.msrb.mxu1 %v2368_v13 }
0x1078   :  { %1938 = vmatpush.msra.mxu0 %v2369_v14  ;;  %1958 = vmatpush.msrb.mxu1 %v2370_v21 }
0x107a   :  { %1939 = vmatpush.msra.mxu0 %v2371_v22  ;;  %1959 = vmatpush.msrb.mxu1 %v2372_v23 }
0x107c   :  { %1940 = vmatpush.msra.mxu0 %v2373_v24  ;;  %1960 = vmatpush.msrb.mxu1 %v2374_v25 }
0x10da   :  { %v1723_v26 = vpop.f32.mrf.mxu0  ;;  %v1743_v30 = vpop.f32.mrf.mxu1 }
0x10db   :  { %v1744_v31 = vadd.f32 %v1743_v30, %v1723_v26 }
0x10dd   :  { %vm1746_vm15 = vcmp.ge.f32.partialorder %v1744_v31, 50.0 }
0x10de   :  { %v1747_v37 = vsel %vm1746_vm15, %v3389_v1, %v3383_v55  ;;  %v1748_v41 = vsel %vm1746_vm15, %v3385_v57, %v3389_v1 }
0x10df   :  { %v1749_v43 = vadd.f32 %v1748_v41, %v1747_v37 }
0x10e1   :  { %v1750_v40 = vmul.f32 0.5, %v1749_v43 }
0x10e3   :  { %1753 = vperm.xlu1 %2292, %v1750_v40  }
0x1155   :  { %v1754_v44 = vpop.permute.xlu1 %1753 }
0x1156   :  { %vm1756_vm0 = vcmp.gt.f32.partialorder %v2947_v46, %v1754_v44  ;;  %vm1757_vm4 = vcmp.gt.f32.partialorder %v2949_v47, %v1754_v44 }
0x1157   :  { %2089 = vmatmul.msk.f32.vlgmr.msrb.gmra.mxu2 %vm1756_vm0, %v2517_v48  ;;  %2090 = vmatmul.msk.f32.vlgmr.msrb.gmra.mxu3 %vm1757_vm4, %v2517_v48  ;;  %vm1991_vm4 = vcmask 785408  }
0x11da   :  { %v1779_v45 = vpop.f32.mrf.mxu2  ;;  %v1799_v49 = vpop.f32.mrf.mxu3 }
0x11db   :  { %v1800_v59 = vadd.f32 %v1799_v49, %v1779_v45 }
0x11dd   :  { %vm1802_vm5 = vcmp.ge.f32.partialorder %v1800_v59, 50.0 }
0x11de   :  { %v1803_v62 = vsel %vm1802_vm5, %v1750_v40, %v1747_v37  ;;  %v1804_v63 = vsel %vm1802_vm5, %v1748_v41, %v1750_v40 }
0x11df   :  { %v1805_v56 = vadd.f32 %v1804_v63, %v1803_v62 }
0x11e1   :  { %v1806_v54 = vmul.f32 0.5, %v1805_v56 }
0x11e3   :  { %1809 = vperm.xlu0 %2291, %v1806_v54  }
0x1255   :  { %v1810_v6 = vpop.permute.xlu0 %1809 }
0x1256   :  { %vm1812_vm6 = vcmp.gt.f32.partialorder %v2947_v46, %v1810_v6  ;;  %vm1813_vm7 = vcmp.gt.f32.partialorder %v2949_v47, %v1810_v6 }
0x1257   :  { %2093 = vmatmul.msk.f32.vlgmr.msrb.gmra.mxu0 %vm1812_vm6, %v2517_v48  ;;  %2094 = vmatmul.msk.f32.vlgmr.msra.gmra.mxu1 %vm1813_vm7, %v2517_v48 }
0x12d4   :  { %v1835_v61 = vpop.f32.mrf.mxu0  ;;  %v1855_v42 = vpop.f32.mrf.mxu1 }
0x12d5   :  { %v1856_v60 = vadd.f32 %v1855_v42, %v1835_v61 }
0x12d7   :  { %vm1858_vm8 = vcmp.ge.f32.partialorder %v1856_v60, 50.0 }
0x12d8   :  { %v1859_v50 = vsel %vm1858_vm8, %v1806_v54, %v1803_v62  ;;  %v1860_v51 = vsel %vm1858_vm8, %v1804_v63, %v1806_v54 }
0x12d9   :  { %v1861_v53 = vadd.f32 %v1860_v51, %v1859_v50 }
0x12db   :  { %v1862_v55 = vmul.f32 0.5, %v1861_v53 }
0x12dd   :  { %1865 = vperm.xlu2 %2290, %v1862_v55  }
0x12e5   :  { %1981 = vrot.lane.b32.xlu2 %v2735_v32, %s2515_s12 }
0x1337   :  { %v1866_v57 = vpop.permute.xlu2 %1865 }
0x1338   :  { %vm1868_vm9 = vcmp.gt.f32.partialorder %v2947_v46, %v1866_v57  ;;  %vm1869_vm10 = vcmp.gt.f32.partialorder %v2949_v47, %v1866_v57 }
0x1339   :  { %2097 = vmatmul.msk.f32.vlgmr.msra.gmra.mxu2 %vm1868_vm9, %v2517_v48  ;;  %2098 = vmatmul.msk.f32.vlgmr.msra.gmra.mxu3 %vm1869_vm10, %v2517_v48 }
0x133f   :  { %v1982_v16 = vpop.permute.xlu2 %1981 }
0x13bc   :  { %v1891_v58 = vpop.f32.mrf.mxu2  ;;  %v1911_v1 = vpop.f32.mrf.mxu3 }
0x13bd   :  { %v1912_v2 = vadd.f32 %v1911_v1, %v1891_v58 }
0x13bf   :  { %vm1914_vm11 = vcmp.ge.f32.partialorder %v1912_v2, 50.0 }
0x13c0   :  { %v1915_v3 = vsel %vm1914_vm11, %v1862_v55, %v1859_v50 }
0x13c1   :  { %1918 = vperm.xlu1 %2292, %v1915_v3  }
0x13c9   :  { %1985 = vrot.lane.b32.xlu1 %v2726_v18, %s2514_s11 }
0x1433   :  { %v1919_v17 = vpop.permute.xlu1 %1918 }
0x1434   :  { %vm1921_vm12 = vcmp.gt.f32.partialorder %v2947_v46, %v1919_v17  ;;  %vm1922_vm13 = vcmp.gt.f32.partialorder %v2949_v47, %v1919_v17 }
0x1435   :  { %2099 = vmatmul.msk.f32.vlgmr.msra.gmra.mxu0 %vm1921_vm12, %v2947_v46  ;;  %2100 = vmatmul.msk.f32.vlgmr.msrb.gmra.mxu1 %vm1922_vm13, %v2949_v47 }
0x143b   :  { %v1986_v27 = vpop.permute.xlu1 %1985 }
0x14b2   :  { %v1942_v32 = vpop.f32.mrf.mxu0  ;;  %v1962_v48 = vpop.f32.mrf.mxu1 }
0x14b3   :  { %v1963_v4 = vadd.f32 %v1962_v48, %v1942_v32 }
0x14b5   :  { %v1965_v5 = vmul.f32 %v1963_v4, %v1963_v4 }
0x14b7   :  { %v1966_v7 = vsel %vm156_vm1, %v1965_v5, 0.0 }
0x14b8   :  { %1967 = vadd.xlane.f32.xlu0 %v1966_v7 }
0x152b   :  { %v1968_v8 = vpop.xlane.xlu0 %1967 }
0x152c   :  { %v1969_v9 = vadd.f32 1e-12, %v1968_v8 }
0x152e   :  { %2341 = vrsqrt.f32 %v1969_v9  ;;  %vm1976_vm15 = vweird.f32 %v1969_v9 }
0x1534   :  { %v2342_v18 = vpop.eup %2341 }
0x1535   :  { %v1971_v10 = vmul.f32 %v2342_v18, %v1969_v9  ;;  %vm1977_vm14 = vweird.f32 %v2342_v18 }
0x1536   :  { %vm1978_vm0 = vmor %vm1976_vm15, %vm1977_vm14 }
0x1537   :  { %v1972_v11 = vmul.f32 %v2342_v18, %v1971_v10 }
0x1539   :  { %v1973_v52 = vmul.f32 0.5, %v1972_v11 }
0x153b   :  { %v1974_v0 = vsub.f32 1.5, %v1973_v52 }
0x153d   :  { %v1975_v15 = vmul.f32 %v2342_v18, %v1974_v0 }
0x153f   :  { %v1979_v46 = vsel %vm1978_vm0, %v2342_v18, %v1975_v15 }
0x1540   :  { %v1980_v47 = vmul.f32 %v1979_v46, %v1963_v4 }
0x1542   :  { %v1988_v20 = vsel %vm156_vm1, %v1980_v47, 0.0 }
0x1543   :  { %v1989_v28 = vsel %vm117_vm3, %v1988_v20, %v1982_v16 }
0x1544   :  { %v1990_v29 = vsel %vm92_vm2, %v1989_v28, %v1986_v27 }
0x1545   :  { %v1992_v19 = vsel %vm1991_vm4, %v1990_v29, 0.0 }
0x1546   :  { %1993 = vst [vmem:[#allocation10] sm:$0xff] %v1992_v19 }
0x1547   :  { %2004 = dma.vmem_to_hbm [thread:$0]  %s2000_s14, 128, %s2002_s17, [#allocation4]  }
0x1548   :  { %2501 = dma.done.wait [#allocation4], 128  }
0x1549   :  { %2502 = vsyncadd [#allocation4], 4294967168 }
0x154a   :  { %2009 = vsyncpa [#allocation3], 1 }
0x154b   :  { %2010 = vsyncpa [#allocation6], 1 }
0x154c   :  { %2011 = vsyncpa [#allocation9], 1 }
0x154d   :  { %2012 = vsyncpa [#allocation4], 1 }

</bundles_post_ra>
